<compile_context>
chip_gen: v5e
topology: v5e:2x2
jax: 0.10.0
libtpu: 0.0.40
codegen_flags: <defaults>
</compile_context>

<pallas_src>
import numpy as np

import jax
import jax.numpy as jnp
from jax.experimental import pallas as pl
from jax.experimental.pallas import tpu as pltpu


# ----------------------- constant selection matrices -------------------------
# Conv2 selection: for tap t=(ky,kx), row (dy*2+dx)*32 + qr*5+qc of S2[t] picks
# p1 row (2qr+dy+ky)*13 + (2qc+dx+kx).  Rows 25..31 of each 32-row parity block
# are zero padding (kept only for 8-aligned slicing).
def _build_s2():
    s2 = np.zeros((9, 128, 169), np.float32)
    for ky in range(3):
        for kx in range(3):
            t = ky * 3 + kx
            for dy in range(2):
                for dx in range(2):
                    blk = dy * 2 + dx
                    for qr in range(5):
                        for qc in range(5):
                            dst = blk * 32 + qr * 5 + qc
                            src = (2 * qr + dy + ky) * 13 + (2 * qc + dx + kx)
                            s2[t, dst, src] = 1.0
    return s2


# Conv3 selection: row r*3+c of S3[t] picks p2 row (r+ky)*5 + (c+kx).
def _build_s3():
    s3 = np.zeros((9, 9, 25), np.float32)
    for ky in range(3):
        for kx in range(3):
            t = ky * 3 + kx
            for r in range(3):
                for c in range(3):
                    s3[t, r * 3 + c, (r + ky) * 5 + (c + kx)] = 1.0
    return s3


_S2 = _build_s2()
_S3 = _build_s3()


# ------------------------------- fused kernel --------------------------------

def _fused_kernel(patches_ref, w1_ref, b1_ref, s2_ref, w2_ref, b2_ref,
                  s3_ref, w3_ref, b3_ref, w4_ref, b4_ref, out_ref):
    f32 = jnp.float32
    bf16 = jnp.bfloat16

    # ---- conv1 (Cin=1) as one GEMM on pool-parity-ordered im2col patches ----
    y1 = jnp.dot(patches_ref[0], w1_ref[...], preferred_element_type=f32)  # (704,32)
    # maxpool 2x2: max over the 4 parity blocks (176 rows each, 169 valid),
    # then bias + ReLU (pool->relu order == relu(max)+bias, exactly nn.Sequential).
    p1 = jnp.maximum(jnp.maximum(y1[0:169], y1[176:345]),
                     jnp.maximum(y1[352:521], y1[528:697]))
    p1 = jnp.maximum(p1 + b1_ref[...], 0.0)                 # (169, 32) f32
    p1 = p1.astype(bf16)

    # ---- conv2 + maxpool + ReLU (in-kernel im2col via selection matmuls) ----
    acc2 = jnp.zeros((128, 64), f32)
    for t in range(9):
        gathered = jnp.dot(s2_ref[t], p1, preferred_element_type=f32)       # (128,32)
        acc2 = acc2 + jnp.dot(gathered.astype(bf16), w2_ref[t],
                              preferred_element_type=f32)                   # (128,64)
    p2 = jnp.maximum(jnp.maximum(acc2[0:25], acc2[32:57]),
                     jnp.maximum(acc2[64:89], acc2[96:121]))
    p2 = jnp.maximum(p2 + b2_ref[...], 0.0)                 # (25, 64) f32
    p2 = p2.astype(bf16)

    # ---- conv3 + ReLU ----
    acc3 = jnp.zeros((9, 128), f32)
    for t in range(9):
        gathered = jnp.dot(s3_ref[t], p2, preferred_element_type=f32)       # (9,64)
        acc3 = acc3 + jnp.dot(gathered.astype(bf16), w3_ref[t],
                              preferred_element_type=f32)                   # (9,128)
    y3 = jnp.maximum(acc3 + b3_ref[...], 0.0).astype(bf16)  # (9, 128)

    # ---- conv4 (1x1 spatial output): 9 row slices of y3 against the 9 taps ----
    acc4 = b4_ref[...]                                       # (1, 10) f32
    for t in range(9):
        acc4 = acc4 + jnp.dot(y3[t:t + 1, :], w4_ref[t],
                              preferred_element_type=f32)    # (1, 10)

    # ---- softmax epilogue (f32, exact divide) ----
    z = acc4 - jnp.max(acc4, axis=-1, keepdims=True)
    e = jnp.exp(z)
    out_ref[0] = e / jnp.sum(e, axis=-1, keepdims=True)


# ------------------------------ wrapper / glue --------------------------------

def _conv1_pool_patches(x_nchw):
    """im2col of the raw 28x28 input for conv1, row-ordered as
    (pool parity dy,dx) x (pooled position pr,pc) with each parity block padded
    to 176 rows -> (N, 704, 9).  This is the only XLA-side data prep (tiny)."""
    x = x_nchw[:, 0, :, :].astype(jnp.float32)              # (N, 28, 28)
    n = x.shape[0]
    blocks = []
    for dy in range(2):
        for dx in range(2):
            taps = []
            for ky in range(3):
                for kx in range(3):
                    r0, c0 = dy + ky, dx + kx
                    sl = x[:, r0:r0 + 26:2, c0:c0 + 26:2]   # (N, 13, 13)
                    taps.append(sl.reshape(n, 169))
            blk = jnp.stack(taps, axis=-1)                  # (N, 169, 9)
            blk = jnp.pad(blk, ((0, 0), (0, 7), (0, 0)))    # (N, 176, 9)
            blocks.append(blk)
    return jnp.concatenate(blocks, axis=1)                  # (N, 704, 9)


def _const_spec(shape):
    zeros = (0,) * len(shape)
    return pl.BlockSpec(shape, lambda n, _z=zeros: _z)


@jax.jit
def net_mnist_forward(x_nchw, params):
    (w1, b1), (w2, b2), (w3, b3), (w4, b4) = params
    n = x_nchw.shape[0]

    patches = _conv1_pool_patches(x_nchw).astype(jnp.bfloat16)      # (N, 704, 9)
    w1m = w1.reshape(9, 32).astype(jnp.bfloat16)
    w2m = w2.reshape(9, 32, 64).astype(jnp.bfloat16)
    w3m = w3.reshape(9, 64, 128).astype(jnp.bfloat16)
    w4m = w4.reshape(9, 128, 10).astype(jnp.bfloat16)
    b1r = b1.reshape(1, 32).astype(jnp.float32)
    b2r = b2.reshape(1, 64).astype(jnp.float32)
    b3r = b3.reshape(1, 128).astype(jnp.float32)
    b4r = b4.reshape(1, 10).astype(jnp.float32)
    s2 = jnp.asarray(_S2, jnp.bfloat16)
    s3 = jnp.asarray(_S3, jnp.bfloat16)

    out = pl.pallas_call(
        _fused_kernel,
        out_shape=jax.ShapeDtypeStruct((n, 1, 10), jnp.float32),
        grid=(n,),
        in_specs=[
            pl.BlockSpec((1, 704, 9), lambda i: (i, 0, 0)),   # per-sample patches
            _const_spec((9, 32)),    _const_spec((1, 32)),    # w1, b1
            _const_spec((9, 128, 169)),                       # S2
            _const_spec((9, 32, 64)), _const_spec((1, 64)),   # w2, b2
            _const_spec((9, 9, 25)),                          # S3
            _const_spec((9, 64, 128)), _const_spec((1, 128)), # w3, b3
            _const_spec((9, 128, 10)), _const_spec((1, 10)),  # w4, b4
        ],
        out_specs=pl.BlockSpec((1, 1, 10), lambda i: (i, 0, 0)),
        compiler_params=pltpu.CompilerParams(
            dimension_semantics=("parallel",)),
    )(patches, w1m, b1r, s2, w2m, b2r, s3, w3m, b3r, w4m, b4r)

    return out.reshape(n, 10)


# --------------------------------- params --------------------------------------

def init_params(key):
    """nn.init.normal_(param, mean=0, std=0.1) for every conv weight and bias."""
    base = 32
    shapes = [
        ((3, 3, 1, base), (base,)),                 # Conv2d(1, 32, 3)
        ((3, 3, base, 2 * base), (2 * base,)),      # Conv2d(32, 64, 3)
        ((3, 3, 2 * base, 4 * base), (4 * base,)),  # Conv2d(64, 128, 3)
        ((3, 3, 4 * base, 10), (10,)),              # Conv2d(128, 10, 3)
    ]
    params = []
    for ws, bs in shapes:
        key, kw, kb = jax.random.split(key, 3)
        params.append((0.1 * jax.random.normal(kw, ws, jnp.float32),
                       0.1 * jax.random.normal(kb, bs, jnp.float32)))
    return params


if __name__ == "__main__":
    key = jax.random.PRNGKey(0)
    kx, kp = jax.random.split(key)
    # MNIST-shaped input (spatial must be 28x28 so the last conv yields 1x1).
    x = jax.random.normal(kx, (2, 1, 28, 28), jnp.float32)
    params = init_params(kp)

    out = jax.block_until_ready(net_mnist_forward(x, params))

    assert out.shape == (2, 10), out.shape
    assert bool(jnp.all(jnp.isfinite(out)))
    assert bool(jnp.allclose(jnp.sum(out, axis=-1), 1.0, atol=1e-4))
    print("KERNEL_OK")
</pallas_src>

<mosaic_0001>
module attributes {stable_mosaic.version = 11 : i64} {
  func.func @_fused_kernel(%arg0: i32, %arg1: memref<1x704x9xbf16, #tpu.memory_space<vmem>>, %arg2: memref<9x32xbf16, #tpu.memory_space<vmem>>, %arg3: memref<1x32xf32, #tpu.memory_space<vmem>>, %arg4: memref<9x128x169xbf16, #tpu.memory_space<vmem>>, %arg5: memref<9x32x64xbf16, #tpu.memory_space<vmem>>, %arg6: memref<1x64xf32, #tpu.memory_space<vmem>>, %arg7: memref<9x9x25xbf16, #tpu.memory_space<vmem>>, %arg8: memref<9x64x128xbf16, #tpu.memory_space<vmem>>, %arg9: memref<1x128xf32, #tpu.memory_space<vmem>>, %arg10: memref<9x128x10xbf16, #tpu.memory_space<vmem>>, %arg11: memref<1x10xf32, #tpu.memory_space<vmem>>, %arg12: memref<1x1x10xf32, #tpu.memory_space<vmem>>) attributes {dimension_semantics = [#tpu.dimension_semantics<parallel>], iteration_bounds = array<i64: 2>, scalar_prefetch = 0 : i64, scratch_operands = 0 : i64, tpu.core_type = #tpu.core_type<tc>, window_params = [{transform_indices = @transform_0, window_bounds = array<i64: 1, 704, 9>}, {pipeline_mode = #tpu.pipeline_mode<synchronous>, transform_indices = @transform_1, window_bounds = array<i64: 9, 32>}, {pipeline_mode = #tpu.pipeline_mode<synchronous>, transform_indices = @transform_2, window_bounds = array<i64: 1, 32>}, {pipeline_mode = #tpu.pipeline_mode<synchronous>, transform_indices = @transform_3, window_bounds = array<i64: 9, 128, 169>}, {pipeline_mode = #tpu.pipeline_mode<synchronous>, transform_indices = @transform_4, window_bounds = array<i64: 9, 32, 64>}, {pipeline_mode = #tpu.pipeline_mode<synchronous>, transform_indices = @transform_5, window_bounds = array<i64: 1, 64>}, {pipeline_mode = #tpu.pipeline_mode<synchronous>, transform_indices = @transform_6, window_bounds = array<i64: 9, 9, 25>}, {pipeline_mode = #tpu.pipeline_mode<synchronous>, transform_indices = @transform_7, window_bounds = array<i64: 9, 64, 128>}, {pipeline_mode = #tpu.pipeline_mode<synchronous>, transform_indices = @transform_8, window_bounds = array<i64: 1, 128>}, {pipeline_mode = #tpu.pipeline_mode<synchronous>, transform_indices = @transform_9, window_bounds = array<i64: 9, 128, 10>}, {pipeline_mode = #tpu.pipeline_mode<synchronous>, transform_indices = @transform_10, window_bounds = array<i64: 1, 10>}, {transform_indices = @transform_11, window_bounds = array<i64: 1, 1, 10>}]} {
    %c0 = arith.constant 0 : index
    %c0_0 = arith.constant 0 : index
    %c0_1 = arith.constant 0 : index
    %0 = vector.load %arg1[%c0, %c0_0, %c0_1] : memref<1x704x9xbf16, #tpu.memory_space<vmem>>, vector<1x704x9xbf16>
    %1 = vector.shape_cast %0 : vector<1x704x9xbf16> to vector<704x9xbf16>
    %c0_2 = arith.constant 0 : index
    %c0_3 = arith.constant 0 : index
    %2 = vector.load %arg2[%c0_2, %c0_3] : memref<9x32xbf16, #tpu.memory_space<vmem>>, vector<9x32xbf16>
    %cst = arith.constant dense<0.000000e+00> : vector<704x32xf32>
    %3 = tpu.matmul %1, %2, %cst {dimension_numbers = #tpu.dot_dimension_numbers<[1], [0], [0], [1], [0, 0, 1, 1], [], []>} : vector<704x9xbf16>, vector<9x32xbf16>, vector<704x32xf32> -> vector<704x32xf32>
    %4 = vector.extract_strided_slice %3 {offsets = [0, 0], sizes = [169, 32], strides = [1, 1]} : vector<704x32xf32> to vector<169x32xf32>
    %5 = vector.extract_strided_slice %3 {offsets = [176, 0], sizes = [169, 32], strides = [1, 1]} : vector<704x32xf32> to vector<169x32xf32>
    %6 = arith.maximumf %4, %5 : vector<169x32xf32>
    %7 = vector.extract_strided_slice %3 {offsets = [352, 0], sizes = [169, 32], strides = [1, 1]} : vector<704x32xf32> to vector<169x32xf32>
    %8 = vector.extract_strided_slice %3 {offsets = [528, 0], sizes = [169, 32], strides = [1, 1]} : vector<704x32xf32> to vector<169x32xf32>
    %9 = arith.maximumf %7, %8 : vector<169x32xf32>
    %10 = arith.maximumf %6, %9 : vector<169x32xf32>
    %c0_4 = arith.constant 0 : index
    %c0_5 = arith.constant 0 : index
    %11 = vector.load %arg3[%c0_4, %c0_5] : memref<1x32xf32, #tpu.memory_space<vmem>>, vector<1x32xf32>
    %12 = vector.broadcast %11 : vector<1x32xf32> to vector<169x32xf32>
    %13 = arith.addf %10, %12 : vector<169x32xf32>
    %cst_6 = arith.constant 0.000000e+00 : f32
    %14 = vector.broadcast %cst_6 : f32 to vector<169x32xf32>
    %15 = arith.maximumf %13, %14 : vector<169x32xf32>
    %16 = arith.truncf %15 : vector<169x32xf32> to vector<169x32xbf16>
    %cst_7 = arith.constant 0.000000e+00 : f32
    %17 = vector.broadcast %cst_7 : f32 to vector<128x64xf32>
    %c0_8 = arith.constant 0 : index
    %c0_9 = arith.constant 0 : index
    %c0_10 = arith.constant 0 : index
    %18 = vector.load %arg4[%c0_8, %c0_9, %c0_10] : memref<9x128x169xbf16, #tpu.memory_space<vmem>>, vector<1x128x169xbf16>
    %19 = vector.shape_cast %18 : vector<1x128x169xbf16> to vector<128x169xbf16>
    %cst_11 = arith.constant dense<0.000000e+00> : vector<128x32xf32>
    %20 = tpu.matmul %19, %16, %cst_11 {dimension_numbers = #tpu.dot_dimension_numbers<[1], [0], [0], [1], [0, 0, 1, 1], [], []>} : vector<128x169xbf16>, vector<169x32xbf16>, vector<128x32xf32> -> vector<128x32xf32>
    %21 = arith.truncf %20 : vector<128x32xf32> to vector<128x32xbf16>
    %c0_12 = arith.constant 0 : index
    %c0_13 = arith.constant 0 : index
    %c0_14 = arith.constant 0 : index
    %22 = vector.load %arg5[%c0_12, %c0_13, %c0_14] : memref<9x32x64xbf16, #tpu.memory_space<vmem>>, vector<1x32x64xbf16>
    %23 = vector.shape_cast %22 : vector<1x32x64xbf16> to vector<32x64xbf16>
    %cst_15 = arith.constant dense<0.000000e+00> : vector<128x64xf32>
    %24 = tpu.matmul %21, %23, %cst_15 {dimension_numbers = #tpu.dot_dimension_numbers<[1], [0], [0], [1], [0, 0, 1, 1], [], []>} : vector<128x32xbf16>, vector<32x64xbf16>, vector<128x64xf32> -> vector<128x64xf32>
    %25 = arith.addf %17, %24 : vector<128x64xf32>
    %c1 = arith.constant 1 : index
    %c0_16 = arith.constant 0 : index
    %c0_17 = arith.constant 0 : index
    %26 = vector.load %arg4[%c1, %c0_16, %c0_17] : memref<9x128x169xbf16, #tpu.memory_space<vmem>>, vector<1x128x169xbf16>
    %27 = vector.shape_cast %26 : vector<1x128x169xbf16> to vector<128x169xbf16>
    %cst_18 = arith.constant dense<0.000000e+00> : vector<128x32xf32>
    %28 = tpu.matmul %27, %16, %cst_18 {dimension_numbers = #tpu.dot_dimension_numbers<[1], [0], [0], [1], [0, 0, 1, 1], [], []>} : vector<128x169xbf16>, vector<169x32xbf16>, vector<128x32xf32> -> vector<128x32xf32>
    %29 = arith.truncf %28 : vector<128x32xf32> to vector<128x32xbf16>
    %c1_19 = arith.constant 1 : index
    %c0_20 = arith.constant 0 : index
    %c0_21 = arith.constant 0 : index
    %30 = vector.load %arg5[%c1_19, %c0_20, %c0_21] : memref<9x32x64xbf16, #tpu.memory_space<vmem>>, vector<1x32x64xbf16>
    %31 = vector.shape_cast %30 : vector<1x32x64xbf16> to vector<32x64xbf16>
    %cst_22 = arith.constant dense<0.000000e+00> : vector<128x64xf32>
    %32 = tpu.matmul %29, %31, %cst_22 {dimension_numbers = #tpu.dot_dimension_numbers<[1], [0], [0], [1], [0, 0, 1, 1], [], []>} : vector<128x32xbf16>, vector<32x64xbf16>, vector<128x64xf32> -> vector<128x64xf32>
    %33 = arith.addf %25, %32 : vector<128x64xf32>
    %c2 = arith.constant 2 : index
    %c0_23 = arith.constant 0 : index
    %c0_24 = arith.constant 0 : index
    %34 = vector.load %arg4[%c2, %c0_23, %c0_24] : memref<9x128x169xbf16, #tpu.memory_space<vmem>>, vector<1x128x169xbf16>
    %35 = vector.shape_cast %34 : vector<1x128x169xbf16> to vector<128x169xbf16>
    %cst_25 = arith.constant dense<0.000000e+00> : vector<128x32xf32>
    %36 = tpu.matmul %35, %16, %cst_25 {dimension_numbers = #tpu.dot_dimension_numbers<[1], [0], [0], [1], [0, 0, 1, 1], [], []>} : vector<128x169xbf16>, vector<169x32xbf16>, vector<128x32xf32> -> vector<128x32xf32>
    %37 = arith.truncf %36 : vector<128x32xf32> to vector<128x32xbf16>
    %c2_26 = arith.constant 2 : index
    %c0_27 = arith.constant 0 : index
    %c0_28 = arith.constant 0 : index
    %38 = vector.load %arg5[%c2_26, %c0_27, %c0_28] : memref<9x32x64xbf16, #tpu.memory_space<vmem>>, vector<1x32x64xbf16>
    %39 = vector.shape_cast %38 : vector<1x32x64xbf16> to vector<32x64xbf16>
    %cst_29 = arith.constant dense<0.000000e+00> : vector<128x64xf32>
    %40 = tpu.matmul %37, %39, %cst_29 {dimension_numbers = #tpu.dot_dimension_numbers<[1], [0], [0], [1], [0, 0, 1, 1], [], []>} : vector<128x32xbf16>, vector<32x64xbf16>, vector<128x64xf32> -> vector<128x64xf32>
    %41 = arith.addf %33, %40 : vector<128x64xf32>
    %c3 = arith.constant 3 : index
    %c0_30 = arith.constant 0 : index
    %c0_31 = arith.constant 0 : index
    %42 = vector.load %arg4[%c3, %c0_30, %c0_31] : memref<9x128x169xbf16, #tpu.memory_space<vmem>>, vector<1x128x169xbf16>
    %43 = vector.shape_cast %42 : vector<1x128x169xbf16> to vector<128x169xbf16>
    %cst_32 = arith.constant dense<0.000000e+00> : vector<128x32xf32>
    %44 = tpu.matmul %43, %16, %cst_32 {dimension_numbers = #tpu.dot_dimension_numbers<[1], [0], [0], [1], [0, 0, 1, 1], [], []>} : vector<128x169xbf16>, vector<169x32xbf16>, vector<128x32xf32> -> vector<128x32xf32>
    %45 = arith.truncf %44 : vector<128x32xf32> to vector<128x32xbf16>
    %c3_33 = arith.constant 3 : index
    %c0_34 = arith.constant 0 : index
    %c0_35 = arith.constant 0 : index
    %46 = vector.load %arg5[%c3_33, %c0_34, %c0_35] : memref<9x32x64xbf16, #tpu.memory_space<vmem>>, vector<1x32x64xbf16>
    %47 = vector.shape_cast %46 : vector<1x32x64xbf16> to vector<32x64xbf16>
    %cst_36 = arith.constant dense<0.000000e+00> : vector<128x64xf32>
    %48 = tpu.matmul %45, %47, %cst_36 {dimension_numbers = #tpu.dot_dimension_numbers<[1], [0], [0], [1], [0, 0, 1, 1], [], []>} : vector<128x32xbf16>, vector<32x64xbf16>, vector<128x64xf32> -> vector<128x64xf32>
    %49 = arith.addf %41, %48 : vector<128x64xf32>
    %c4 = arith.constant 4 : index
    %c0_37 = arith.constant 0 : index
    %c0_38 = arith.constant 0 : index
    %50 = vector.load %arg4[%c4, %c0_37, %c0_38] : memref<9x128x169xbf16, #tpu.memory_space<vmem>>, vector<1x128x169xbf16>
    %51 = vector.shape_cast %50 : vector<1x128x169xbf16> to vector<128x169xbf16>
    %cst_39 = arith.constant dense<0.000000e+00> : vector<128x32xf32>
    %52 = tpu.matmul %51, %16, %cst_39 {dimension_numbers = #tpu.dot_dimension_numbers<[1], [0], [0], [1], [0, 0, 1, 1], [], []>} : vector<128x169xbf16>, vector<169x32xbf16>, vector<128x32xf32> -> vector<128x32xf32>
    %53 = arith.truncf %52 : vector<128x32xf32> to vector<128x32xbf16>
    %c4_40 = arith.constant 4 : index
    %c0_41 = arith.constant 0 : index
    %c0_42 = arith.constant 0 : index
    %54 = vector.load %arg5[%c4_40, %c0_41, %c0_42] : memref<9x32x64xbf16, #tpu.memory_space<vmem>>, vector<1x32x64xbf16>
    %55 = vector.shape_cast %54 : vector<1x32x64xbf16> to vector<32x64xbf16>
    %cst_43 = arith.constant dense<0.000000e+00> : vector<128x64xf32>
    %56 = tpu.matmul %53, %55, %cst_43 {dimension_numbers = #tpu.dot_dimension_numbers<[1], [0], [0], [1], [0, 0, 1, 1], [], []>} : vector<128x32xbf16>, vector<32x64xbf16>, vector<128x64xf32> -> vector<128x64xf32>
    %57 = arith.addf %49, %56 : vector<128x64xf32>
    %c5 = arith.constant 5 : index
    %c0_44 = arith.constant 0 : index
    %c0_45 = arith.constant 0 : index
    %58 = vector.load %arg4[%c5, %c0_44, %c0_45] : memref<9x128x169xbf16, #tpu.memory_space<vmem>>, vector<1x128x169xbf16>
    %59 = vector.shape_cast %58 : vector<1x128x169xbf16> to vector<128x169xbf16>
    %cst_46 = arith.constant dense<0.000000e+00> : vector<128x32xf32>
    %60 = tpu.matmul %59, %16, %cst_46 {dimension_numbers = #tpu.dot_dimension_numbers<[1], [0], [0], [1], [0, 0, 1, 1], [], []>} : vector<128x169xbf16>, vector<169x32xbf16>, vector<128x32xf32> -> vector<128x32xf32>
    %61 = arith.truncf %60 : vector<128x32xf32> to vector<128x32xbf16>
    %c5_47 = arith.constant 5 : index
    %c0_48 = arith.constant 0 : index
    %c0_49 = arith.constant 0 : index
    %62 = vector.load %arg5[%c5_47, %c0_48, %c0_49] : memref<9x32x64xbf16, #tpu.memory_space<vmem>>, vector<1x32x64xbf16>
    %63 = vector.shape_cast %62 : vector<1x32x64xbf16> to vector<32x64xbf16>
    %cst_50 = arith.constant dense<0.000000e+00> : vector<128x64xf32>
    %64 = tpu.matmul %61, %63, %cst_50 {dimension_numbers = #tpu.dot_dimension_numbers<[1], [0], [0], [1], [0, 0, 1, 1], [], []>} : vector<128x32xbf16>, vector<32x64xbf16>, vector<128x64xf32> -> vector<128x64xf32>
    %65 = arith.addf %57, %64 : vector<128x64xf32>
    %c6 = arith.constant 6 : index
    %c0_51 = arith.constant 0 : index
    %c0_52 = arith.constant 0 : index
    %66 = vector.load %arg4[%c6, %c0_51, %c0_52] : memref<9x128x169xbf16, #tpu.memory_space<vmem>>, vector<1x128x169xbf16>
    %67 = vector.shape_cast %66 : vector<1x128x169xbf16> to vector<128x169xbf16>
    %cst_53 = arith.constant dense<0.000000e+00> : vector<128x32xf32>
    %68 = tpu.matmul %67, %16, %cst_53 {dimension_numbers = #tpu.dot_dimension_numbers<[1], [0], [0], [1], [0, 0, 1, 1], [], []>} : vector<128x169xbf16>, vector<169x32xbf16>, vector<128x32xf32> -> vector<128x32xf32>
    %69 = arith.truncf %68 : vector<128x32xf32> to vector<128x32xbf16>
    %c6_54 = arith.constant 6 : index
    %c0_55 = arith.constant 0 : index
    %c0_56 = arith.constant 0 : index
    %70 = vector.load %arg5[%c6_54, %c0_55, %c0_56] : memref<9x32x64xbf16, #tpu.memory_space<vmem>>, vector<1x32x64xbf16>
    %71 = vector.shape_cast %70 : vector<1x32x64xbf16> to vector<32x64xbf16>
    %cst_57 = arith.constant dense<0.000000e+00> : vector<128x64xf32>
    %72 = tpu.matmul %69, %71, %cst_57 {dimension_numbers = #tpu.dot_dimension_numbers<[1], [0], [0], [1], [0, 0, 1, 1], [], []>} : vector<128x32xbf16>, vector<32x64xbf16>, vector<128x64xf32> -> vector<128x64xf32>
    %73 = arith.addf %65, %72 : vector<128x64xf32>
    %c7 = arith.constant 7 : index
    %c0_58 = arith.constant 0 : index
    %c0_59 = arith.constant 0 : index
    %74 = vector.load %arg4[%c7, %c0_58, %c0_59] : memref<9x128x169xbf16, #tpu.memory_space<vmem>>, vector<1x128x169xbf16>
    %75 = vector.shape_cast %74 : vector<1x128x169xbf16> to vector<128x169xbf16>
    %cst_60 = arith.constant dense<0.000000e+00> : vector<128x32xf32>
    %76 = tpu.matmul %75, %16, %cst_60 {dimension_numbers = #tpu.dot_dimension_numbers<[1], [0], [0], [1], [0, 0, 1, 1], [], []>} : vector<128x169xbf16>, vector<169x32xbf16>, vector<128x32xf32> -> vector<128x32xf32>
    %77 = arith.truncf %76 : vector<128x32xf32> to vector<128x32xbf16>
    %c7_61 = arith.constant 7 : index
    %c0_62 = arith.constant 0 : index
    %c0_63 = arith.constant 0 : index
    %78 = vector.load %arg5[%c7_61, %c0_62, %c0_63] : memref<9x32x64xbf16, #tpu.memory_space<vmem>>, vector<1x32x64xbf16>
    %79 = vector.shape_cast %78 : vector<1x32x64xbf16> to vector<32x64xbf16>
    %cst_64 = arith.constant dense<0.000000e+00> : vector<128x64xf32>
    %80 = tpu.matmul %77, %79, %cst_64 {dimension_numbers = #tpu.dot_dimension_numbers<[1], [0], [0], [1], [0, 0, 1, 1], [], []>} : vector<128x32xbf16>, vector<32x64xbf16>, vector<128x64xf32> -> vector<128x64xf32>
    %81 = arith.addf %73, %80 : vector<128x64xf32>
    %c8 = arith.constant 8 : index
    %c0_65 = arith.constant 0 : index
    %c0_66 = arith.constant 0 : index
    %82 = vector.load %arg4[%c8, %c0_65, %c0_66] : memref<9x128x169xbf16, #tpu.memory_space<vmem>>, vector<1x128x169xbf16>
    %83 = vector.shape_cast %82 : vector<1x128x169xbf16> to vector<128x169xbf16>
    %cst_67 = arith.constant dense<0.000000e+00> : vector<128x32xf32>
    %84 = tpu.matmul %83, %16, %cst_67 {dimension_numbers = #tpu.dot_dimension_numbers<[1], [0], [0], [1], [0, 0, 1, 1], [], []>} : vector<128x169xbf16>, vector<169x32xbf16>, vector<128x32xf32> -> vector<128x32xf32>
    %85 = arith.truncf %84 : vector<128x32xf32> to vector<128x32xbf16>
    %c8_68 = arith.constant 8 : index
    %c0_69 = arith.constant 0 : index
    %c0_70 = arith.constant 0 : index
    %86 = vector.load %arg5[%c8_68, %c0_69, %c0_70] : memref<9x32x64xbf16, #tpu.memory_space<vmem>>, vector<1x32x64xbf16>
    %87 = vector.shape_cast %86 : vector<1x32x64xbf16> to vector<32x64xbf16>
    %cst_71 = arith.constant dense<0.000000e+00> : vector<128x64xf32>
    %88 = tpu.matmul %85, %87, %cst_71 {dimension_numbers = #tpu.dot_dimension_numbers<[1], [0], [0], [1], [0, 0, 1, 1], [], []>} : vector<128x32xbf16>, vector<32x64xbf16>, vector<128x64xf32> -> vector<128x64xf32>
    %89 = arith.addf %81, %88 : vector<128x64xf32>
    %90 = vector.extract_strided_slice %89 {offsets = [0, 0], sizes = [25, 64], strides = [1, 1]} : vector<128x64xf32> to vector<25x64xf32>
    %91 = vector.extract_strided_slice %89 {offsets = [32, 0], sizes = [25, 64], strides = [1, 1]} : vector<128x64xf32> to vector<25x64xf32>
    %92 = arith.maximumf %90, %91 : vector<25x64xf32>
    %93 = vector.extract_strided_slice %89 {offsets = [64, 0], sizes = [25, 64], strides = [1, 1]} : vector<128x64xf32> to vector<25x64xf32>
    %94 = vector.extract_strided_slice %89 {offsets = [96, 0], sizes = [25, 64], strides = [1, 1]} : vector<128x64xf32> to vector<25x64xf32>
    %95 = arith.maximumf %93, %94 : vector<25x64xf32>
    %96 = arith.maximumf %92, %95 : vector<25x64xf32>
    %c0_72 = arith.constant 0 : index
    %c0_73 = arith.constant 0 : index
    %97 = vector.load %arg6[%c0_72, %c0_73] : memref<1x64xf32, #tpu.memory_space<vmem>>, vector<1x64xf32>
    %98 = vector.broadcast %97 : vector<1x64xf32> to vector<25x64xf32>
    %99 = arith.addf %96, %98 : vector<25x64xf32>
    %cst_74 = arith.constant 0.000000e+00 : f32
    %100 = vector.broadcast %cst_74 : f32 to vector<25x64xf32>
    %101 = arith.maximumf %99, %100 : vector<25x64xf32>
    %102 = arith.truncf %101 : vector<25x64xf32> to vector<25x64xbf16>
    %cst_75 = arith.constant 0.000000e+00 : f32
    %103 = vector.broadcast %cst_75 : f32 to vector<9x128xf32>
    %c0_76 = arith.constant 0 : index
    %c0_77 = arith.constant 0 : index
    %c0_78 = arith.constant 0 : index
    %104 = vector.load %arg7[%c0_76, %c0_77, %c0_78] : memref<9x9x25xbf16, #tpu.memory_space<vmem>>, vector<1x9x25xbf16>
    %105 = vector.shape_cast %104 : vector<1x9x25xbf16> to vector<9x25xbf16>
    %cst_79 = arith.constant dense<0.000000e+00> : vector<9x64xf32>
    %106 = tpu.matmul %105, %102, %cst_79 {dimension_numbers = #tpu.dot_dimension_numbers<[1], [0], [0], [1], [0, 0, 1, 1], [], []>} : vector<9x25xbf16>, vector<25x64xbf16>, vector<9x64xf32> -> vector<9x64xf32>
    %107 = arith.truncf %106 : vector<9x64xf32> to vector<9x64xbf16>
    %c0_80 = arith.constant 0 : index
    %c0_81 = arith.constant 0 : index
    %c0_82 = arith.constant 0 : index
    %108 = vector.load %arg8[%c0_80, %c0_81, %c0_82] : memref<9x64x128xbf16, #tpu.memory_space<vmem>>, vector<1x64x128xbf16>
    %109 = vector.shape_cast %108 : vector<1x64x128xbf16> to vector<64x128xbf16>
    %cst_83 = arith.constant dense<0.000000e+00> : vector<9x128xf32>
    %110 = tpu.matmul %107, %109, %cst_83 {dimension_numbers = #tpu.dot_dimension_numbers<[1], [0], [0], [1], [0, 0, 1, 1], [], []>} : vector<9x64xbf16>, vector<64x128xbf16>, vector<9x128xf32> -> vector<9x128xf32>
    %111 = arith.addf %103, %110 : vector<9x128xf32>
    %c1_84 = arith.constant 1 : index
    %c0_85 = arith.constant 0 : index
    %c0_86 = arith.constant 0 : index
    %112 = vector.load %arg7[%c1_84, %c0_85, %c0_86] : memref<9x9x25xbf16, #tpu.memory_space<vmem>>, vector<1x9x25xbf16>
    %113 = vector.shape_cast %112 : vector<1x9x25xbf16> to vector<9x25xbf16>
    %cst_87 = arith.constant dense<0.000000e+00> : vector<9x64xf32>
    %114 = tpu.matmul %113, %102, %cst_87 {dimension_numbers = #tpu.dot_dimension_numbers<[1], [0], [0], [1], [0, 0, 1, 1], [], []>} : vector<9x25xbf16>, vector<25x64xbf16>, vector<9x64xf32> -> vector<9x64xf32>
    %115 = arith.truncf %114 : vector<9x64xf32> to vector<9x64xbf16>
    %c1_88 = arith.constant 1 : index
    %c0_89 = arith.constant 0 : index
    %c0_90 = arith.constant 0 : index
    %116 = vector.load %arg8[%c1_88, %c0_89, %c0_90] : memref<9x64x128xbf16, #tpu.memory_space<vmem>>, vector<1x64x128xbf16>
    %117 = vector.shape_cast %116 : vector<1x64x128xbf16> to vector<64x128xbf16>
    %cst_91 = arith.constant dense<0.000000e+00> : vector<9x128xf32>
    %118 = tpu.matmul %115, %117, %cst_91 {dimension_numbers = #tpu.dot_dimension_numbers<[1], [0], [0], [1], [0, 0, 1, 1], [], []>} : vector<9x64xbf16>, vector<64x128xbf16>, vector<9x128xf32> -> vector<9x128xf32>
    %119 = arith.addf %111, %118 : vector<9x128xf32>
    %c2_92 = arith.constant 2 : index
    %c0_93 = arith.constant 0 : index
    %c0_94 = arith.constant 0 : index
    %120 = vector.load %arg7[%c2_92, %c0_93, %c0_94] : memref<9x9x25xbf16, #tpu.memory_space<vmem>>, vector<1x9x25xbf16>
    %121 = vector.shape_cast %120 : vector<1x9x25xbf16> to vector<9x25xbf16>
    %cst_95 = arith.constant dense<0.000000e+00> : vector<9x64xf32>
    %122 = tpu.matmul %121, %102, %cst_95 {dimension_numbers = #tpu.dot_dimension_numbers<[1], [0], [0], [1], [0, 0, 1, 1], [], []>} : vector<9x25xbf16>, vector<25x64xbf16>, vector<9x64xf32> -> vector<9x64xf32>
    %123 = arith.truncf %122 : vector<9x64xf32> to vector<9x64xbf16>
    %c2_96 = arith.constant 2 : index
    %c0_97 = arith.constant 0 : index
    %c0_98 = arith.constant 0 : index
    %124 = vector.load %arg8[%c2_96, %c0_97, %c0_98] : memref<9x64x128xbf16, #tpu.memory_space<vmem>>, vector<1x64x128xbf16>
    %125 = vector.shape_cast %124 : vector<1x64x128xbf16> to vector<64x128xbf16>
    %cst_99 = arith.constant dense<0.000000e+00> : vector<9x128xf32>
    %126 = tpu.matmul %123, %125, %cst_99 {dimension_numbers = #tpu.dot_dimension_numbers<[1], [0], [0], [1], [0, 0, 1, 1], [], []>} : vector<9x64xbf16>, vector<64x128xbf16>, vector<9x128xf32> -> vector<9x128xf32>
    %127 = arith.addf %119, %126 : vector<9x128xf32>
    %c3_100 = arith.constant 3 : index
    %c0_101 = arith.constant 0 : index
    %c0_102 = arith.constant 0 : index
    %128 = vector.load %arg7[%c3_100, %c0_101, %c0_102] : memref<9x9x25xbf16, #tpu.memory_space<vmem>>, vector<1x9x25xbf16>
    %129 = vector.shape_cast %128 : vector<1x9x25xbf16> to vector<9x25xbf16>
    %cst_103 = arith.constant dense<0.000000e+00> : vector<9x64xf32>
    %130 = tpu.matmul %129, %102, %cst_103 {dimension_numbers = #tpu.dot_dimension_numbers<[1], [0], [0], [1], [0, 0, 1, 1], [], []>} : vector<9x25xbf16>, vector<25x64xbf16>, vector<9x64xf32> -> vector<9x64xf32>
    %131 = arith.truncf %130 : vector<9x64xf32> to vector<9x64xbf16>
    %c3_104 = arith.constant 3 : index
    %c0_105 = arith.constant 0 : index
    %c0_106 = arith.constant 0 : index
    %132 = vector.load %arg8[%c3_104, %c0_105, %c0_106] : memref<9x64x128xbf16, #tpu.memory_space<vmem>>, vector<1x64x128xbf16>
    %133 = vector.shape_cast %132 : vector<1x64x128xbf16> to vector<64x128xbf16>
    %cst_107 = arith.constant dense<0.000000e+00> : vector<9x128xf32>
    %134 = tpu.matmul %131, %133, %cst_107 {dimension_numbers = #tpu.dot_dimension_numbers<[1], [0], [0], [1], [0, 0, 1, 1], [], []>} : vector<9x64xbf16>, vector<64x128xbf16>, vector<9x128xf32> -> vector<9x128xf32>
    %135 = arith.addf %127, %134 : vector<9x128xf32>
    %c4_108 = arith.constant 4 : index
    %c0_109 = arith.constant 0 : index
    %c0_110 = arith.constant 0 : index
    %136 = vector.load %arg7[%c4_108, %c0_109, %c0_110] : memref<9x9x25xbf16, #tpu.memory_space<vmem>>, vector<1x9x25xbf16>
    %137 = vector.shape_cast %136 : vector<1x9x25xbf16> to vector<9x25xbf16>
    %cst_111 = arith.constant dense<0.000000e+00> : vector<9x64xf32>
    %138 = tpu.matmul %137, %102, %cst_111 {dimension_numbers = #tpu.dot_dimension_numbers<[1], [0], [0], [1], [0, 0, 1, 1], [], []>} : vector<9x25xbf16>, vector<25x64xbf16>, vector<9x64xf32> -> vector<9x64xf32>
    %139 = arith.truncf %138 : vector<9x64xf32> to vector<9x64xbf16>
    %c4_112 = arith.constant 4 : index
    %c0_113 = arith.constant 0 : index
    %c0_114 = arith.constant 0 : index
    %140 = vector.load %arg8[%c4_112, %c0_113, %c0_114] : memref<9x64x128xbf16, #tpu.memory_space<vmem>>, vector<1x64x128xbf16>
    %141 = vector.shape_cast %140 : vector<1x64x128xbf16> to vector<64x128xbf16>
    %cst_115 = arith.constant dense<0.000000e+00> : vector<9x128xf32>
    %142 = tpu.matmul %139, %141, %cst_115 {dimension_numbers = #tpu.dot_dimension_numbers<[1], [0], [0], [1], [0, 0, 1, 1], [], []>} : vector<9x64xbf16>, vector<64x128xbf16>, vector<9x128xf32> -> vector<9x128xf32>
    %143 = arith.addf %135, %142 : vector<9x128xf32>
    %c5_116 = arith.constant 5 : index
    %c0_117 = arith.constant 0 : index
    %c0_118 = arith.constant 0 : index
    %144 = vector.load %arg7[%c5_116, %c0_117, %c0_118] : memref<9x9x25xbf16, #tpu.memory_space<vmem>>, vector<1x9x25xbf16>
    %145 = vector.shape_cast %144 : vector<1x9x25xbf16> to vector<9x25xbf16>
    %cst_119 = arith.constant dense<0.000000e+00> : vector<9x64xf32>
    %146 = tpu.matmul %145, %102, %cst_119 {dimension_numbers = #tpu.dot_dimension_numbers<[1], [0], [0], [1], [0, 0, 1, 1], [], []>} : vector<9x25xbf16>, vector<25x64xbf16>, vector<9x64xf32> -> vector<9x64xf32>
    %147 = arith.truncf %146 : vector<9x64xf32> to vector<9x64xbf16>
    %c5_120 = arith.constant 5 : index
    %c0_121 = arith.constant 0 : index
    %c0_122 = arith.constant 0 : index
    %148 = vector.load %arg8[%c5_120, %c0_121, %c0_122] : memref<9x64x128xbf16, #tpu.memory_space<vmem>>, vector<1x64x128xbf16>
    %149 = vector.shape_cast %148 : vector<1x64x128xbf16> to vector<64x128xbf16>
    %cst_123 = arith.constant dense<0.000000e+00> : vector<9x128xf32>
    %150 = tpu.matmul %147, %149, %cst_123 {dimension_numbers = #tpu.dot_dimension_numbers<[1], [0], [0], [1], [0, 0, 1, 1], [], []>} : vector<9x64xbf16>, vector<64x128xbf16>, vector<9x128xf32> -> vector<9x128xf32>
    %151 = arith.addf %143, %150 : vector<9x128xf32>
    %c6_124 = arith.constant 6 : index
    %c0_125 = arith.constant 0 : index
    %c0_126 = arith.constant 0 : index
    %152 = vector.load %arg7[%c6_124, %c0_125, %c0_126] : memref<9x9x25xbf16, #tpu.memory_space<vmem>>, vector<1x9x25xbf16>
    %153 = vector.shape_cast %152 : vector<1x9x25xbf16> to vector<9x25xbf16>
    %cst_127 = arith.constant dense<0.000000e+00> : vector<9x64xf32>
    %154 = tpu.matmul %153, %102, %cst_127 {dimension_numbers = #tpu.dot_dimension_numbers<[1], [0], [0], [1], [0, 0, 1, 1], [], []>} : vector<9x25xbf16>, vector<25x64xbf16>, vector<9x64xf32> -> vector<9x64xf32>
    %155 = arith.truncf %154 : vector<9x64xf32> to vector<9x64xbf16>
    %c6_128 = arith.constant 6 : index
    %c0_129 = arith.constant 0 : index
    %c0_130 = arith.constant 0 : index
    %156 = vector.load %arg8[%c6_128, %c0_129, %c0_130] : memref<9x64x128xbf16, #tpu.memory_space<vmem>>, vector<1x64x128xbf16>
    %157 = vector.shape_cast %156 : vector<1x64x128xbf16> to vector<64x128xbf16>
    %cst_131 = arith.constant dense<0.000000e+00> : vector<9x128xf32>
    %158 = tpu.matmul %155, %157, %cst_131 {dimension_numbers = #tpu.dot_dimension_numbers<[1], [0], [0], [1], [0, 0, 1, 1], [], []>} : vector<9x64xbf16>, vector<64x128xbf16>, vector<9x128xf32> -> vector<9x128xf32>
    %159 = arith.addf %151, %158 : vector<9x128xf32>
    %c7_132 = arith.constant 7 : index
    %c0_133 = arith.constant 0 : index
    %c0_134 = arith.constant 0 : index
    %160 = vector.load %arg7[%c7_132, %c0_133, %c0_134] : memref<9x9x25xbf16, #tpu.memory_space<vmem>>, vector<1x9x25xbf16>
    %161 = vector.shape_cast %160 : vector<1x9x25xbf16> to vector<9x25xbf16>
    %cst_135 = arith.constant dense<0.000000e+00> : vector<9x64xf32>
    %162 = tpu.matmul %161, %102, %cst_135 {dimension_numbers = #tpu.dot_dimension_numbers<[1], [0], [0], [1], [0, 0, 1, 1], [], []>} : vector<9x25xbf16>, vector<25x64xbf16>, vector<9x64xf32> -> vector<9x64xf32>
    %163 = arith.truncf %162 : vector<9x64xf32> to vector<9x64xbf16>
    %c7_136 = arith.constant 7 : index
    %c0_137 = arith.constant 0 : index
    %c0_138 = arith.constant 0 : index
    %164 = vector.load %arg8[%c7_136, %c0_137, %c0_138] : memref<9x64x128xbf16, #tpu.memory_space<vmem>>, vector<1x64x128xbf16>
    %165 = vector.shape_cast %164 : vector<1x64x128xbf16> to vector<64x128xbf16>
    %cst_139 = arith.constant dense<0.000000e+00> : vector<9x128xf32>
    %166 = tpu.matmul %163, %165, %cst_139 {dimension_numbers = #tpu.dot_dimension_numbers<[1], [0], [0], [1], [0, 0, 1, 1], [], []>} : vector<9x64xbf16>, vector<64x128xbf16>, vector<9x128xf32> -> vector<9x128xf32>
    %167 = arith.addf %159, %166 : vector<9x128xf32>
    %c8_140 = arith.constant 8 : index
    %c0_141 = arith.constant 0 : index
    %c0_142 = arith.constant 0 : index
    %168 = vector.load %arg7[%c8_140, %c0_141, %c0_142] : memref<9x9x25xbf16, #tpu.memory_space<vmem>>, vector<1x9x25xbf16>
    %169 = vector.shape_cast %168 : vector<1x9x25xbf16> to vector<9x25xbf16>
    %cst_143 = arith.constant dense<0.000000e+00> : vector<9x64xf32>
    %170 = tpu.matmul %169, %102, %cst_143 {dimension_numbers = #tpu.dot_dimension_numbers<[1], [0], [0], [1], [0, 0, 1, 1], [], []>} : vector<9x25xbf16>, vector<25x64xbf16>, vector<9x64xf32> -> vector<9x64xf32>
    %171 = arith.truncf %170 : vector<9x64xf32> to vector<9x64xbf16>
    %c8_144 = arith.constant 8 : index
    %c0_145 = arith.constant 0 : index
    %c0_146 = arith.constant 0 : index
    %172 = vector.load %arg8[%c8_144, %c0_145, %c0_146] : memref<9x64x128xbf16, #tpu.memory_space<vmem>>, vector<1x64x128xbf16>
    %173 = vector.shape_cast %172 : vector<1x64x128xbf16> to vector<64x128xbf16>
    %cst_147 = arith.constant dense<0.000000e+00> : vector<9x128xf32>
    %174 = tpu.matmul %171, %173, %cst_147 {dimension_numbers = #tpu.dot_dimension_numbers<[1], [0], [0], [1], [0, 0, 1, 1], [], []>} : vector<9x64xbf16>, vector<64x128xbf16>, vector<9x128xf32> -> vector<9x128xf32>
    %175 = arith.addf %167, %174 : vector<9x128xf32>
    %c0_148 = arith.constant 0 : index
    %c0_149 = arith.constant 0 : index
    %176 = vector.load %arg9[%c0_148, %c0_149] : memref<1x128xf32, #tpu.memory_space<vmem>>, vector<1x128xf32>
    %177 = vector.broadcast %176 : vector<1x128xf32> to vector<9x128xf32>
    %178 = arith.addf %175, %177 : vector<9x128xf32>
    %cst_150 = arith.constant 0.000000e+00 : f32
    %179 = vector.broadcast %cst_150 : f32 to vector<9x128xf32>
    %180 = arith.maximumf %178, %179 : vector<9x128xf32>
    %181 = arith.truncf %180 : vector<9x128xf32> to vector<9x128xbf16>
    %c0_151 = arith.constant 0 : index
    %c0_152 = arith.constant 0 : index
    %182 = vector.load %arg11[%c0_151, %c0_152] : memref<1x10xf32, #tpu.memory_space<vmem>>, vector<1x10xf32>
    %183 = vector.extract_strided_slice %181 {offsets = [0, 0], sizes = [1, 128], strides = [1, 1]} : vector<9x128xbf16> to vector<1x128xbf16>
    %c0_153 = arith.constant 0 : index
    %c0_154 = arith.constant 0 : index
    %c0_155 = arith.constant 0 : index
    %184 = vector.load %arg10[%c0_153, %c0_154, %c0_155] : memref<9x128x10xbf16, #tpu.memory_space<vmem>>, vector<1x128x10xbf16>
    %185 = vector.shape_cast %184 : vector<1x128x10xbf16> to vector<128x10xbf16>
    %cst_156 = arith.constant dense<0.000000e+00> : vector<1x10xf32>
    %186 = tpu.matmul %183, %185, %cst_156 {dimension_numbers = #tpu.dot_dimension_numbers<[1], [0], [0], [1], [0, 0, 1, 1], [], []>} : vector<1x128xbf16>, vector<128x10xbf16>, vector<1x10xf32> -> vector<1x10xf32>
    %187 = arith.addf %182, %186 : vector<1x10xf32>
    %188 = vector.extract_strided_slice %181 {offsets = [1, 0], sizes = [1, 128], strides = [1, 1]} : vector<9x128xbf16> to vector<1x128xbf16>
    %c1_157 = arith.constant 1 : index
    %c0_158 = arith.constant 0 : index
    %c0_159 = arith.constant 0 : index
    %189 = vector.load %arg10[%c1_157, %c0_158, %c0_159] : memref<9x128x10xbf16, #tpu.memory_space<vmem>>, vector<1x128x10xbf16>
    %190 = vector.shape_cast %189 : vector<1x128x10xbf16> to vector<128x10xbf16>
    %cst_160 = arith.constant dense<0.000000e+00> : vector<1x10xf32>
    %191 = tpu.matmul %188, %190, %cst_160 {dimension_numbers = #tpu.dot_dimension_numbers<[1], [0], [0], [1], [0, 0, 1, 1], [], []>} : vector<1x128xbf16>, vector<128x10xbf16>, vector<1x10xf32> -> vector<1x10xf32>
    %192 = arith.addf %187, %191 : vector<1x10xf32>
    %193 = vector.extract_strided_slice %181 {offsets = [2, 0], sizes = [1, 128], strides = [1, 1]} : vector<9x128xbf16> to vector<1x128xbf16>
    %c2_161 = arith.constant 2 : index
    %c0_162 = arith.constant 0 : index
    %c0_163 = arith.constant 0 : index
    %194 = vector.load %arg10[%c2_161, %c0_162, %c0_163] : memref<9x128x10xbf16, #tpu.memory_space<vmem>>, vector<1x128x10xbf16>
    %195 = vector.shape_cast %194 : vector<1x128x10xbf16> to vector<128x10xbf16>
    %cst_164 = arith.constant dense<0.000000e+00> : vector<1x10xf32>
    %196 = tpu.matmul %193, %195, %cst_164 {dimension_numbers = #tpu.dot_dimension_numbers<[1], [0], [0], [1], [0, 0, 1, 1], [], []>} : vector<1x128xbf16>, vector<128x10xbf16>, vector<1x10xf32> -> vector<1x10xf32>
    %197 = arith.addf %192, %196 : vector<1x10xf32>
    %198 = vector.extract_strided_slice %181 {offsets = [3, 0], sizes = [1, 128], strides = [1, 1]} : vector<9x128xbf16> to vector<1x128xbf16>
    %c3_165 = arith.constant 3 : index
    %c0_166 = arith.constant 0 : index
    %c0_167 = arith.constant 0 : index
    %199 = vector.load %arg10[%c3_165, %c0_166, %c0_167] : memref<9x128x10xbf16, #tpu.memory_space<vmem>>, vector<1x128x10xbf16>
    %200 = vector.shape_cast %199 : vector<1x128x10xbf16> to vector<128x10xbf16>
    %cst_168 = arith.constant dense<0.000000e+00> : vector<1x10xf32>
    %201 = tpu.matmul %198, %200, %cst_168 {dimension_numbers = #tpu.dot_dimension_numbers<[1], [0], [0], [1], [0, 0, 1, 1], [], []>} : vector<1x128xbf16>, vector<128x10xbf16>, vector<1x10xf32> -> vector<1x10xf32>
    %202 = arith.addf %197, %201 : vector<1x10xf32>
    %203 = vector.extract_strided_slice %181 {offsets = [4, 0], sizes = [1, 128], strides = [1, 1]} : vector<9x128xbf16> to vector<1x128xbf16>
    %c4_169 = arith.constant 4 : index
    %c0_170 = arith.constant 0 : index
    %c0_171 = arith.constant 0 : index
    %204 = vector.load %arg10[%c4_169, %c0_170, %c0_171] : memref<9x128x10xbf16, #tpu.memory_space<vmem>>, vector<1x128x10xbf16>
    %205 = vector.shape_cast %204 : vector<1x128x10xbf16> to vector<128x10xbf16>
    %cst_172 = arith.constant dense<0.000000e+00> : vector<1x10xf32>
    %206 = tpu.matmul %203, %205, %cst_172 {dimension_numbers = #tpu.dot_dimension_numbers<[1], [0], [0], [1], [0, 0, 1, 1], [], []>} : vector<1x128xbf16>, vector<128x10xbf16>, vector<1x10xf32> -> vector<1x10xf32>
    %207 = arith.addf %202, %206 : vector<1x10xf32>
    %208 = vector.extract_strided_slice %181 {offsets = [5, 0], sizes = [1, 128], strides = [1, 1]} : vector<9x128xbf16> to vector<1x128xbf16>
    %c5_173 = arith.constant 5 : index
    %c0_174 = arith.constant 0 : index
    %c0_175 = arith.constant 0 : index
    %209 = vector.load %arg10[%c5_173, %c0_174, %c0_175] : memref<9x128x10xbf16, #tpu.memory_space<vmem>>, vector<1x128x10xbf16>
    %210 = vector.shape_cast %209 : vector<1x128x10xbf16> to vector<128x10xbf16>
    %cst_176 = arith.constant dense<0.000000e+00> : vector<1x10xf32>
    %211 = tpu.matmul %208, %210, %cst_176 {dimension_numbers = #tpu.dot_dimension_numbers<[1], [0], [0], [1], [0, 0, 1, 1], [], []>} : vector<1x128xbf16>, vector<128x10xbf16>, vector<1x10xf32> -> vector<1x10xf32>
    %212 = arith.addf %207, %211 : vector<1x10xf32>
    %213 = vector.extract_strided_slice %181 {offsets = [6, 0], sizes = [1, 128], strides = [1, 1]} : vector<9x128xbf16> to vector<1x128xbf16>
    %c6_177 = arith.constant 6 : index
    %c0_178 = arith.constant 0 : index
    %c0_179 = arith.constant 0 : index
    %214 = vector.load %arg10[%c6_177, %c0_178, %c0_179] : memref<9x128x10xbf16, #tpu.memory_space<vmem>>, vector<1x128x10xbf16>
    %215 = vector.shape_cast %214 : vector<1x128x10xbf16> to vector<128x10xbf16>
    %cst_180 = arith.constant dense<0.000000e+00> : vector<1x10xf32>
    %216 = tpu.matmul %213, %215, %cst_180 {dimension_numbers = #tpu.dot_dimension_numbers<[1], [0], [0], [1], [0, 0, 1, 1], [], []>} : vector<1x128xbf16>, vector<128x10xbf16>, vector<1x10xf32> -> vector<1x10xf32>
    %217 = arith.addf %212, %216 : vector<1x10xf32>
    %218 = vector.extract_strided_slice %181 {offsets = [7, 0], sizes = [1, 128], strides = [1, 1]} : vector<9x128xbf16> to vector<1x128xbf16>
    %c7_181 = arith.constant 7 : index
    %c0_182 = arith.constant 0 : index
    %c0_183 = arith.constant 0 : index
    %219 = vector.load %arg10[%c7_181, %c0_182, %c0_183] : memref<9x128x10xbf16, #tpu.memory_space<vmem>>, vector<1x128x10xbf16>
    %220 = vector.shape_cast %219 : vector<1x128x10xbf16> to vector<128x10xbf16>
    %cst_184 = arith.constant dense<0.000000e+00> : vector<1x10xf32>
    %221 = tpu.matmul %218, %220, %cst_184 {dimension_numbers = #tpu.dot_dimension_numbers<[1], [0], [0], [1], [0, 0, 1, 1], [], []>} : vector<1x128xbf16>, vector<128x10xbf16>, vector<1x10xf32> -> vector<1x10xf32>
    %222 = arith.addf %217, %221 : vector<1x10xf32>
    %223 = vector.extract_strided_slice %181 {offsets = [8, 0], sizes = [1, 128], strides = [1, 1]} : vector<9x128xbf16> to vector<1x128xbf16>
    %c8_185 = arith.constant 8 : index
    %c0_186 = arith.constant 0 : index
    %c0_187 = arith.constant 0 : index
    %224 = vector.load %arg10[%c8_185, %c0_186, %c0_187] : memref<9x128x10xbf16, #tpu.memory_space<vmem>>, vector<1x128x10xbf16>
    %225 = vector.shape_cast %224 : vector<1x128x10xbf16> to vector<128x10xbf16>
    %cst_188 = arith.constant dense<0.000000e+00> : vector<1x10xf32>
    %226 = tpu.matmul %223, %225, %cst_188 {dimension_numbers = #tpu.dot_dimension_numbers<[1], [0], [0], [1], [0, 0, 1, 1], [], []>} : vector<1x128xbf16>, vector<128x10xbf16>, vector<1x10xf32> -> vector<1x10xf32>
    %227 = arith.addf %222, %226 : vector<1x10xf32>
    %cst_189 = arith.constant dense<0xFF800000> : vector<1xf32>
    %228 = vector.multi_reduction <maximumf>, %227, %cst_189 [1] : vector<1x10xf32> to vector<1xf32>
    %229 = vector.shape_cast %228 : vector<1xf32> to vector<1x1xf32>
    %230 = vector.broadcast %229 : vector<1x1xf32> to vector<1x10xf32>
    %231 = arith.subf %227, %230 : vector<1x10xf32>
    %232 = math.exp %231 : vector<1x10xf32>
    %cst_190 = arith.constant dense<0.000000e+00> : vector<1xf32>
    %233 = vector.multi_reduction <add>, %232, %cst_190 [1] : vector<1x10xf32> to vector<1xf32>
    %234 = vector.shape_cast %233 : vector<1xf32> to vector<1x1xf32>
    %235 = vector.broadcast %234 : vector<1x1xf32> to vector<1x10xf32>
    %236 = arith.divf %232, %235 : vector<1x10xf32>
    %c0_191 = arith.constant 0 : index
    %c0_192 = arith.constant 0 : index
    %c0_193 = arith.constant 0 : index
    %237 = vector.load %arg12[%c0_191, %c0_192, %c0_193] : memref<1x1x10xf32, #tpu.memory_space<vmem>>, vector<1x1x10xf32>
    %238 = vector.shape_cast %237 : vector<1x1x10xf32> to vector<1x10xf32>
    %239 = vector.shape_cast %236 : vector<1x10xf32> to vector<1x1x10xf32>
    tpu.vector_store %arg12[%c0_191, %c0_192, %c0_193], %239 {strides = array<i32>} : memref<1x1x10xf32, #tpu.memory_space<vmem>>, vector<1x1x10xf32>,
    return
  }
  func.func @transform_0(%arg0: i32) -> (i32, i32, i32) {
    %c0_i32 = arith.constant 0 : i32
    %c0_i32_0 = arith.constant 0 : i32
    %c0_i32_1 = arith.constant 0 : i32
    return %arg0, %c0_i32, %c0_i32_0 : i32, i32, i32
  }
  func.func @transform_1(%arg0: i32) -> (i32, i32) {
    %c0_i32 = arith.constant 0 : i32
    %c0_i32_0 = arith.constant 0 : i32
    %c0_i32_1 = arith.constant 0 : i32
    return %c0_i32, %c0_i32_0 : i32, i32
  }
  func.func @transform_2(%arg0: i32) -> (i32, i32) {
    %c0_i32 = arith.constant 0 : i32
    %c0_i32_0 = arith.constant 0 : i32
    %c0_i32_1 = arith.constant 0 : i32
    return %c0_i32, %c0_i32_0 : i32, i32
  }
  func.func @transform_3(%arg0: i32) -> (i32, i32, i32) {
    %c0_i32 = arith.constant 0 : i32
    %c0_i32_0 = arith.constant 0 : i32
    %c0_i32_1 = arith.constant 0 : i32
    %c0_i32_2 = arith.constant 0 : i32
    return %c0_i32, %c0_i32_0, %c0_i32_1 : i32, i32, i32
  }
  func.func @transform_4(%arg0: i32) -> (i32, i32, i32) {
    %c0_i32 = arith.constant 0 : i32
    %c0_i32_0 = arith.constant 0 : i32
    %c0_i32_1 = arith.constant 0 : i32
    %c0_i32_2 = arith.constant 0 : i32
    return %c0_i32, %c0_i32_0, %c0_i32_1 : i32, i32, i32
  }
  func.func @transform_5(%arg0: i32) -> (i32, i32) {
    %c0_i32 = arith.constant 0 : i32
    %c0_i32_0 = arith.constant 0 : i32
    %c0_i32_1 = arith.constant 0 : i32
    return %c0_i32, %c0_i32_0 : i32, i32
  }
  func.func @transform_6(%arg0: i32) -> (i32, i32, i32) {
    %c0_i32 = arith.constant 0 : i32
    %c0_i32_0 = arith.constant 0 : i32
    %c0_i32_1 = arith.constant 0 : i32
    %c0_i32_2 = arith.constant 0 : i32
    return %c0_i32, %c0_i32_0, %c0_i32_1 : i32, i32, i32
  }
  func.func @transform_7(%arg0: i32) -> (i32, i32, i32) {
    %c0_i32 = arith.constant 0 : i32
    %c0_i32_0 = arith.constant 0 : i32
    %c0_i32_1 = arith.constant 0 : i32
    %c0_i32_2 = arith.constant 0 : i32
    return %c0_i32, %c0_i32_0, %c0_i32_1 : i32, i32, i32
  }
  func.func @transform_8(%arg0: i32) -> (i32, i32) {
    %c0_i32 = arith.constant 0 : i32
    %c0_i32_0 = arith.constant 0 : i32
    %c0_i32_1 = arith.constant 0 : i32
    return %c0_i32, %c0_i32_0 : i32, i32
  }
  func.func @transform_9(%arg0: i32) -> (i32, i32, i32) {
    %c0_i32 = arith.constant 0 : i32
    %c0_i32_0 = arith.constant 0 : i32
    %c0_i32_1 = arith.constant 0 : i32
    %c0_i32_2 = arith.constant 0 : i32
    return %c0_i32, %c0_i32_0, %c0_i32_1 : i32, i32, i32
  }
  func.func @transform_10(%arg0: i32) -> (i32, i32) {
    %c0_i32 = arith.constant 0 : i32
    %c0_i32_0 = arith.constant 0 : i32
    %c0_i32_1 = arith.constant 0 : i32
    return %c0_i32, %c0_i32_0 : i32, i32
  }
  func.func @transform_11(%arg0: i32) -> (i32, i32, i32) {
    %c0_i32 = arith.constant 0 : i32
    %c0_i32_0 = arith.constant 0 : i32
    %c0_i32_1 = arith.constant 0 : i32
    return %arg0, %c0_i32, %c0_i32_0 : i32, i32, i32
  }
}

</mosaic_0001>

<bundles_post_ra>
// kernel: net_mnist_forward.1
= control target key start
LH: loop header
LB: loop body
LE: loop exit
PB: predicated region body
PF: predicated region fallthrough
CT: control target
= control target key end

     0   :  { %s10578_s0 = inlined_call_operand.vmem [shape: bf16[2,704,9], index: 0, kind: input, shape index: {}]   ;;  %s10579_s1 = inlined_call_operand.vmem [shape: bf16[9,32], index: 1, kind: input, shape index: {}]   ;;  %s10580_s2 = inlined_call_operand.vmem [shape: f32[1,32], index: 2, kind: input, shape index: {}]   ;;  %s10581_s3 = inlined_call_operand.vmem [shape: bf16[9,128,169], index: 3, kind: input, shape index: {}]   ;;  %s10582_s4 = inlined_call_operand.vmem [shape: bf16[9,32,64], index: 4, kind: input, shape index: {}]   ;;  %s10583_s5 = inlined_call_operand.vmem [shape: f32[1,64], index: 5, kind: input, shape index: {}]   ;;  %s10584_s6 = inlined_call_operand.vmem [shape: bf16[9,9,25], index: 6, kind: input, shape index: {}]   ;;  %s10585_s7 = inlined_call_operand.vmem [shape: bf16[9,64,128], index: 7, kind: input, shape index: {}]   ;;  %s10586_s8 = inlined_call_operand.vmem [shape: f32[1,128], index: 8, kind: input, shape index: {}]   ;;  %s10587_s9 = inlined_call_operand.vmem [shape: bf16[9,128,10], index: 9, kind: input, shape index: {}]   ;;  %s10588_s10 = inlined_call_operand.vmem [shape: f32[1,10], index: 10, kind: input, shape index: {}]   ;;  %s10589_s11 = inlined_call_operand.hbm [shape: f32[2,1,10], index: 11, kind: output, shape index: {}]  }
   0x1   :  { %10606 = sst [smem:[#allocation29_spill]] %s10578_s0 }
   0x2   :  { %16 = vsyncpa [#allocation3], 0 }
   0x3   :  { %18 = vsyncpa [#allocation3 + $0x1], 0  ;;  %s8026_s17 = smov 0   ;;  %s8028_s18 = smov 0  }
   0x4   :  { %s8030_s19 = smov 0   ;;  %s8032_s20 = smov 0  }
   0x5 LB: > { %s8047_s21 = sadd.s32 4294967295, %s7963_s20   ;;  %s5651_s22 = sadd.s32 4294967294, %s7963_s20   ;;  %s7963_s20 = sphi %s8032_s20, %s10673_s20   ;;  %s7959_s19 = sphi %s8030_s19, %s10672_s19   ;;  %s7955_s18 = sphi %s8028_s18, %s10671_s18   ;;  %s7951_s17 = sphi %s8026_s17, %s10670_s17  }
   0x6   : > { %s8051_s23 = sadd.s32 1, %s7963_s20   ;;  %s267_s24 = sadd.s32 1, %s7959_s19 }
   0x7   : > { %s264_s25 = ssub.s32 %s7963_s20, %s8051_s23  ;;  %p277_p0 = scmp.ne.s32.totalorder %s7959_s19, %s7955_s18 }
   0x8   : > { %p265_p1 = scmp.eq.s32.totalorder %s264_s25, 0  ;;  %p278_p2 = scmp.eq.s32.totalorder %s8047_s21, 1 }
   0x9   : > { %p283_p3 = scmp.ne.s32.totalorder %s7955_s18, %s7951_s17  ;;  %p284_p4 = scmp.eq.s32.totalorder %s5651_s22, 1 }
   0xa   : > { %s8062_s26 = scalar_select %p265_p1, %s7959_s19, %s267_s24  }
   0xb   : > { %p8064_p5 = por %p278_p2, %p277_p0  ;;  %p8068_p6 = por %p284_p4, %p283_p3 }
   0xc   : > { %p5654_p7 = scmp.ge.s32.totalorder %s7963_s20, 1  ;;  %p340_p8 = scmp.lt.s32.totalorder %s7963_s20, 3 }
   0xe   : > { %p341_p9 = pnand %p5654_p7, %p340_p8 }
  0x10   : > { %344 = sbr.rel (%p341_p9) target bundleno = 3369 (0xd29), region = 64 }
  0x15   : > { %v5834_v0 = vld [vmem:[%s10579_s1] sm:$0xf]  ;;  %v7572_v1 = vld [vmem:[%s10579_s1] sm:$0x10]  ;;  %vm833_vm0 = vcmask 1043456   ;;  %vm834_vm1 = vcmask 1044480  }
  0x16   : > { %v5835_v2 = vor.u32 %v7572_v1, %v5834_v0  ;;  %p379_p10 = scmp.lt.s32.totalorder %s8047_s21, 1  ;;  %v7965_v3 = vmov 65535   ;;  %s10610_s0 = sld [smem:[#allocation29_spill]]  ;;  %vm700_vm2 = vcmask 72704   ;;  %vm1282_vm3 = vcmask 334848  }
  0x17   : > { %v835_v4 = vsel %vm833_vm0, 4294967295, %v7965_v3  ;;  %vm1656_vm4 = vcmask 261120   ;;  %vm4123_vm5 = vcmask 203776   ;;  %vm4212_vm6 = vcmask 523264   ;;  %s377_s30 = sand.u32 1, %s7955_s18   ;;  %s7921_s13 = scalar_lea.hbm %s10589_s11, 2 }
  0x18   : > { %v8081_v5 = vsel %vm834_vm1, %v835_v4, 0  ;;  %s380_s14 = scalar_select %p379_p10, %s8047_s21, 1  ;;  %vm5557_vm7 = vcmask 73728  }
  0x19   : > { %10609 = vst [vmem:[#allocation5_spill] sm:$0xff] %v8081_v5  ;;  %v838_v6 = vand.u32 %v5835_v2, %v8081_v5 }
  0x1a   : > { %s7853_s15 = smul.u32 352, %s380_s14  ;;  %s5592_s14 = scalar_lea.hbm %s10589_s11, %s8047_s21 }
  0x1b   : > { %847 = vmatpush.bf16.msra.mxu0 %v838_v6  ;;  %7852 = vmatpush.bf16.msra.mxu2 %v838_v6  ;;  %s5596_s22 = sshll.u32 %s5592_s14, 4  ;;  %s5597_s22 = int_to_ptr.hbm [resolvable:$true] %s5596_s22 }
  0x1c   : > { %s8088_s24 = scalar_lea.vmem %s10610_s0, %s7853_s15  ;;  %s378_s15 = scalar_lea.vmem [#allocation2], %s377_s30 }
  0x1d   : > { %v7528_v7 = vld [vmem:[%s8088_s24] sm:$0xff]  ;;  %v7529_v8 = vld [vmem:[%s8088_s24 + $0x8] sm:$0xff]  ;;  %v7530_v9 = vld [vmem:[%s8088_s24 + $0x10] sm:$0xff]  ;;  %s5594_s16 = sshll.u32 %s378_s15, 4  ;;  %s7915_s25 = sshra.s32 %s5597_s22, 4  ;;  %s5595_s16 = int_to_ptr.vmem [resolvable:$true] %s5594_s16  ;;  %s7916_s25 = int_to_ptr.hbm [resolvable:$true] %s7915_s25 }
  0x1e   : > { %5836 = vmatmul.msk.bf16.vlgmr.msra.gmra.mxu0 %vm700_vm2, %v7528_v7  ;;  %v7531_v10 = vld [vmem:[%s8088_s24 + $0x18] sm:$0xff]  ;;  %v7532_v11 = vld [vmem:[%s8088_s24 + $0x20] sm:$0xff]  ;;  %v7533_v12 = vld [vmem:[%s8088_s24 + $0x28] sm:$0xff]  ;;  %s7917_s21 = scalar_lea.hbm %s7916_s25, 1  ;;  %p7922_p0 = scmp.lt.s32.totalorder %s7916_s25, %s10589_s11 }
  0x1f   : > { %v7534_v13 = vld [vmem:[%s8088_s24 + $0x30] sm:$0xff]  ;;  %v7535_v14 = vld [vmem:[%s8088_s24 + $0x38] sm:$0xff]  ;;  %v7536_v15 = vld [vmem:[%s8088_s24 + $0x40] sm:$0xff]  ;;  %p7918_p11 = scmp.ne.s32.totalorder %s7916_s25, %s7917_s21  ;;  %p7923_p1 = scmp.lt.s32.totalorder %s7921_s13, %s7917_s21 }
  0x20   : > { %v7537_v18 = vld [vmem:[%s8088_s24 + $0x48] sm:$0xff]  ;;  %v7538_v21 = vld [vmem:[%s8088_s24 + $0x50] sm:$0xff]  ;;  %v7539_v24 = vld [vmem:[%s8088_s24 + $0x58] sm:$0xff] }
  0x21   : > { %v7540_v27 = vld [vmem:[%s8088_s24 + $0x60] sm:$0xff]  ;;  %v7541_v30 = vld [vmem:[%s8088_s24 + $0x68] sm:$0xff]  ;;  %v7542_v33 = vld [vmem:[%s8088_s24 + $0x70] sm:$0xff]  ;;  %p7919_p12 = pnand %p7918_p11, %p8064_p5  ;;  %p7924_p2 = por %p7923_p1, %p7922_p0 }
  0x22   : > { %v7543_v36 = vld [vmem:[%s8088_s24 + $0x78] sm:$0xff]  ;;  %v7544_v39 = vld [vmem:[%s8088_s24 + $0x80] sm:$0xff]  ;;  %v7545_v42 = vld [vmem:[%s8088_s24 + $0x88] sm:$0xff] }
  0x23   : > { %v7546_v45 = vld [vmem:[%s8088_s24 + $0x90] sm:$0xff]  ;;  %v7547_v48 = vld [vmem:[%s8088_s24 + $0x98] sm:$0xff]  ;;  %v7548_v51 = vld [vmem:[%s8088_s24 + $0xa0] sm:$0xff]  ;;  %p7920_p13 = pneg %p7919_p12 }
  0x24   : > { %v7549_v54 = vld [vmem:[%s8088_s24 + $0xa8] sm:$0xff]  ;;  %v7550_v57 = vld [vmem:[%s8088_s24 + $0xb0] sm:$0xff]  ;;  %v7551_v60 = vld [vmem:[%s8088_s24 + $0xb8] sm:$0xff] }
  0x25   : > { %v7552_v63 = vld [vmem:[%s8088_s24 + $0xc0] sm:$0xff]  ;;  %v7553_v2 = vld [vmem:[%s8088_s24 + $0xc8] sm:$0xff]  ;;  %v7554_v6 = vld [vmem:[%s8088_s24 + $0xd0] sm:$0xff]  ;;  %p7925_p3 = pnand %p7924_p2, %p7920_p13 }
  0x2e   : > { %5837 = vmatmul.msk.bf16.gmra.mxu0 %vm700_vm2, %v7529_v8 }
  0x3e   : > { %5838 = vmatmul.msk.bf16.gmra.mxu0 %vm700_vm2, %v7530_v9  ;;  %v7555_v9 = vld [vmem:[%s8088_s24 + $0xd8] sm:$0xff] }
  0x4e   : > { %5839 = vmatmul.msk.bf16.gmra.mxu0 %vm700_vm2, %v7531_v10 }
  0x5e   : > { %5840 = vmatmul.msk.bf16.gmra.mxu0 %vm700_vm2, %v7532_v11 }
  0x6e   : > { %5841 = vmatmul.msk.bf16.gmra.mxu0 %vm700_vm2, %v7533_v12  ;;  %v7556_v12 = vld [vmem:[%s8088_s24 + $0xe0] sm:$0xff] }
  0x7e   : > { %5842 = vmatmul.msk.bf16.gmra.mxu0 %vm700_vm2, %v7534_v13 }
  0x8e   : > { %5843 = vmatmul.msk.bf16.gmra.mxu0 %vm700_vm2, %v7535_v14 }
  0x9b   : > { %v8107_v16 = vpop.f32.mrf.mxu0 }
  0x9e   : > { %5844 = vmatmul.msk.bf16.gmra.mxu0 %vm700_vm2, %v7536_v15  ;;  %v7557_v15 = vld [vmem:[%s8088_s24 + $0xe8] sm:$0xff] }
  0xa3   : > { %v8110_v17 = vpop.f32.mrf.mxu0 }
  0xab   : > { %v8113_v19 = vpop.f32.mrf.mxu0 }
  0xae   : > { %5845 = vmatmul.msk.bf16.gmra.mxu0 %vm700_vm2, %v7537_v18 }
  0xb3   : > { %v8116_v20 = vpop.f32.mrf.mxu0 }
  0xbb   : > { %v8119_v22 = vpop.f32.mrf.mxu0 }
  0xbe   : > { %5846 = vmatmul.msk.bf16.gmra.mxu0 %vm700_vm2, %v7538_v21 }
  0xc3   : > { %v8122_v23 = vpop.f32.mrf.mxu0 }
  0xcb   : > { %v8125_v25 = vpop.f32.mrf.mxu0 }
  0xce   : > { %5847 = vmatmul.msk.bf16.gmra.mxu0 %vm700_vm2, %v7539_v24  ;;  %v7571_v24 = vld [vmem:[%s8088_s24 + $0x158] sm:$0xff] }
  0xcf   : > { %5879 = vmatmul.msk.bf16.vlgmr.msra.gmra.mxu2 %vm700_vm2, %v7571_v24  ;;  %v7564_v24 = vld [vmem:[%s8088_s24 + $0x120] sm:$0xff] }
  0xd3   : > { %v8128_v26 = vpop.f32.mrf.mxu0 }
  0xdb   : > { %v8131_v28 = vpop.f32.mrf.mxu0 }
  0xde   : > { %5848 = vmatmul.msk.bf16.gmra.mxu0 %vm700_vm2, %v7540_v27  ;;  %v7558_v27 = vld [vmem:[%s8088_s24 + $0xf0] sm:$0xff] }
  0xe3   : > { %v8134_v29 = vpop.f32.mrf.mxu0 }
  0xeb   : > { %v8137_v31 = vpop.f32.mrf.mxu0 }
  0xee   : > { %5849 = vmatmul.msk.bf16.gmra.mxu0 %vm700_vm2, %v7541_v30 }
  0xf3   : > { %v8140_v32 = vpop.f32.mrf.mxu0 }
  0xfb   : > { %v8143_v34 = vpop.f32.mrf.mxu0 }
  0xfe   : > { %5850 = vmatmul.msk.bf16.gmra.mxu0 %vm700_vm2, %v7542_v33 }
 0x103   : > { %v8146_v35 = vpop.f32.mrf.mxu0 }
 0x10b   : > { %v8149_v37 = vpop.f32.mrf.mxu0 }
 0x10c   : > { %10611 = vst [vmem:[#allocation6_spill] sm:$0xff] %v8149_v37 }
 0x10e   : > { %5851 = vmatmul.msk.bf16.gmra.mxu0 %vm700_vm2, %v7543_v36  ;;  %v7559_v36 = vld [vmem:[%s8088_s24 + $0xf8] sm:$0xff] }
 0x113   : > { %v8152_v38 = vpop.f32.mrf.mxu0 }
 0x114   : > { %10612 = vst [vmem:[#allocation7_spill] sm:$0xff] %v8152_v38 }
 0x11b   : > { %v8155_v40 = vpop.f32.mrf.mxu0 }
 0x11c   : > { %10613 = vst [vmem:[#allocation8_spill] sm:$0xff] %v8155_v40 }
 0x11e   : > { %5852 = vmatmul.msk.bf16.gmra.mxu0 %vm700_vm2, %v7544_v39 }
 0x123   : > { %v8158_v41 = vpop.f32.mrf.mxu0 }
 0x124   : > { %10614 = vst [vmem:[#allocation9_spill] sm:$0xff] %v8158_v41 }
 0x12b   : > { %v8161_v43 = vpop.f32.mrf.mxu0 }
 0x12c   : > { %10615 = vst [vmem:[#allocation10_spill] sm:$0xff] %v8161_v43  ;;  %v7567_v43 = vld [vmem:[%s8088_s24 + $0x138] sm:$0xff] }
 0x12e   : > { %5853 = vmatmul.msk.bf16.gmra.mxu0 %vm700_vm2, %v7545_v42 }
 0x133   : > { %v8164_v44 = vpop.f32.mrf.mxu0 }
 0x134   : > { %10616 = vst [vmem:[#allocation11_spill] sm:$0xff] %v8164_v44  ;;  %v7566_v44 = vld [vmem:[%s8088_s24 + $0x130] sm:$0xff] }
 0x13b   : > { %v8167_v46 = vpop.f32.mrf.mxu0 }
 0x13e   : > { %5854 = vmatmul.msk.bf16.gmra.mxu0 %vm700_vm2, %v7546_v45  ;;  %v7560_v45 = vld [vmem:[%s8088_s24 + $0x100] sm:$0xff] }
 0x143   : > { %v8170_v47 = vpop.f32.mrf.mxu0 }
 0x14b   : > { %v8173_v49 = vpop.f32.mrf.mxu0 }
 0x14e   : > { %5855 = vmatmul.msk.bf16.gmra.mxu0 %vm700_vm2, %v7547_v48 }
 0x152   : > { %v1064_v41 = vpop.f32.mrf.mxu2 }
 0x153   : > { %v8176_v50 = vpop.f32.mrf.mxu0 }
 0x15b   : > { %v8179_v52 = vpop.f32.mrf.mxu0 }
 0x15e   : > { %5856 = vmatmul.msk.bf16.gmra.mxu0 %vm700_vm2, %v7548_v51 }
 0x163   : > { %v8182_v53 = vpop.f32.mrf.mxu0 }
 0x16b   : > { %v8185_v55 = vpop.f32.mrf.mxu0 }
 0x16e   : > { %5857 = vmatmul.msk.bf16.gmra.mxu0 %vm700_vm2, %v7549_v54  ;;  %v7561_v54 = vld [vmem:[%s8088_s24 + $0x108] sm:$0xff] }
 0x173   : > { %v8188_v56 = vpop.f32.mrf.mxu0 }
 0x17b   : > { %v8191_v58 = vpop.f32.mrf.mxu0 }
 0x17e   : > { %5858 = vmatmul.msk.bf16.gmra.mxu0 %vm700_vm2, %v7550_v57 }
 0x183   : > { %v8194_v59 = vpop.f32.mrf.mxu0 }
 0x18b   : > { %v8197_v61 = vpop.f32.mrf.mxu0 }
 0x18e   : > { %5859 = vmatmul.msk.bf16.gmra.mxu0 %vm700_vm2, %v7551_v60 }
 0x193   : > { %v8200_v62 = vpop.f32.mrf.mxu0 }
 0x19b   : > { %v8203_v0 = vpop.f32.mrf.mxu0 }
 0x19e   : > { %5860 = vmatmul.msk.bf16.gmra.mxu0 %vm700_vm2, %v7552_v63  ;;  %v7562_v63 = vld [vmem:[%s8088_s24 + $0x110] sm:$0xff] }
 0x1a3   : > { %v8206_v1 = vpop.f32.mrf.mxu0 }
 0x1ab   : > { %v8209_v3 = vpop.f32.mrf.mxu0 }
 0x1ae   : > { %5861 = vmatmul.msk.bf16.gmra.mxu0 %vm700_vm2, %v7553_v2 }
 0x1b3   : > { %v8212_v4 = vpop.f32.mrf.mxu0 }
 0x1bb   : > { %v8215_v7 = vpop.f32.mrf.mxu0 }
 0x1be   : > { %5862 = vmatmul.msk.bf16.gmra.mxu0 %vm700_vm2, %v7554_v6 }
 0x1c3   : > { %v8218_v8 = vpop.f32.mrf.mxu0 }
 0x1c4   : > { %10617 = vst [vmem:[#allocation12_spill] sm:$0xff] %v8218_v8  ;;  %v7569_v8 = vld [vmem:[%s8088_s24 + $0x148] sm:$0xff] }
 0x1cb   : > { %v8221_v10 = vpop.f32.mrf.mxu0 }
 0x1cc   : > { %10618 = vst [vmem:[#allocation13_spill] sm:$0xff] %v8221_v10 }
 0x1ce   : > { %5863 = vmatmul.msk.bf16.gmra.mxu0 %vm700_vm2, %v7555_v9  ;;  %v7563_v9 = vld [vmem:[%s8088_s24 + $0x118] sm:$0xff] }
 0x1d3   : > { %v8224_v11 = vpop.f32.mrf.mxu0 }
 0x1d4   : > { %10619 = vst [vmem:[#allocation14_spill] sm:$0xff] %v8224_v11  ;;  %v7568_v11 = vld [vmem:[%s8088_s24 + $0x140] sm:$0xff] }
 0x1db   : > { %v8227_v13 = vpop.f32.mrf.mxu0 }
 0x1dc   : > { %10620 = vst [vmem:[#allocation15_spill] sm:$0xff] %v8227_v13 }
 0x1de   : > { %5864 = vmatmul.msk.bf16.gmra.mxu0 %vm700_vm2, %v7556_v12 }
 0x1e3   : > { %v8230_v14 = vpop.f32.mrf.mxu0 }
 0x1e4   : > { %10621 = vst [vmem:[#allocation16_spill] sm:$0xff] %v8230_v14 }
 0x1eb   : > { %v954_v18 = vpop.f32.mrf.mxu0 }
 0x1ec   : > { %v1089_v10 = vmax.f32 %v8167_v46, %v954_v18 }
 0x1ee   : > { %5865 = vmatmul.msk.bf16.gmra.mxu0 %vm700_vm2, %v7557_v15 }
 0x1f3   : > { %v956_v21 = vpop.f32.mrf.mxu0 }
 0x1fb   : > { %v8237_v30 = vpop.f32.mrf.mxu0 }
 0x1fe   : > { %5866 = vmatmul.msk.bf16.gmra.mxu0 %vm700_vm2, %v7558_v27 }
 0x203   : > { %v8240_v33 = vpop.f32.mrf.mxu0 }
 0x20b   : > { %v8243_v39 = vpop.f32.mrf.mxu0 }
 0x20e   : > { %5867 = vmatmul.msk.bf16.gmra.mxu0 %vm700_vm2, %v7559_v36 }
 0x213   : > { %v8246_v42 = vpop.f32.mrf.mxu0 }
 0x21b   : > { %v8249_v48 = vpop.f32.mrf.mxu0 }
 0x21e   : > { %5868 = vmatmul.msk.bf16.gmra.mxu0 %vm700_vm2, %v7560_v45  ;;  %v7565_v45 = vld [vmem:[%s8088_s24 + $0x128] sm:$0xff] }
 0x223   : > { %v8252_v51 = vpop.f32.mrf.mxu0 }
 0x22b   : > { %v8255_v57 = vpop.f32.mrf.mxu0 }
 0x22e   : > { %5869 = vmatmul.msk.bf16.gmra.mxu0 %vm700_vm2, %v7561_v54 }
 0x233   : > { %v8258_v60 = vpop.f32.mrf.mxu0 }
 0x23b   : > { %v8261_v2 = vpop.f32.mrf.mxu0 }
 0x23e   : > { %5870 = vmatmul.msk.bf16.gmra.mxu0 %vm700_vm2, %v7562_v63 }
 0x243   : > { %v8264_v6 = vpop.f32.mrf.mxu0 }
 0x24b   : > { %v8267_v12 = vpop.f32.mrf.mxu0 }
 0x24e   : > { %5871 = vmatmul.msk.bf16.gmra.mxu0 %vm700_vm2, %v7563_v9 }
 0x253   : > { %v8270_v15 = vpop.f32.mrf.mxu0 }
 0x25b   : > { %v8273_v27 = vpop.f32.mrf.mxu0 }
 0x25e   : > { %5872 = vmatmul.msk.bf16.gmra.mxu0 %vm700_vm2, %v7564_v24 }
 0x263   : > { %v8276_v36 = vpop.f32.mrf.mxu0 }
 0x26b   : > { %v8279_v54 = vpop.f32.mrf.mxu0 }
 0x26e   : > { %5873 = vmatmul.msk.bf16.gmra.mxu0 %vm700_vm2, %v7565_v45 }
 0x273   : > { %v8282_v63 = vpop.f32.mrf.mxu0 }
 0x274   : > { %10622 = vst [vmem:[#allocation17_spill] sm:$0xff] %v8282_v63 }
 0x27b   : > { %v8285_v14 = vpop.f32.mrf.mxu0 }
 0x27c   : > { %10623 = vst [vmem:[#allocation18_spill] sm:$0xff] %v8285_v14  ;;  %v1066_v14 = vpop.f32.mrf.mxu2 }
 0x27e   : > { %5874 = vmatmul.msk.bf16.gmra.mxu0 %vm700_vm2, %v7566_v44 }
 0x283   : > { %v8288_v9 = vpop.f32.mrf.mxu0 }
 0x284   : > { %10624 = vst [vmem:[#allocation19_spill] sm:$0xff] %v8288_v9  ;;  %v8302_v9 = vld [vmem:[%s10580_s2] ss:$0 sm:$0xff] }
 0x28b   : > { %v8291_v13 = vpop.f32.mrf.mxu0 }
 0x28c   : > { %10625 = vst [vmem:[#allocation20_spill] sm:$0xff] %v8291_v13 }
 0x28e   : > { %5875 = vmatmul.msk.bf16.gmra.mxu0 %vm700_vm2, %v7567_v43  ;;  %v1090_v43 = vmax.f32 %v8170_v47, %v956_v21 }
 0x293   : > { %v8294_v24 = vpop.f32.mrf.mxu0 }
 0x294   : > { %10626 = vst [vmem:[#allocation21_spill] sm:$0xff] %v8294_v24 }
 0x29b   : > { %v1009_v45 = vpop.f32.mrf.mxu0 }
 0x29c   : > { %v1111_v40 = vmax.f32 %v1009_v45, %v1064_v41 }
 0x29e   : > { %5876 = vmatmul.msk.bf16.gmra.mxu0 %vm700_vm2, %v7568_v11  ;;  %v1133_v44 = vmax.f32 %v1089_v10, %v1111_v40  ;;  %v1069_v40 = vmax.f32 %v8107_v16, %v8173_v49 }
 0x2a0   : > { %v1159_v63 = vadd.f32 %v8302_v9, %v1133_v44 }
 0x2a2   : > { %v1181_v45 = vmax.f32 %v1159_v63, 0.0 }
 0x2a3   : > { %v1011_v13 = vpop.f32.mrf.mxu0 }
 0x2a4   : > { %v1112_v24 = vmax.f32 %v1011_v13, %v1066_v14  ;;  %v1070_v13 = vmax.f32 %v8110_v17, %v8176_v50  ;;  %v1072_v50 = vmax.f32 %v8116_v20, %v8182_v53  ;;  %v1074_v20 = vmax.f32 %v8122_v23, %v8188_v56 }
 0x2a5   : > { %v1076_v23 = vmax.f32 %v8128_v26, %v8194_v59  ;;  %v1078_v26 = vmax.f32 %v8134_v29, %v8200_v62  ;;  %v1080_v29 = vmax.f32 %v8140_v32, %v8206_v1  ;;  %v1082_v32 = vmax.f32 %v8146_v35, %v8212_v4  ;;  %v10635_v35 = vld [vmem:[#allocation12_spill] sm:$0xff]  ;;  %v10636_v4 = vld [vmem:[#allocation7_spill] sm:$0xff] }
 0x2a6   : > { %v1134_v38 = vmax.f32 %v1090_v43, %v1112_v24  ;;  %v7570_v24 = vld [vmem:[%s8088_s24 + $0x150] sm:$0xff]  ;;  %s5584_s24 = scalar_lea.sflag [#allocation3], %s377_s30 }
 0x2a8   : > { %v1160_v41 = vadd.f32 %v8302_v9, %v1134_v38 }
 0x2aa   : > { %v1182_v11 = vmax.f32 %v1160_v41, 0.0 }
 0x2ab   : > { %v1014_v46 = vpop.f32.mrf.mxu0 }
 0x2ac   : > { %v1193_v10 = vpack.c.bf16 %v1182_v11, %v1181_v45  ;;  %v1091_v18 = vmax.f32 %v8237_v30, %v1014_v46 }
 0x2ae   : > { %v8312_v37 = vand.u32 %v1193_v10, %v8081_v5  ;;  %v1113_v47 = vmax.f32 %v1069_v40, %v1091_v18  ;;  %5877 = vmatmul.msk.bf16.gmra.mxu0 %vm700_vm2, %v7569_v8  ;;  %v1071_v8 = vmax.f32 %v8113_v19, %v8179_v52 }
 0x2b0   : > { %10627 = vst [vmem:[#allocation22_spill] sm:$0xff] %v8312_v37  ;;  %1364 = vmatpush.bf16.msrb.mxu2 %v8312_v37  ;;  %v1139_v21 = vadd.f32 %v8302_v9, %v1113_v47 }
 0x2b2   : > { %v1161_v30 = vmax.f32 %v1139_v21, 0.0 }
 0x2b3   : > { %v1016_v38 = vpop.f32.mrf.mxu0 }
 0x2b4   : > { %v1092_v14 = vmax.f32 %v8240_v33, %v1016_v38 }
 0x2b6   : > { %v1114_v16 = vmax.f32 %v1070_v13, %v1092_v14 }
 0x2b8   : > { %v1140_v49 = vadd.f32 %v8302_v9, %v1114_v16 }
 0x2ba   : > { %v1162_v63 = vmax.f32 %v1140_v49, 0.0 }
 0x2bb   : > { %v1019_v44 = vpop.f32.mrf.mxu0 }
 0x2bc   : > { %v8324_v43 = vpack.c.bf16 %v1162_v63, %v1161_v30  ;;  %v1093_v41 = vmax.f32 %v8243_v39, %v1019_v44  ;;  %v1073_v39 = vmax.f32 %v8119_v22, %v8185_v55  ;;  %v1075_v22 = vmax.f32 %v8125_v25, %v8191_v58 }
 0x2bd   : > { %v1077_v25 = vmax.f32 %v8131_v28, %v8197_v61 }
 0x2be   : > { %10628 = vst [vmem:[#allocation23_spill] sm:$0xff] %v8324_v43  ;;  %v1115_v45 = vmax.f32 %v1071_v8, %v1093_v41  ;;  %5878 = vmatmul.msk.bf16.gmra.mxu0 %vm700_vm2, %v7570_v24 }
 0x2c0   : > { %v1141_v11 = vadd.f32 %v8302_v9, %v1115_v45 }
 0x2c2   : > { %v1163_v10 = vmax.f32 %v1141_v11, 0.0 }
 0x2c3   : > { %v1021_v17 = vpop.f32.mrf.mxu0 }
 0x2c4   : > { %v1094_v33 = vmax.f32 %v8246_v42, %v1021_v17 }
 0x2c6   : > { %v1116_v46 = vmax.f32 %v1072_v50, %v1094_v33 }
 0x2c8   : > { %v1142_v40 = vadd.f32 %v8302_v9, %v1116_v46 }
 0x2ca   : > { %v1164_v19 = vmax.f32 %v1142_v40, 0.0 }
 0x2cb   : > { %v1024_v52 = vpop.f32.mrf.mxu0 }
 0x2cc   : > { %v8335_v18 = vpack.c.bf16 %v1164_v19, %v1163_v10  ;;  %v1095_v47 = vmax.f32 %v8249_v48, %v1024_v52 }
 0x2ce   : > { %10629 = vst [vmem:[#allocation24_spill] sm:$0xff] %v8335_v18  ;;  %v1117_v38 = vmax.f32 %v1073_v39, %v1095_v47 }
 0x2d0   : > { %v1143_v42 = vadd.f32 %v8302_v9, %v1117_v38 }
 0x2d2   : > { %v1165_v16 = vmax.f32 %v1143_v42, 0.0 }
 0x2d3   : > { %v1026_v13 = vpop.f32.mrf.mxu0 }
 0x2d4   : > { %v1096_v53 = vmax.f32 %v8252_v51, %v1026_v13 }
 0x2d6   : > { %v1118_v14 = vmax.f32 %v1074_v20, %v1096_v53 }
 0x2d8   : > { %v1144_v21 = vadd.f32 %v8302_v9, %v1118_v14 }
 0x2da   : > { %v1166_v49 = vmax.f32 %v1144_v21, 0.0 }
 0x2db   : > { %v1029_v30 = vpop.f32.mrf.mxu0 }
 0x2dc   : > { %v8345_v55 = vpack.c.bf16 %v1166_v49, %v1165_v16  ;;  %v1097_v48 = vmax.f32 %v8255_v57, %v1029_v30 }
 0x2de   : > { %10630 = vst [vmem:[#allocation25_spill] sm:$0xff] %v8345_v55  ;;  %v1119_v63 = vmax.f32 %v1075_v22, %v1097_v48 }
 0x2e0   : > { %v1145_v51 = vadd.f32 %v8302_v9, %v1119_v63 }
 0x2e2   : > { %v1167_v41 = vmax.f32 %v1145_v51, 0.0 }
 0x2e3   : > { %v1031_v24 = vpop.f32.mrf.mxu0 }
 0x2e4   : > { %v1098_v56 = vmax.f32 %v8258_v60, %v1031_v24 }
 0x2e6   : > { %v1120_v44 = vmax.f32 %v1076_v23, %v1098_v56  ;;  %v10637_v23 = vld [vmem:[#allocation17_spill] sm:$0xff] }
 0x2e8   : > { %v1146_v8 = vadd.f32 %v8302_v9, %v1120_v44 }
 0x2ea   : > { %v1168_v45 = vmax.f32 %v1146_v8, 0.0 }
 0x2eb   : > { %v1034_v17 = vpop.f32.mrf.mxu0 }
 0x2ec   : > { %v8355_v58 = vpack.c.bf16 %v1168_v45, %v1167_v41  ;;  %v1099_v57 = vmax.f32 %v8261_v2, %v1034_v17  ;;  %v1079_v2 = vmax.f32 %v8137_v31, %v8203_v0  ;;  %v1081_v31 = vmax.f32 %v8143_v34, %v8209_v3  ;;  %v10634_v34 = vld [vmem:[#allocation6_spill] sm:$0xff] }
 0x2ed   : > { %v1083_v3 = vmax.f32 %v10634_v34, %v8215_v7  ;;  %v10639_v7 = vld [vmem:[#allocation13_spill] sm:$0xff] }
 0x2ee   : > { %10631 = vst [vmem:[#allocation26_spill] sm:$0xff] %v8355_v58  ;;  %v1121_v50 = vmax.f32 %v1077_v25, %v1099_v57 }
 0x2f0   : > { %v1147_v60 = vadd.f32 %v8302_v9, %v1121_v50  ;;  %v10640_v50 = vld [vmem:[#allocation8_spill] sm:$0xff] }
 0x2f2   : > { %v1169_v40 = vmax.f32 %v1147_v60, 0.0  ;;  %v10641_v60 = vld [vmem:[#allocation14_spill] sm:$0xff] }
 0x2f3   : > { %v1036_v33 = vpop.f32.mrf.mxu0 }
 0x2f4   : > { %v1100_v59 = vmax.f32 %v8264_v6, %v1036_v33  ;;  %v1085_v33 = vmax.f32 %v10640_v50, %v10639_v7  ;;  %v5898_v50 = vld [vmem:[%s10581_s3 + $0x20] sm:$0xf] }
 0x2f6   : > { %v1122_v11 = vmax.f32 %v1078_v26, %v1100_v59 }
 0x2f8   : > { %v1148_v46 = vadd.f32 %v8302_v9, %v1122_v11  ;;  %v10642_v11 = vld [vmem:[#allocation9_spill] sm:$0xff] }
 0x2fa   : > { %v1170_v10 = vmax.f32 %v1148_v46, 0.0  ;;  %v1086_v46 = vmax.f32 %v10642_v11, %v10641_v60 }
 0x2fb   : > { %v1039_v19 = vpop.f32.mrf.mxu0 }
 0x2fc   : > { %v8363_v28 = vpack.c.bf16 %v1170_v10, %v1169_v40  ;;  %v1101_v61 = vmax.f32 %v8267_v12, %v1039_v19  ;;  %v10643_v40 = vld [vmem:[#allocation19_spill] sm:$0xff] }
 0x2fe   : > { %10632 = vst [vmem:[#allocation27_spill] sm:$0xff] %v8363_v28  ;;  %v1123_v52 = vmax.f32 %v1079_v2, %v1101_v61 }
 0x300   : > { %v1149_v6 = vadd.f32 %v8302_v9, %v1123_v52 }
 0x302   : > { %v1171_v13 = vmax.f32 %v1149_v6, 0.0  ;;  %v10645_v6 = vld [vmem:[#allocation20_spill] sm:$0xff] }
 0x303   : > { %v1041_v39 = vpop.f32.mrf.mxu0 }
 0x304   : > { %v1102_v62 = vmax.f32 %v8270_v15, %v1041_v39 }
 0x306   : > { %v1124_v47 = vmax.f32 %v1080_v29, %v1102_v62 }
 0x308   : > { %v1150_v38 = vadd.f32 %v8302_v9, %v1124_v47 }
 0x30a   : > { %v1172_v20 = vmax.f32 %v1150_v38, 0.0  ;;  %v10646_v38 = vld [vmem:[#allocation15_spill] sm:$0xff] }
 0x30b   : > { %v1044_v53 = vpop.f32.mrf.mxu0 }
 0x30c   : > { %v8373_v42 = vpack.c.bf16 %v1172_v20, %v1171_v13  ;;  %v1103_v12 = vmax.f32 %v8273_v27, %v1044_v53  ;;  %v10647_v13 = vld [vmem:[#allocation10_spill] sm:$0xff] }
 0x30d   : > { %v1087_v20 = vmax.f32 %v10647_v13, %v10646_v38  ;;  %v5914_v13 = vld [vmem:[%s10581_s3 + $0x40] sm:$0xf] }
 0x30e   : > { %10633 = vst [vmem:[#allocation28_spill] sm:$0xff] %v8373_v42  ;;  %v1125_v0 = vmax.f32 %v1081_v31, %v1103_v12  ;;  %v10648_v31 = vld [vmem:[#allocation16_spill] sm:$0xff] }
 0x310   : > { %v1151_v15 = vadd.f32 %v8302_v9, %v1125_v0  ;;  %v10649_v0 = vld [vmem:[#allocation11_spill] sm:$0xff] }
 0x312   : > { %v1173_v49 = vmax.f32 %v1151_v15, 0.0  ;;  %v5882_v15 = vld [vmem:[%s10581_s3] sm:$0xf] }
 0x313   : > { %v1046_v14 = vpop.f32.mrf.mxu0 }
 0x314   : > { %v1104_v1 = vmax.f32 %v8276_v36, %v1046_v14  ;;  %v1084_v36 = vmax.f32 %v10636_v4, %v10635_v35  ;;  %v1088_v14 = vmax.f32 %v10649_v0, %v10648_v31  ;;  %v7607_v4 = vld [vmem:[%s10582_s4 + $0x10] sm:$0xff] }
 0x316   : > { %v1126_v21 = vmax.f32 %v1082_v32, %v1104_v1  ;;  %v10650_v32 = vld [vmem:[#allocation21_spill] sm:$0xff] }
 0x318   : > { %v1152_v16 = vadd.f32 %v8302_v9, %v1126_v21 }
 0x31a   : > { %v1174_v30 = vmax.f32 %v1152_v16, 0.0 }
 0x31b   : > { %v1049_v22 = vpop.f32.mrf.mxu0 }
 0x31c   : > { %v8383_v48 = vpack.c.bf16 %v1174_v30, %v1173_v49  ;;  %v1105_v27 = vmax.f32 %v8279_v54, %v1049_v22  ;;  %v10638_v54 = vld [vmem:[#allocation18_spill] sm:$0xff]  ;;  %v5970_v30 = vld [vmem:[%s10581_s3 + $0x80] sm:$0xf] }
 0x31d   : > { %v7574_v49 = vld [vmem:[%s10581_s3 + $0x4] sm:$0xf0] }
 0x31e   : > { %v1127_v63 = vmax.f32 %v1083_v3, %v1105_v27  ;;  %v7592_v22 = vld [vmem:[%s10581_s3 + $0x84] sm:$0xf0]  ;;  %v7608_v27 = vld [vmem:[%s10582_s4 + $0x18] sm:$0xff]  ;;  %v5883_v3 = vor.u32 %v7574_v49, %v5882_v15  ;;  %v5922_v15 = vld [vmem:[%s10581_s3 + $0x50] sm:$0xf] }
 0x31f   : > { %v7602_v49 = vld [vmem:[%s10581_s3 + $0xd4] sm:$0xf0] }
 0x320   : > { %v1153_v51 = vadd.f32 %v8302_v9, %v1127_v63  ;;  %v5971_v63 = vor.u32 %v7592_v22, %v5970_v30 }
 0x322   : > { %v1175_v41 = vmax.f32 %v1153_v51, 0.0  ;;  %v5890_v51 = vld [vmem:[%s10581_s3 + $0x10] sm:$0xf] }
 0x323   : > { %v1051_v24 = vpop.f32.mrf.mxu0 }
 0x324   : > { %v1106_v56 = vmax.f32 %v10637_v23, %v1051_v24  ;;  %v5884_v23 = vld [vmem:[%s10581_s3 + $0x8] sm:$0xf0] }
 0x326   : > { %v1128_v44 = vmax.f32 %v1084_v36, %v1106_v56 }
 0x328   : > { %v1154_v8 = vadd.f32 %v8302_v9, %v1128_v44  ;;  %v7576_v44 = vld [vmem:[%s10581_s3 + $0x14] sm:$0xf0] }
 0x32a   : > { %v1176_v45 = vmax.f32 %v1154_v8, 0.0  ;;  %v5978_v8 = vld [vmem:[%s10581_s3 + $0x90] sm:$0xf] }
 0x32b   : > { %v1054_v17 = vpop.f32.mrf.mxu0 }
 0x32c   : > { %v8393_v25 = vpack.c.bf16 %v1176_v45, %v1175_v41  ;;  %v1107_v57 = vmax.f32 %v10638_v54, %v1054_v17  ;;  %v7594_v41 = vld [vmem:[%s10581_s3 + $0x94] sm:$0xf0]  ;;  %v5891_v45 = vor.u32 %v7576_v44, %v5890_v51  ;;  %v7575_v54 = vld [vmem:[%s10581_s3 + $0x14] sm:$0xf]  ;;  %v5932_v51 = vld [vmem:[%s10581_s3 + $0x68] sm:$0xf0] }
 0x32d   : > { %v5979_v17 = vor.u32 %v7594_v41, %v5978_v8  ;;  %v5938_v8 = vld [vmem:[%s10581_s3 + $0x70] sm:$0xf]  ;;  %v7588_v41 = vld [vmem:[%s10581_s3 + $0x74] sm:$0xf0] }
 0x32e   : > { %1310 = vmatpush.bf16.msra.mxu1 %v8393_v25  ;;  %1533 = vmatpush.bf16.msra.mxu3 %v8393_v25  ;;  %v1129_v26 = vmax.f32 %v1085_v33, %v1107_v57  ;;  %v5892_v57 = vld [vmem:[%s10581_s3 + $0x18] sm:$0xf0]  ;;  %v7578_v33 = vld [vmem:[%s10581_s3 + $0x24] sm:$0xf0] }
 0x32f   : > { %3228 = vmatpush.bf16.msrb.mxu0 %v8393_v25  ;;  %v5895_v7 = vor.u32 %v7575_v54, %v5892_v57  ;;  %v5899_v60 = vor.u32 %v7578_v33, %v5898_v50  ;;  %v5939_v54 = vor.u32 %v7588_v41, %v5938_v8  ;;  %v7587_v50 = vld [vmem:[%s10581_s3 + $0x74] sm:$0xf]  ;;  %v5940_v33 = vld [vmem:[%s10581_s3 + $0x78] sm:$0xf0] }
 0x330   : > { %v1155_v19 = vadd.f32 %v8302_v9, %v1129_v26  ;;  %v5986_v26 = vld [vmem:[%s10581_s3 + $0xa0] sm:$0xf] }
 0x332   : > { %1311 = vmatpush.bf16.msra.mxu1 %v8383_v48  ;;  %1534 = vmatpush.bf16.msra.mxu3 %v8383_v48  ;;  %v1177_v52 = vmax.f32 %v1155_v19, 0.0  ;;  %v5906_v19 = vld [vmem:[%s10581_s3 + $0x30] sm:$0xf] }
 0x333   : > { %3229 = vmatpush.bf16.msrb.mxu0 %v8383_v48  ;;  %v1056_v59 = vpop.f32.mrf.mxu0 }
 0x334   : > { %v1108_v10 = vmax.f32 %v10643_v40, %v1056_v59  ;;  %v7596_v59 = vld [vmem:[%s10581_s3 + $0xa4] sm:$0xf0]  ;;  %v5900_v40 = vld [vmem:[%s10581_s3 + $0x28] sm:$0xf0] }
 0x335   : > { %v5987_v11 = vor.u32 %v7596_v59, %v5986_v26  ;;  %v5943_v26 = vor.u32 %v7587_v50, %v5940_v33  ;;  %v7589_v59 = vld [vmem:[%s10582_s4] sm:$0xff]  ;;  %v7601_v33 = vld [vmem:[%s10581_s3 + $0xd4] sm:$0xf] }
 0x336   : > { %v1130_v61 = vmax.f32 %v1086_v46, %v1108_v10  ;;  %1312 = vmatpush.bf16.msra.mxu1 %v8373_v42  ;;  %1535 = vmatpush.bf16.msra.mxu3 %v8373_v42  ;;  %v7577_v46 = vld [vmem:[%s10581_s3 + $0x24] sm:$0xf] }
 0x337   : > { %3230 = vmatpush.bf16.msrb.mxu0 %v8373_v42  ;;  %v5903_v10 = vor.u32 %v7577_v46, %v5900_v40  ;;  %v5972_v46 = vld [vmem:[%s10581_s3 + $0x88] sm:$0xf0] }
 0x338   : > { %v1156_v2 = vadd.f32 %v8302_v9, %v1130_v61  ;;  %v7580_v61 = vld [vmem:[%s10581_s3 + $0x34] sm:$0xf0] }
 0x33a   : > { %v1178_v39 = vmax.f32 %v1156_v2, 0.0  ;;  %1313 = vmatpush.bf16.msra.mxu1 %v8363_v28  ;;  %1536 = vmatpush.bf16.msra.mxu3 %v8363_v28  ;;  %v5994_v2 = vld [vmem:[%s10581_s3 + $0xb0] sm:$0xf] }
 0x33b   : > { %3231 = vmatpush.bf16.msrb.mxu0 %v8363_v28  ;;  %v1059_v29 = vpop.f32.mrf.mxu0 }
 0x33c   : > { %v8415_v62 = vpack.c.bf16 %v1178_v39, %v1177_v52  ;;  %v1109_v47 = vmax.f32 %v10645_v6, %v1059_v29  ;;  %v7598_v52 = vld [vmem:[%s10581_s3 + $0xb4] sm:$0xf0]  ;;  %v5907_v39 = vor.u32 %v7580_v61, %v5906_v19  ;;  %v7579_v6 = vld [vmem:[%s10581_s3 + $0x34] sm:$0xf] }
 0x33d   : > { %v5995_v29 = vor.u32 %v7598_v52, %v5994_v2  ;;  %v7593_v2 = vld [vmem:[%s10581_s3 + $0x94] sm:$0xf]  ;;  %v5980_v52 = vld [vmem:[%s10581_s3 + $0x98] sm:$0xf0] }
 0x33e   : > { %10644 = vst [vmem:[#allocation6_spill] sm:$0xff] %v8415_v62  ;;  %1314 = vmatpush.bf16.msra.mxu1 %v8355_v58  ;;  %1537 = vmatpush.bf16.msra.mxu3 %v8355_v58  ;;  %v1131_v53 = vmax.f32 %v1087_v20, %v1109_v47  ;;  %v5908_v47 = vld [vmem:[%s10581_s3 + $0x38] sm:$0xf0]  ;;  %v7582_v20 = vld [vmem:[%s10581_s3 + $0x44] sm:$0xf0] }
 0x33f   : > { %3232 = vmatpush.bf16.msrb.mxu0 %v8355_v58  ;;  %v5911_v38 = vor.u32 %v7579_v6, %v5908_v47  ;;  %v5915_v31 = vor.u32 %v7582_v20, %v5914_v13  ;;  %v5983_v47 = vor.u32 %v7593_v2, %v5980_v52  ;;  %v7603_v52 = vld [vmem:[%s10581_s3 + $0xe4] sm:$0xf] }
 0x340   : > { %v1157_v21 = vadd.f32 %v8302_v9, %v1131_v53  ;;  %v6002_v53 = vld [vmem:[%s10581_s3 + $0xc0] sm:$0xf] }
 0x342   : > { %1315 = vmatpush.bf16.msra.mxu1 %v8345_v55  ;;  %1538 = vmatpush.bf16.msra.mxu3 %v8345_v55  ;;  %v1179_v24 = vmax.f32 %v1157_v21, 0.0  ;;  %v7584_v21 = vld [vmem:[%s10581_s3 + $0x54] sm:$0xf0] }
 0x343   : > { %3233 = vmatpush.bf16.msrb.mxu0 %v8345_v55  ;;  %v1061_v12 = vpop.f32.mrf.mxu0  ;;  %v5923_v30 = vor.u32 %v7584_v21, %v5922_v15 }
 0x344   : > { %v1110_v1 = vmax.f32 %v10650_v32, %v1061_v12  ;;  %v7600_v12 = vld [vmem:[%s10581_s3 + $0xc4] sm:$0xf0]  ;;  %v5916_v32 = vld [vmem:[%s10581_s3 + $0x48] sm:$0xf0] }
 0x345   : > { %v6003_v0 = vor.u32 %v7600_v12, %v6002_v53  ;;  %v7595_v12 = vld [vmem:[%s10581_s3 + $0xa4] sm:$0xf] }
 0x346   : > { %v1132_v16 = vmax.f32 %v1088_v14, %v1110_v1  ;;  %1316 = vmatpush.bf16.msra.mxu1 %v8335_v18  ;;  %1539 = vmatpush.bf16.msra.mxu3 %v8335_v18  ;;  %v7581_v14 = vld [vmem:[%s10581_s3 + $0x44] sm:$0xf] }
 0x347   : > { %3234 = vmatpush.bf16.msrb.mxu0 %v8335_v18  ;;  %v5919_v1 = vor.u32 %v7581_v14, %v5916_v32 }
 0x348   : > { %v1158_v34 = vadd.f32 %v8302_v9, %v1132_v16  ;;  %v7573_v9 = vld [vmem:[%s10581_s3 + $0x4] sm:$0xf]  ;;  %v6010_v16 = vld [vmem:[%s10581_s3 + $0xd0] sm:$0xf] }
 0x349   : > { %v5887_v56 = vor.u32 %v7573_v9, %v5884_v23  ;;  %v6011_v22 = vor.u32 %v7602_v49, %v6010_v16 }
 0x34a   : > { %v1180_v35 = vmax.f32 %v1158_v34, 0.0  ;;  %1317 = vmatpush.bf16.msra.mxu1 %v8324_v43  ;;  %1540 = vmatpush.bf16.msra.mxu3 %v8324_v43  ;;  %v5924_v34 = vld [vmem:[%s10581_s3 + $0x58] sm:$0xf0] }
 0x34b   : > { %3235 = vmatpush.bf16.msrb.mxu0 %v8324_v43 }
 0x34c   : > { %v8455_v36 = vpack.c.bf16 %v1180_v35, %v1179_v24  ;;  %v7586_v24 = vld [vmem:[%s10581_s3 + $0x64] sm:$0xf0]  ;;  %v6018_v35 = vld [vmem:[%s10581_s3 + $0xe0] sm:$0xf] }
 0x34d   : > { %1318 = vmatmul.bf16.vlgmr.msra.gmra.mxu1 %v5883_v3  ;;  %1541 = vmatmul.bf16.vlgmr.msra.gmra.mxu3 %v5971_v63  ;;  %v5930_v63 = vld [vmem:[%s10581_s3 + $0x60] sm:$0xf] }
 0x34e   : > { %1687 = vmatpush.bf16.msrb.mxu1 %v7608_v27  ;;  %10651 = vst [vmem:[#allocation12_spill] sm:$0xff] %v8455_v36  ;;  %1365 = vmatpush.bf16.msrb.mxu2 %v8455_v36  ;;  %v7583_v27 = vld [vmem:[%s10581_s3 + $0x54] sm:$0xf]  ;;  %v5931_v9 = vor.u32 %v7586_v24, %v5930_v63 }
 0x34f   : > { %3607 = vmatpush.bf16.msra.mxu0 %v8312_v37  ;;  %v5927_v3 = vor.u32 %v7583_v27, %v5924_v34 }
 0x352   : > { %1688 = vmatpush.bf16.msrb.mxu1 %v7607_v4  ;;  %1366 = vmatpush.bf16.msrb.mxu2 %v8415_v62  ;;  %v7604_v4 = vld [vmem:[%s10581_s3 + $0xe4] sm:$0xf0] }
 0x353   : > { %3608 = vmatpush.bf16.msra.mxu0 %v8455_v36  ;;  %v6019_v23 = vor.u32 %v7604_v4, %v6018_v35 }
 0x355   : > { %5944 = vmatmul.msk.bf16.vlgmr.msrb.gmra.mxu2 %vm1282_vm3, %v5887_v56  ;;  %v7585_v56 = vld [vmem:[%s10581_s3 + $0x64] sm:$0xf] }
 0x356   : > { %1982 = vmatpush.bf16.msra.mxu1 %v8312_v37  ;;  %1587 = vmatpush.bf16.msra.mxu2 %v8312_v37  ;;  %v5935_v44 = vor.u32 %v7585_v56, %v5932_v51  ;;  %v6004_v56 = vld [vmem:[%s10581_s3 + $0xc8] sm:$0xf0] }
 0x357   : > { %3609 = vmatpush.bf16.msra.mxu0 %v8415_v62 }
 0x35a   : > { %1983 = vmatpush.bf16.msra.mxu1 %v8455_v36  ;;  %1588 = vmatpush.bf16.msra.mxu2 %v8455_v36 }
 0x35d   : > { %1323 = vmatmul.bf16.gmra.mxu1 %v5891_v45  ;;  %1546 = vmatmul.bf16.gmra.mxu3 %v5979_v17  ;;  %v6026_v45 = vld [vmem:[%s10581_s3 + $0xf0] sm:$0xf]  ;;  %v7606_v17 = vld [vmem:[%s10581_s3 + $0xf4] sm:$0xf0] }
 0x35e   : > { %1984 = vmatpush.bf16.msra.mxu1 %v8415_v62  ;;  %1589 = vmatpush.bf16.msra.mxu2 %v8415_v62  ;;  %v6027_v57 = vor.u32 %v7606_v17, %v6026_v45 }
 0x362   : > { %1928 = vmatpush.bf16.msrb.mxu2 %v8393_v25 }
 0x365   : > { %5945 = vmatmul.msk.bf16.gmra.mxu2 %vm1282_vm3, %v5895_v7  ;;  %v7590_v7 = vld [vmem:[%s10582_s4 + $0x8] sm:$0xff] }
 0x366   : > { %1929 = vmatpush.bf16.msrb.mxu2 %v8383_v48  ;;  %1772 = vmatpush.bf16.msrb.mxu3 %v7590_v7 }
 0x36a   : > { %1930 = vmatpush.bf16.msrb.mxu2 %v8373_v42  ;;  %1773 = vmatpush.bf16.msrb.mxu3 %v7589_v59 }
 0x36d   : > { %1328 = vmatmul.bf16.gmra.mxu1 %v5899_v60  ;;  %1551 = vmatmul.bf16.gmra.mxu3 %v5987_v11  ;;  %v7591_v11 = vld [vmem:[%s10581_s3 + $0x84] sm:$0xf] }
 0x36e   : > { %1931 = vmatpush.bf16.msrb.mxu2 %v8363_v28  ;;  %v5975_v40 = vor.u32 %v7591_v11, %v5972_v46 }
 0x372   : > { %1932 = vmatpush.bf16.msrb.mxu2 %v8355_v58 }
 0x375   : > { %5946 = vmatmul.msk.bf16.gmra.mxu2 %vm1282_vm3, %v5903_v10 }
 0x376   : > { %1933 = vmatpush.bf16.msrb.mxu2 %v8345_v55 }
 0x37a   : > { %1934 = vmatpush.bf16.msrb.mxu2 %v8335_v18 }
 0x37d   : > { %1333 = vmatmul.bf16.gmra.mxu1 %v5907_v39  ;;  %1556 = vmatmul.bf16.gmra.mxu3 %v5995_v29 }
 0x37e   : > { %1935 = vmatpush.bf16.msrb.mxu2 %v8324_v43 }
 0x385   : > { %5947 = vmatmul.msk.bf16.gmra.mxu2 %vm1282_vm3, %v5911_v38 }
 0x38d   : > { %1338 = vmatmul.bf16.gmra.mxu1 %v5915_v31  ;;  %1561 = vmatmul.bf16.gmra.mxu3 %v6003_v0  ;;  %v5988_v31 = vld [vmem:[%s10581_s3 + $0xa8] sm:$0xf0] }
 0x395   : > { %5948 = vmatmul.msk.bf16.gmra.mxu2 %vm1282_vm3, %v5919_v1  ;;  %v5991_v1 = vor.u32 %v7595_v12, %v5988_v31 }
 0x39d   : > { %1343 = vmatmul.bf16.gmra.mxu1 %v5923_v30  ;;  %1566 = vmatmul.bf16.gmra.mxu3 %v6011_v22  ;;  %v7597_v30 = vld [vmem:[%s10581_s3 + $0xb4] sm:$0xf]  ;;  %v5996_v22 = vld [vmem:[%s10581_s3 + $0xb8] sm:$0xf0] }
 0x39e   : > { %v5999_v63 = vor.u32 %v7597_v30, %v5996_v22 }
 0x3a5   : > { %5949 = vmatmul.msk.bf16.gmra.mxu2 %vm1282_vm3, %v5927_v3 }
 0x3ad   : > { %1348 = vmatmul.bf16.gmra.mxu1 %v5931_v9  ;;  %1571 = vmatmul.bf16.gmra.mxu3 %v6019_v23  ;;  %v7599_v23 = vld [vmem:[%s10581_s3 + $0xc4] sm:$0xf] }
 0x3ae   : > { %v6007_v45 = vor.u32 %v7599_v23, %v6004_v56 }
 0x3b5   : > { %5950 = vmatmul.msk.bf16.gmra.mxu2 %vm1282_vm3, %v5935_v44 }
 0x3bd   : > { %1353 = vmatmul.bf16.gmra.mxu1 %v5939_v54  ;;  %1576 = vmatmul.bf16.gmra.mxu3 %v6027_v57 }
 0x3c5   : > { %5951 = vmatmul.msk.bf16.gmra.mxu2 %vm1282_vm3, %v5943_v26  ;;  %v6012_v26 = vld [vmem:[%s10581_s3 + $0xd8] sm:$0xf0] }
 0x3c6   : > { %v6015_v46 = vor.u32 %v7601_v33, %v6012_v26 }
 0x3ca   : > { %v1319_v60 = vpop.f32.mrf.mxu1 }
 0x3d0   : > { %v8667_v51 = vpop.f32.mrf.mxu3 }
 0x3d2   : > { %v1321_v10 = vpop.f32.mrf.mxu1 }
 0x3d5   : > { %6032 = vmatmul.msk.bf16.vlgmr.msra.gmra.mxu2 %vm1282_vm3, %v5975_v40 }
 0x3d6   : > { %2253 = vmatpush.bf16.msra.mxu2 %v8393_v25 }
 0x3d8   : > { %v1368_v19 = vpop.f32.mrf.mxu2  ;;  %v1544_v7 = vpop.f32.mrf.mxu3 }
 0x3d9   : > { %v1369_v29 = vadd.f32 %v1368_v19, %v1319_v60 }
 0x3da   : > { %2254 = vmatpush.bf16.msra.mxu2 %v8383_v48  ;;  %v1324_v61 = vpop.f32.mrf.mxu1 }
 0x3de   : > { %2255 = vmatpush.bf16.msra.mxu2 %v8373_v42 }
 0x3e0   : > { %v1370_v39 = vpop.f32.mrf.mxu2  ;;  %v8677_v40 = vpop.f32.mrf.mxu3 }
 0x3e1   : > { %v1371_v6 = vadd.f32 %v1370_v39, %v1321_v10  ;;  %v6020_v39 = vld [vmem:[%s10581_s3 + $0xe8] sm:$0xf0] }
 0x3e2   : > { %2256 = vmatpush.bf16.msra.mxu2 %v8363_v28  ;;  %v1326_v38 = vpop.f32.mrf.mxu1 }
 0x3e3   : > { %v1408_v13 = vpack.c.bf16 %v1371_v6, %v1369_v29 }
 0x3e5   : > { %6033 = vmatmul.msk.bf16.gmra.mxu2 %vm1282_vm3, %v5983_v47  ;;  %6068 = vmatmul.msk.bf16.vlgmr.msrb.gmra.mxu3 %vm1656_vm4, %v1408_v13  ;;  %v6023_v13 = vor.u32 %v7603_v52, %v6020_v39 }
 0x3e6   : > { %2257 = vmatpush.bf16.msra.mxu2 %v8355_v58 }
 0x3e8   : > { %v1373_v20 = vpop.f32.mrf.mxu2  ;;  %v8681_v2 = vpop.f32.mrf.mxu3 }
 0x3e9   : > { %v1374_v14 = vadd.f32 %v1373_v20, %v1324_v61 }
 0x3ea   : > { %2258 = vmatpush.bf16.msra.mxu2 %v8345_v55  ;;  %v1329_v53 = vpop.f32.mrf.mxu1 }
 0x3ee   : > { %2259 = vmatpush.bf16.msra.mxu2 %v8335_v18 }
 0x3f0   : > { %v1375_v0 = vpop.f32.mrf.mxu2 }
 0x3f1   : > { %v1376_v32 = vadd.f32 %v1375_v0, %v1326_v38  ;;  %v7605_v0 = vld [vmem:[%s10581_s3 + $0xf4] sm:$0xf] }
 0x3f2   : > { %2260 = vmatpush.bf16.msra.mxu2 %v8324_v43  ;;  %v1331_v15 = vpop.f32.mrf.mxu1 }
 0x3f3   : > { %v1409_v21 = vpack.c.bf16 %v1376_v32, %v1374_v14  ;;  %v6028_v14 = vld [vmem:[%s10581_s3 + $0xf8] sm:$0xf0] }
 0x3f5   : > { %6034 = vmatmul.msk.bf16.gmra.mxu2 %vm1282_vm3, %v5991_v1  ;;  %6069 = vmatmul.msk.bf16.gmra.mxu3 %vm1656_vm4, %v1409_v21 }
 0x3f8   : > { %v1378_v16 = vpop.f32.mrf.mxu2 }
 0x3f9   : > { %v1379_v34 = vadd.f32 %v1378_v16, %v1329_v53  ;;  %v1552_v53 = vpop.f32.mrf.mxu3  ;;  %v6031_v16 = vor.u32 %v7605_v0, %v6028_v14 }
 0x3fa   : > { %v1334_v49 = vpop.f32.mrf.mxu1 }
 0x400   : > { %v1380_v27 = vpop.f32.mrf.mxu2 }
 0x401   : > { %v1381_v3 = vadd.f32 %v1380_v27, %v1331_v15  ;;  %v1554_v1 = vpop.f32.mrf.mxu3 }
 0x402   : > { %v1336_v24 = vpop.f32.mrf.mxu1 }
 0x403   : > { %v1410_v35 = vpack.c.bf16 %v1381_v3, %v1379_v34  ;;  %v6094_v3 = vld [vmem:[%s10581_s3 + $0x100] sm:$0xf] }
 0x405   : > { %6035 = vmatmul.msk.bf16.gmra.mxu2 %vm1282_vm3, %v5999_v63  ;;  %6070 = vmatmul.msk.bf16.gmra.mxu3 %vm1656_vm4, %v1410_v35  ;;  %v7610_v63 = vld [vmem:[%s10581_s3 + $0x104] sm:$0xf0] }
 0x408   : > { %v1383_v4 = vpop.f32.mrf.mxu2 }
 0x409   : > { %v1384_v8 = vadd.f32 %v1383_v4, %v1334_v49  ;;  %v1557_v27 = vpop.f32.mrf.mxu3 }
 0x40a   : > { %v1339_v9 = vpop.f32.mrf.mxu1 }
 0x410   : > { %v1385_v44 = vpop.f32.mrf.mxu2 }
 0x411   : > { %v1386_v41 = vadd.f32 %v1385_v44, %v1336_v24  ;;  %v1559_v56 = vpop.f32.mrf.mxu3 }
 0x412   : > { %v1341_v17 = vpop.f32.mrf.mxu1 }
 0x413   : > { %v1411_v54 = vpack.c.bf16 %v1386_v41, %v1384_v8  ;;  %v6102_v8 = vld [vmem:[%s10581_s3 + $0x110] sm:$0xf]  ;;  %v7612_v41 = vld [vmem:[%s10581_s3 + $0x114] sm:$0xf0] }
 0x415   : > { %6036 = vmatmul.msk.bf16.gmra.mxu2 %vm1282_vm3, %v6007_v45  ;;  %6071 = vmatmul.msk.bf16.gmra.mxu3 %vm1656_vm4, %v1411_v54 }
 0x418   : > { %v1388_v57 = vpop.f32.mrf.mxu2 }
 0x419   : > { %v1389_v60 = vadd.f32 %v1388_v57, %v1339_v9  ;;  %v6095_v9 = vor.u32 %v7610_v63, %v6094_v3  ;;  %v6103_v57 = vor.u32 %v7612_v41, %v6102_v8  ;;  %v6142_v63 = vld [vmem:[%s10581_s3 + $0x160] sm:$0xf] }
 0x41a   : > { %v1344_v50 = vpop.f32.mrf.mxu1 }
 0x420   : > { %v1390_v59 = vpop.f32.mrf.mxu2 }
 0x421   : > { %v1391_v11 = vadd.f32 %v1390_v59, %v1341_v17 }
 0x422   : > { %v1346_v19 = vpop.f32.mrf.mxu1 }
 0x423   : > { %v1412_v10 = vpack.c.bf16 %v1391_v11, %v1389_v60 }
 0x425   : > { %6037 = vmatmul.msk.bf16.gmra.mxu2 %vm1282_vm3, %v6015_v46  ;;  %6072 = vmatmul.msk.bf16.gmra.mxu3 %vm1656_vm4, %v1412_v10 }
 0x428   : > { %v1393_v61 = vpop.f32.mrf.mxu2 }
 0x429   : > { %v1394_v47 = vadd.f32 %v1393_v61, %v1344_v50  ;;  %v7616_v61 = vld [vmem:[%s10581_s3 + $0x134] sm:$0xf0] }
 0x42a   : > { %v1349_v6 = vpop.f32.mrf.mxu1 }
 0x430   : > { %v1395_v29 = vpop.f32.mrf.mxu2 }
 0x431   : > { %v1396_v38 = vadd.f32 %v1395_v29, %v1346_v19  ;;  %v6118_v19 = vld [vmem:[%s10581_s3 + $0x130] sm:$0xf] }
 0x432   : > { %v1351_v31 = vpop.f32.mrf.mxu1 }
 0x433   : > { %v1413_v20 = vpack.c.bf16 %v1396_v38, %v1394_v47  ;;  %v1562_v47 = vpop.f32.mrf.mxu3  ;;  %v6126_v38 = vld [vmem:[%s10581_s3 + $0x140] sm:$0xf] }
 0x435   : > { %6038 = vmatmul.msk.bf16.gmra.mxu2 %vm1282_vm3, %v6023_v13  ;;  %6073 = vmatmul.msk.bf16.gmra.mxu3 %vm1656_vm4, %v1413_v20  ;;  %v7618_v13 = vld [vmem:[%s10581_s3 + $0x144] sm:$0xf0] }
 0x438   : > { %v1398_v12 = vpop.f32.mrf.mxu2 }
 0x439   : > { %v1399_v15 = vadd.f32 %v1398_v12, %v1349_v6 }
 0x43a   : > { %v1354_v30 = vpop.f32.mrf.mxu1 }
 0x43b   : > { %v1564_v14 = vpop.f32.mrf.mxu3 }
 0x440   : > { %v1400_v32 = vpop.f32.mrf.mxu2 }
 0x441   : > { %v1401_v21 = vadd.f32 %v1400_v32, %v1351_v31 }
 0x442   : > { %v1356_v34 = vpop.f32.mrf.mxu1 }
 0x443   : > { %v1414_v49 = vpack.c.bf16 %v1401_v21, %v1399_v15  ;;  %v6134_v15 = vld [vmem:[%s10581_s3 + $0x150] sm:$0xf]  ;;  %v7620_v21 = vld [vmem:[%s10581_s3 + $0x154] sm:$0xf0] }
 0x445   : > { %6039 = vmatmul.msk.bf16.gmra.mxu2 %vm1282_vm3, %v6031_v16  ;;  %6074 = vmatmul.msk.bf16.gmra.mxu3 %vm1656_vm4, %v1414_v49 }
 0x448   : > { %v1403_v22 = vpop.f32.mrf.mxu2 }
 0x449   : > { %v1404_v35 = vadd.f32 %v1403_v22, %v1354_v30  ;;  %v6135_v22 = vor.u32 %v7620_v21, %v6134_v15 }
 0x450   : > { %v1405_v24 = vpop.f32.mrf.mxu2 }
 0x451   : > { %v1406_v4 = vadd.f32 %v1405_v24, %v1356_v34  ;;  %v7622_v24 = vld [vmem:[%s10581_s3 + $0x164] sm:$0xf0] }
 0x453   : > { %v1415_v23 = vpack.c.bf16 %v1406_v4, %v1404_v35 }
 0x455   : > { %6075 = vmatmul.msk.bf16.gmra.mxu3 %vm1656_vm4, %v1415_v23  ;;  %1936 = vmatmul.bf16.vlgmr.msrb.gmra.mxu2 %v6095_v9  ;;  %v6143_v23 = vor.u32 %v7622_v24, %v6142_v63 }
 0x456   : > { %2578 = vmatpush.bf16.msrb.mxu2 %v8393_v25 }
 0x458   : > { %v1591_v44 = vpop.f32.mrf.mxu2 }
 0x459   : > { %v1592_v17 = vadd.f32 %v1591_v44, %v8667_v51  ;;  %v6110_v51 = vld [vmem:[%s10581_s3 + $0x120] sm:$0xf] }
 0x45a   : > { %2579 = vmatpush.bf16.msrb.mxu2 %v8383_v48 }
 0x45e   : > { %2580 = vmatpush.bf16.msrb.mxu2 %v8373_v42 }
 0x460   : > { %v1593_v45 = vpop.f32.mrf.mxu2 }
 0x461   : > { %v1594_v54 = vadd.f32 %v1593_v45, %v1544_v7  ;;  %v7614_v7 = vld [vmem:[%s10581_s3 + $0x124] sm:$0xf0]  ;;  %v6150_v45 = vld [vmem:[%s10581_s3 + $0x170] sm:$0xf] }
 0x462   : > { %2581 = vmatpush.bf16.msrb.mxu2 %v8363_v28  ;;  %v6111_v11 = vor.u32 %v7614_v7, %v6110_v51 }
 0x463   : > { %v1631_v50 = vpack.c.bf16 %v1594_v54, %v1592_v17  ;;  %v7624_v17 = vld [vmem:[%s10581_s3 + $0x174] sm:$0xf0] }
 0x465   : > { %6052 = vmatmul.msk.bf16.vlgmr.msrb.gmra.mxu1 %vm1656_vm4, %v1631_v50  ;;  %1941 = vmatmul.bf16.gmra.mxu2 %v6103_v57 }
 0x466   : > { %2307 = vmatpush.bf16.msrb.mxu1 %v8312_v37  ;;  %2582 = vmatpush.bf16.msrb.mxu2 %v8355_v58 }
 0x468   : > { %v1596_v33 = vpop.f32.mrf.mxu2 }
 0x469   : > { %v1597_v59 = vadd.f32 %v1596_v33, %v8677_v40  ;;  %v6151_v33 = vor.u32 %v7624_v17, %v6150_v45 }
 0x46a   : > { %2308 = vmatpush.bf16.msrb.mxu1 %v8455_v36  ;;  %2583 = vmatpush.bf16.msrb.mxu2 %v8345_v55 }
 0x46e   : > { %2309 = vmatpush.bf16.msrb.mxu1 %v8415_v62  ;;  %2584 = vmatpush.bf16.msrb.mxu2 %v8335_v18 }
 0x470   : > { %v1598_v26 = vpop.f32.mrf.mxu2 }
 0x471   : > { %v1599_v60 = vadd.f32 %v1598_v26, %v8681_v2  ;;  %v6119_v2 = vor.u32 %v7616_v61, %v6118_v19 }
 0x472   : > { %2585 = vmatpush.bf16.msrb.mxu2 %v8324_v43 }
 0x473   : > { %v1632_v46 = vpack.c.bf16 %v1599_v60, %v1597_v59  ;;  %v6202_v59 = vld [vmem:[%s10581_s3 + $0x180] sm:$0xf]  ;;  %v7628_v60 = vld [vmem:[%s10581_s3 + $0x184] sm:$0xf0] }
 0x474   : > { %v6203_v61 = vor.u32 %v7628_v60, %v6202_v59  ;;  %v7638_v59 = vld [vmem:[%s10581_s3 + $0x1d4] sm:$0xf0] }
 0x475   : > { %6053 = vmatmul.msk.bf16.gmra.mxu1 %vm1656_vm4, %v1632_v46  ;;  %1946 = vmatmul.bf16.gmra.mxu2 %v6111_v11 }
 0x478   : > { %v1601_v10 = vpop.f32.mrf.mxu2 }
 0x479   : > { %v1602_v40 = vadd.f32 %v1601_v10, %v1552_v53  ;;  %v6127_v53 = vor.u32 %v7618_v13, %v6126_v38 }
 0x480   : > { %v1603_v52 = vpop.f32.mrf.mxu2 }
 0x481   : > { %v1604_v39 = vadd.f32 %v1603_v52, %v1554_v1  ;;  %v1567_v1 = vpop.f32.mrf.mxu3 }
 0x483   : > { %v1633_v29 = vpack.c.bf16 %v1604_v39, %v1602_v40  ;;  %v7609_v39 = vld [vmem:[%s10581_s3 + $0x104] sm:$0xf] }
 0x485   : > { %6054 = vmatmul.msk.bf16.gmra.mxu1 %vm1656_vm4, %v1633_v29  ;;  %1951 = vmatmul.bf16.gmra.mxu2 %v6119_v2  ;;  %v6096_v2 = vld [vmem:[%s10581_s3 + $0x108] sm:$0xf0]  ;;  %v6210_v29 = vld [vmem:[%s10581_s3 + $0x190] sm:$0xf] }
 0x486   : > { %v6099_v38 = vor.u32 %v7609_v39, %v6096_v2  ;;  %v6136_v39 = vld [vmem:[%s10581_s3 + $0x158] sm:$0xf0]  ;;  %v6250_v2 = vld [vmem:[%s10581_s3 + $0x1e0] sm:$0xf] }
 0x488   : > { %v1606_v6 = vpop.f32.mrf.mxu2 }
 0x489   : > { %v1607_v12 = vadd.f32 %v1606_v6, %v1557_v27  ;;  %v1569_v34 = vpop.f32.mrf.mxu3  ;;  %v7630_v6 = vld [vmem:[%s10581_s3 + $0x194] sm:$0xf0] }
 0x48a   : > { %v6211_v13 = vor.u32 %v7630_v6, %v6210_v29  ;;  %v7640_v29 = vld [vmem:[%s10581_s3 + $0x1e4] sm:$0xf0] }
 0x490   : > { %v1608_v20 = vpop.f32.mrf.mxu2 }
 0x491   : > { %v1609_v31 = vadd.f32 %v1608_v20, %v1559_v56  ;;  %v1572_v56 = vpop.f32.mrf.mxu3 }
 0x493   : > { %v1634_v0 = vpack.c.bf16 %v1609_v31, %v1607_v12 }
 0x495   : > { %6055 = vmatmul.msk.bf16.gmra.mxu1 %vm1656_vm4, %v1634_v0  ;;  %1956 = vmatmul.bf16.gmra.mxu2 %v6127_v53  ;;  %v7611_v53 = vld [vmem:[%s10581_s3 + $0x114] sm:$0xf]  ;;  %v6104_v0 = vld [vmem:[%s10581_s3 + $0x118] sm:$0xf0] }
 0x496   : > { %v6107_v15 = vor.u32 %v7611_v53, %v6104_v0 }
 0x498   : > { %v1611_v32 = vpop.f32.mrf.mxu2 }
 0x499   : > { %v1612_v49 = vadd.f32 %v1611_v32, %v1562_v47  ;;  %v1574_v41 = vpop.f32.mrf.mxu3  ;;  %v7632_v32 = vld [vmem:[%s10581_s3 + $0x1a4] sm:$0xf0] }
 0x4a0   : > { %v1613_v16 = vpop.f32.mrf.mxu2 }
 0x4a1   : > { %v1614_v30 = vadd.f32 %v1613_v16, %v1564_v14  ;;  %v1577_v7 = vpop.f32.mrf.mxu3  ;;  %v6218_v14 = vld [vmem:[%s10581_s3 + $0x1a0] sm:$0xf] }
 0x4a2   : > { %v6219_v21 = vor.u32 %v7632_v32, %v6218_v14  ;;  %v7621_v32 = vld [vmem:[%s10581_s3 + $0x164] sm:$0xf] }
 0x4a3   : > { %v1635_v27 = vpack.c.bf16 %v1614_v30, %v1612_v49 }
 0x4a5   : > { %6056 = vmatmul.msk.bf16.gmra.mxu1 %vm1656_vm4, %v1635_v27  ;;  %1961 = vmatmul.bf16.gmra.mxu2 %v6135_v22  ;;  %v7613_v22 = vld [vmem:[%s10581_s3 + $0x124] sm:$0xf]  ;;  %v6112_v27 = vld [vmem:[%s10581_s3 + $0x128] sm:$0xf0] }
 0x4a6   : > { %v6115_v24 = vor.u32 %v7613_v22, %v6112_v27  ;;  %v7642_v22 = vld [vmem:[%s10581_s3 + $0x1f4] sm:$0xf0] }
 0x4a8   : > { %v1616_v3 = vpop.f32.mrf.mxu2 }
 0x4a9   : > { %v1617_v4 = vadd.f32 %v1616_v3, %v1567_v1  ;;  %v1579_v11 = vpop.f32.mrf.mxu3  ;;  %v7634_v3 = vld [vmem:[%s10581_s3 + $0x1b4] sm:$0xf0] }
 0x4b0   : > { %v1618_v35 = vpop.f32.mrf.mxu2 }
 0x4b1   : > { %v1619_v9 = vadd.f32 %v1618_v35, %v1569_v34  ;;  %v6226_v34 = vld [vmem:[%s10581_s3 + $0x1b0] sm:$0xf] }
 0x4b2   : > { %v6227_v35 = vor.u32 %v7634_v3, %v6226_v34 }
 0x4b3   : > { %v1636_v44 = vpack.c.bf16 %v1619_v9, %v1617_v4 }
 0x4b5   : > { %6057 = vmatmul.msk.bf16.gmra.mxu1 %vm1656_vm4, %v1636_v44  ;;  %1966 = vmatmul.bf16.gmra.mxu2 %v6143_v23  ;;  %v6120_v44 = vld [vmem:[%s10581_s3 + $0x138] sm:$0xf0] }
 0x4b8   : > { %v1621_v8 = vpop.f32.mrf.mxu2 }
 0x4b9   : > { %v1622_v57 = vadd.f32 %v1621_v8, %v1572_v56  ;;  %v7615_v56 = vld [vmem:[%s10581_s3 + $0x134] sm:$0xf]  ;;  %v6234_v8 = vld [vmem:[%s10581_s3 + $0x1c0] sm:$0xf] }
 0x4ba   : > { %v6123_v17 = vor.u32 %v7615_v56, %v6120_v44 }
 0x4c0   : > { %v1623_v54 = vpop.f32.mrf.mxu2 }
 0x4c1   : > { %v1624_v50 = vadd.f32 %v1623_v54, %v1574_v41  ;;  %v7636_v41 = vld [vmem:[%s10581_s3 + $0x1c4] sm:$0xf0] }
 0x4c2   : > { %v6235_v54 = vor.u32 %v7636_v41, %v6234_v8  ;;  %v7625_v8 = vld [vmem:[%s10582_s4 + $0x20] sm:$0xff]  ;;  %v7623_v41 = vld [vmem:[%s10581_s3 + $0x174] sm:$0xf] }
 0x4c3   : > { %v1637_v51 = vpack.c.bf16 %v1624_v50, %v1622_v57 }
 0x4c5   : > { %6058 = vmatmul.msk.bf16.gmra.mxu1 %vm1656_vm4, %v1637_v51  ;;  %1971 = vmatmul.bf16.gmra.mxu2 %v6151_v33  ;;  %v7617_v51 = vld [vmem:[%s10581_s3 + $0x144] sm:$0xf] }
 0x4c8   : > { %v1626_v26 = vpop.f32.mrf.mxu2 }
 0x4c9   : > { %v1627_v10 = vadd.f32 %v1626_v26, %v1577_v7  ;;  %v6128_v7 = vld [vmem:[%s10581_s3 + $0x148] sm:$0xf0]  ;;  %v6242_v26 = vld [vmem:[%s10581_s3 + $0x1d0] sm:$0xf] }
 0x4d0   : > { %v1628_v46 = vpop.f32.mrf.mxu2 }
 0x4d1   : > { %v1629_v19 = vadd.f32 %v1628_v46, %v1579_v11  ;;  %v6131_v11 = vor.u32 %v7617_v51, %v6128_v7  ;;  %v6243_v46 = vor.u32 %v7638_v59, %v6242_v26  ;;  %v7646_v51 = vld [vmem:[%s10581_s3 + $0x204] sm:$0xf0] }
 0x4d3   : > { %v1638_v52 = vpack.c.bf16 %v1629_v19, %v1627_v10 }
 0x4d5   : > { %6059 = vmatmul.msk.bf16.gmra.mxu1 %vm1656_vm4, %v1638_v52  ;;  %2261 = vmatmul.bf16.vlgmr.msra.gmra.mxu2 %v6203_v61  ;;  %v7619_v52 = vld [vmem:[%s10581_s3 + $0x154] sm:$0xf] }
 0x4d6   : > { %2903 = vmatpush.bf16.msra.mxu2 %v8393_v25 }
 0x4d8   : > { %v8777_v40 = vpop.f32.mrf.mxu2 }
 0x4da   : > { %2904 = vmatpush.bf16.msra.mxu2 %v8383_v48 }
 0x4de   : > { %2905 = vmatpush.bf16.msra.mxu2 %v8373_v42 }
 0x4e0   : > { %v8793_v47 = vpop.f32.mrf.mxu2 }
 0x4e2   : > { %2906 = vmatpush.bf16.msra.mxu2 %v8363_v28  ;;  %v8796_v20 = vpop.f32.mrf.mxu1 }
 0x4e5   : > { %6156 = vmatmul.msk.bf16.vlgmr.msra.gmra.mxu1 %vm1282_vm3, %v6099_v38  ;;  %2266 = vmatmul.bf16.gmra.mxu2 %v6211_v13  ;;  %v6139_v38 = vor.u32 %v7619_v52, %v6136_v39  ;;  %v6251_v13 = vor.u32 %v7640_v29, %v6250_v2  ;;  %v7627_v2 = vld [vmem:[%s10581_s3 + $0x184] sm:$0xf] }
 0x4e6   : > { %2632 = vmatpush.bf16.msra.mxu1 %v8312_v37  ;;  %2907 = vmatpush.bf16.msra.mxu2 %v8355_v58 }
 0x4e8   : > { %v8801_v12 = vpop.f32.mrf.mxu2 }
 0x4ea   : > { %2633 = vmatpush.bf16.msra.mxu1 %v8455_v36  ;;  %2908 = vmatpush.bf16.msra.mxu2 %v8345_v55  ;;  %v8805_v31 = vpop.f32.mrf.mxu1 }
 0x4ee   : > { %2634 = vmatpush.bf16.msra.mxu1 %v8415_v62  ;;  %2909 = vmatpush.bf16.msra.mxu2 %v8335_v18 }
 0x4f0   : > { %v8821_v1 = vpop.f32.mrf.mxu2 }
 0x4f2   : > { %2910 = vmatpush.bf16.msra.mxu2 %v8324_v43  ;;  %v8824_v16 = vpop.f32.mrf.mxu1 }
 0x4f5   : > { %6157 = vmatmul.msk.bf16.gmra.mxu1 %vm1282_vm3, %v6107_v15  ;;  %2271 = vmatmul.bf16.gmra.mxu2 %v6219_v21  ;;  %v6144_v15 = vld [vmem:[%s10581_s3 + $0x168] sm:$0xf0]  ;;  %v6258_v21 = vld [vmem:[%s10581_s3 + $0x1f0] sm:$0xf] }
 0x4f6   : > { %v6147_v34 = vor.u32 %v7621_v32, %v6144_v15  ;;  %v6259_v3 = vor.u32 %v7642_v22, %v6258_v21  ;;  %v7648_v32 = vld [vmem:[%s10581_s3 + $0x214] sm:$0xf0] }
 0x4f8   : > { %v8827_v49 = vpop.f32.mrf.mxu2 }
 0x4fa   : > { %v8829_v30 = vpop.f32.mrf.mxu1 }
 0x500   : > { %v8843_v63 = vpop.f32.mrf.mxu2 }
 0x502   : > { %v8845_v4 = vpop.f32.mrf.mxu1 }
 0x505   : > { %6158 = vmatmul.msk.bf16.gmra.mxu1 %vm1282_vm3, %v6115_v24  ;;  %2276 = vmatmul.bf16.gmra.mxu2 %v6227_v35  ;;  %v7626_v35 = vld [vmem:[%s10582_s4 + $0x28] sm:$0xff] }
 0x506   : > { %2081 = vmatpush.bf16.msra.mxu3 %v7626_v35 }
 0x508   : > { %v8848_v9 = vpop.f32.mrf.mxu2 }
 0x50a   : > { %v8850_v23 = vpop.f32.mrf.mxu1  ;;  %2082 = vmatpush.bf16.msra.mxu3 %v7625_v8 }
 0x510   : > { %v8864_v45 = vpop.f32.mrf.mxu2 }
 0x512   : > { %v8866_v57 = vpop.f32.mrf.mxu1 }
 0x515   : > { %6159 = vmatmul.msk.bf16.gmra.mxu1 %vm1282_vm3, %v6123_v17  ;;  %2281 = vmatmul.bf16.gmra.mxu2 %v6235_v54  ;;  %v6152_v17 = vld [vmem:[%s10581_s3 + $0x178] sm:$0xf0]  ;;  %v6310_v54 = vld [vmem:[%s10581_s3 + $0x200] sm:$0xf] }
 0x516   : > { %v6155_v26 = vor.u32 %v7623_v41, %v6152_v17  ;;  %v6311_v59 = vor.u32 %v7646_v51, %v6310_v54  ;;  %v7629_v51 = vld [vmem:[%s10581_s3 + $0x194] sm:$0xf] }
 0x518   : > { %v8869_v50 = vpop.f32.mrf.mxu2 }
 0x51a   : > { %v8871_v33 = vpop.f32.mrf.mxu1 }
 0x520   : > { %v8885_v60 = vpop.f32.mrf.mxu2 }
 0x522   : > { %v8887_v10 = vpop.f32.mrf.mxu1 }
 0x525   : > { %6160 = vmatmul.msk.bf16.gmra.mxu1 %vm1282_vm3, %v6131_v11  ;;  %2286 = vmatmul.bf16.gmra.mxu2 %v6243_v46  ;;  %v8958_v46 = vpop.f32.mrf.mxu3 }
 0x528   : > { %v8890_v19 = vpop.f32.mrf.mxu2 }
 0x52a   : > { %v8892_v61 = vpop.f32.mrf.mxu1 }
 0x52d   : > { %v8970_v29 = vpop.f32.mrf.mxu3 }
 0x530   : > { %v8906_v6 = vpop.f32.mrf.mxu2 }
 0x532   : > { %v8908_v53 = vpop.f32.mrf.mxu1 }
 0x535   : > { %6161 = vmatmul.msk.bf16.gmra.mxu1 %vm1282_vm3, %v6139_v38  ;;  %2291 = vmatmul.bf16.gmra.mxu2 %v6251_v13  ;;  %v6204_v38 = vld [vmem:[%s10581_s3 + $0x188] sm:$0xf0]  ;;  %v6318_v13 = vld [vmem:[%s10581_s3 + $0x210] sm:$0xf] }
 0x536   : > { %v6207_v21 = vor.u32 %v7627_v2, %v6204_v38  ;;  %v6319_v22 = vor.u32 %v7648_v32, %v6318_v13 }
 0x538   : > { %v8911_v0 = vpop.f32.mrf.mxu2 }
 0x53a   : > { %v8913_v14 = vpop.f32.mrf.mxu1 }
 0x540   : > { %v8927_v27 = vpop.f32.mrf.mxu2 }
 0x542   : > { %v8929_v24 = vpop.f32.mrf.mxu1 }
 0x545   : > { %6162 = vmatmul.msk.bf16.gmra.mxu1 %vm1282_vm3, %v6147_v34  ;;  %2296 = vmatmul.bf16.gmra.mxu2 %v6259_v3  ;;  %v8986_v3 = vpop.f32.mrf.mxu3 }
 0x548   : > { %v8935_v56 = vpop.f32.mrf.mxu2 }
 0x54a   : > { %v8937_v44 = vpop.f32.mrf.mxu1 }
 0x54d   : > { %v9009_v13 = vpop.f32.mrf.mxu3 }
 0x550   : > { %v8954_v7 = vpop.f32.mrf.mxu2 }
 0x552   : > { %v8956_v11 = vpop.f32.mrf.mxu1 }
 0x555   : > { %6163 = vmatmul.msk.bf16.gmra.mxu1 %vm1282_vm3, %v6155_v26  ;;  %2586 = vmatmul.bf16.vlgmr.msrb.gmra.mxu2 %v6311_v59  ;;  %v6212_v26 = vld [vmem:[%s10581_s3 + $0x198] sm:$0xf0]  ;;  %v6326_v59 = vld [vmem:[%s10581_s3 + $0x220] sm:$0xf] }
 0x556   : > { %3282 = vmatpush.bf16.msrb.mxu2 %v8312_v37  ;;  %v6215_v2 = vor.u32 %v7629_v51, %v6212_v26  ;;  %v6220_v51 = vld [vmem:[%s10581_s3 + $0x1a8] sm:$0xf0]  ;;  %v6334_v26 = vld [vmem:[%s10581_s3 + $0x230] sm:$0xf] }
 0x558   : > { %v8962_v52 = vpop.f32.mrf.mxu2 }
 0x55a   : > { %3283 = vmatpush.bf16.msrb.mxu2 %v8455_v36  ;;  %v8965_v39 = vpop.f32.mrf.mxu1 }
 0x55e   : > { %3284 = vmatpush.bf16.msrb.mxu2 %v8415_v62 }
 0x560   : > { %v8982_v15 = vpop.f32.mrf.mxu2 }
 0x562   : > { %v1986_v34 = vpop.f32.mrf.mxu1 }
 0x563   : > { %v1987_v41 = vadd.f32 %v1986_v34, %v8777_v40  ;;  %v7650_v40 = vld [vmem:[%s10581_s3 + $0x224] sm:$0xf0] }
 0x564   : > { %v6327_v38 = vor.u32 %v7650_v40, %v6326_v59 }
 0x565   : > { %6264 = vmatmul.msk.bf16.vlgmr.msrb.gmra.mxu1 %vm1282_vm3, %v6207_v21  ;;  %2591 = vmatmul.bf16.gmra.mxu2 %v6319_v22 }
 0x566   : > { %2957 = vmatpush.bf16.msrb.mxu1 %v8312_v37 }
 0x568   : > { %v8988_v35 = vpop.f32.mrf.mxu2 }
 0x56a   : > { %2958 = vmatpush.bf16.msrb.mxu1 %v8455_v36  ;;  %v1988_v8 = vpop.f32.mrf.mxu1  ;;  %v7635_v36 = vld [vmem:[%s10581_s3 + $0x1c4] sm:$0xf] }
 0x56b   : > { %v1989_v17 = vadd.f32 %v1988_v8, %v8793_v47 }
 0x56d   : > { %v2026_v54 = vpack.c.bf16 %v1989_v17, %v1987_v41  ;;  %v9016_v41 = vpop.f32.mrf.mxu3 }
 0x56e   : > { %2959 = vmatpush.bf16.msrb.mxu1 %v8415_v62 }
 0x56f   : > { %6176 = vmatmul.msk.bf16.vlgmr.msra.gmra.mxu3 %vm1656_vm4, %v2026_v54  ;;  %v7631_v54 = vld [vmem:[%s10581_s3 + $0x1a4] sm:$0xf] }
 0x570   : > { %v9007_v47 = vpop.f32.mrf.mxu2  ;;  %v6223_v59 = vor.u32 %v7631_v54, %v6220_v51  ;;  %v6228_v54 = vld [vmem:[%s10581_s3 + $0x1b8] sm:$0xf0]  ;;  %v6342_v51 = vld [vmem:[%s10581_s3 + $0x240] sm:$0xf] }
 0x572   : > { %v1991_v32 = vpop.f32.mrf.mxu1 }
 0x573   : > { %v1992_v34 = vadd.f32 %v1991_v32, %v8801_v12  ;;  %v7652_v12 = vld [vmem:[%s10581_s3 + $0x234] sm:$0xf0] }
 0x574   : > { %v6335_v40 = vor.u32 %v7652_v12, %v6334_v26  ;;  %v7654_v26 = vld [vmem:[%s10581_s3 + $0x244] sm:$0xf0] }
 0x575   : > { %6265 = vmatmul.msk.bf16.gmra.mxu1 %vm1282_vm3, %v6215_v2  ;;  %2596 = vmatmul.bf16.gmra.mxu2 %v6327_v38  ;;  %v9034_v38 = vpop.f32.mrf.mxu3 }
 0x578   : > { %v9012_v21 = vpop.f32.mrf.mxu2 }
 0x57a   : > { %v1993_v22 = vpop.f32.mrf.mxu1 }
 0x57b   : > { %v1994_v8 = vadd.f32 %v1993_v22, %v8821_v1 }
 0x57d   : > { %v2027_v17 = vpack.c.bf16 %v1994_v8, %v1992_v34 }
 0x57f   : > { %6177 = vmatmul.msk.bf16.gmra.mxu3 %vm1656_vm4, %v2027_v17  ;;  %v7633_v17 = vld [vmem:[%s10581_s3 + $0x1b4] sm:$0xf] }
 0x580   : > { %v9031_v1 = vpop.f32.mrf.mxu2  ;;  %v6231_v12 = vor.u32 %v7633_v17, %v6228_v54  ;;  %v6236_v17 = vld [vmem:[%s10581_s3 + $0x1c8] sm:$0xf0]  ;;  %v6350_v54 = vld [vmem:[%s10581_s3 + $0x250] sm:$0xf] }
 0x582   : > { %v1996_v2 = vpop.f32.mrf.mxu1 }
 0x583   : > { %v1997_v34 = vadd.f32 %v1996_v2, %v8827_v49  ;;  %v9053_v49 = vpop.f32.mrf.mxu3 }
 0x585   : > { %6266 = vmatmul.msk.bf16.gmra.mxu1 %vm1282_vm3, %v6223_v59  ;;  %2601 = vmatmul.bf16.gmra.mxu2 %v6335_v40  ;;  %v6343_v59 = vor.u32 %v7654_v26, %v6342_v51  ;;  %v7656_v51 = vld [vmem:[%s10581_s3 + $0x254] sm:$0xf0] }
 0x588   : > { %v9036_v32 = vpop.f32.mrf.mxu2 }
 0x58a   : > { %v1998_v22 = vpop.f32.mrf.mxu1 }
 0x58b   : > { %v1999_v8 = vadd.f32 %v1998_v22, %v8843_v63  ;;  %v9060_v22 = vpop.f32.mrf.mxu3 }
 0x58d   : > { %v2028_v5 = vpack.c.bf16 %v1999_v8, %v1997_v34 }
 0x58f   : > { %6178 = vmatmul.msk.bf16.gmra.mxu3 %vm1656_vm4, %v2028_v5 }
 0x590   : > { %v9055_v63 = vpop.f32.mrf.mxu2 }
 0x592   : > { %v2001_v40 = vpop.f32.mrf.mxu1 }
 0x593   : > { %v2002_v8 = vadd.f32 %v2001_v40, %v8848_v9 }
 0x595   : > { %6267 = vmatmul.msk.bf16.gmra.mxu1 %vm1282_vm3, %v6231_v12  ;;  %2606 = vmatmul.bf16.gmra.mxu2 %v6343_v59  ;;  %v9079_v12 = vpop.f32.mrf.mxu3 }
 0x598   : > { %v9058_v2 = vpop.f32.mrf.mxu2 }
 0x59a   : > { %v2003_v34 = vpop.f32.mrf.mxu1 }
 0x59b   : > { %v2004_v62 = vadd.f32 %v2003_v34, %v8864_v45  ;;  %v6351_v45 = vor.u32 %v7656_v51, %v6350_v54  ;;  %v6358_v54 = vld [vmem:[%s10581_s3 + $0x260] sm:$0xf] }
 0x59d   : > { %v2029_v5 = vpack.c.bf16 %v2004_v62, %v2002_v8  ;;  %v6239_v62 = vor.u32 %v7635_v36, %v6236_v17  ;;  %v9089_v36 = vpop.f32.mrf.mxu3  ;;  %v6244_v17 = vld [vmem:[%s10581_s3 + $0x1d8] sm:$0xf0] }
 0x59f   : > { %6179 = vmatmul.msk.bf16.gmra.mxu3 %vm1656_vm4, %v2029_v5  ;;  %v7637_v5 = vld [vmem:[%s10581_s3 + $0x1d4] sm:$0xf] }
 0x5a0   : > { %v9077_v9 = vpop.f32.mrf.mxu2  ;;  %v6247_v51 = vor.u32 %v7637_v5, %v6244_v17  ;;  %v6252_v5 = vld [vmem:[%s10581_s3 + $0x1e8] sm:$0xf0]  ;;  %v6366_v17 = vld [vmem:[%s10581_s3 + $0x270] sm:$0xf] }
 0x5a2   : > { %v2006_v26 = vpop.f32.mrf.mxu1 }
 0x5a3   : > { %v2007_v34 = vadd.f32 %v2006_v26, %v8869_v50  ;;  %v7658_v50 = vld [vmem:[%s10581_s3 + $0x264] sm:$0xf0] }
 0x5a5   : > { %6268 = vmatmul.msk.bf16.gmra.mxu1 %vm1282_vm3, %v6239_v62  ;;  %2611 = vmatmul.bf16.gmra.mxu2 %v6351_v45  ;;  %v6359_v62 = vor.u32 %v7658_v50, %v6358_v54  ;;  %v9104_v26 = vpop.f32.mrf.mxu3  ;;  %v7660_v54 = vld [vmem:[%s10581_s3 + $0x274] sm:$0xf0] }
 0x5a8   : > { %v9082_v59 = vpop.f32.mrf.mxu2 }
 0x5aa   : > { %v2008_v40 = vpop.f32.mrf.mxu1 }
 0x5ab   : > { %v2009_v8 = vadd.f32 %v2008_v40, %v8885_v60 }
 0x5ad   : > { %v2030_v37 = vpack.c.bf16 %v2009_v8, %v2007_v34  ;;  %v9125_v50 = vpop.f32.mrf.mxu3 }
 0x5af   : > { %6180 = vmatmul.msk.bf16.gmra.mxu3 %vm1656_vm4, %v2030_v37  ;;  %v7639_v37 = vld [vmem:[%s10581_s3 + $0x1e4] sm:$0xf] }
 0x5b0   : > { %v9101_v60 = vpop.f32.mrf.mxu2 }
 0x5b2   : > { %v2011_v45 = vpop.f32.mrf.mxu1 }
 0x5b3   : > { %v2012_v8 = vadd.f32 %v2011_v45, %v8890_v19 }
 0x5b5   : > { %6269 = vmatmul.msk.bf16.gmra.mxu1 %vm1282_vm3, %v6247_v51  ;;  %2616 = vmatmul.bf16.gmra.mxu2 %v6359_v62  ;;  %v7644_v62 = vld [vmem:[%s10582_s4 + $0x38] sm:$0xff] }
 0x5b6   : > { %2406 = vmatpush.bf16.msrb.mxu3 %v7644_v62 }
 0x5b8   : > { %v9106_v40 = vpop.f32.mrf.mxu2 }
 0x5ba   : > { %v2013_v34 = vpop.f32.mrf.mxu1 }
 0x5bb   : > { %v2014_v43 = vadd.f32 %v2013_v34, %v8906_v6  ;;  %v6367_v6 = vor.u32 %v7660_v54, %v6366_v17  ;;  %v7641_v54 = vld [vmem:[%s10581_s3 + $0x1f4] sm:$0xf] }
 0x5bd   : > { %v2031_v18 = vpack.c.bf16 %v2014_v43, %v2012_v8  ;;  %v6255_v43 = vor.u32 %v7639_v37, %v6252_v5  ;;  %v7643_v37 = vld [vmem:[%s10582_s4 + $0x30] sm:$0xff]  ;;  %v9138_v5 = vpop.f32.mrf.mxu3 }
 0x5be   : > { %2407 = vmatpush.bf16.msrb.mxu3 %v7643_v37 }
 0x5bf   : > { %6181 = vmatmul.msk.bf16.gmra.mxu3 %vm1656_vm4, %v2031_v18 }
 0x5c0   : > { %v9123_v19 = vpop.f32.mrf.mxu2 }
 0x5c2   : > { %v2016_v51 = vpop.f32.mrf.mxu1 }
 0x5c3   : > { %v2017_v18 = vadd.f32 %v2016_v51, %v8911_v0  ;;  %v6418_v0 = vld [vmem:[%s10581_s3 + $0x280] sm:$0xf] }
 0x5c5   : > { %6270 = vmatmul.msk.bf16.gmra.mxu1 %vm1282_vm3, %v6255_v43  ;;  %2621 = vmatmul.bf16.gmra.mxu2 %v6367_v6  ;;  %v6260_v43 = vld [vmem:[%s10581_s3 + $0x1f8] sm:$0xf0] }
 0x5c6   : > { %v6263_v51 = vor.u32 %v7641_v54, %v6260_v43  ;;  %v6312_v54 = vld [vmem:[%s10581_s3 + $0x208] sm:$0xf0]  ;;  %v6426_v43 = vld [vmem:[%s10581_s3 + $0x290] sm:$0xf] }
 0x5c8   : > { %v9131_v45 = vpop.f32.mrf.mxu2 }
 0x5ca   : > { %v2018_v34 = vpop.f32.mrf.mxu1 }
 0x5cb   : > { %v2019_v8 = vadd.f32 %v2018_v34, %v8927_v27  ;;  %v7664_v27 = vld [vmem:[%s10581_s3 + $0x284] sm:$0xf0] }
 0x5cc   : > { %v6419_v62 = vor.u32 %v7664_v27, %v6418_v0  ;;  %v7666_v0 = vld [vmem:[%s10581_s3 + $0x294] sm:$0xf0] }
 0x5cd   : > { %v2032_v17 = vpack.c.bf16 %v2019_v8, %v2017_v18  ;;  %v9156_v18 = vpop.f32.mrf.mxu3 }
 0x5cf   : > { %6182 = vmatmul.msk.bf16.gmra.mxu3 %vm1656_vm4, %v2032_v17  ;;  %v7645_v17 = vld [vmem:[%s10581_s3 + $0x204] sm:$0xf] }
 0x5d0   : > { %v9153_v6 = vpop.f32.mrf.mxu2 }
 0x5d2   : > { %v2021_v34 = vpop.f32.mrf.mxu1 }
 0x5d3   : > { %v2022_v55 = vadd.f32 %v2021_v34, %v8935_v56 }
 0x5d5   : > { %6271 = vmatmul.msk.bf16.gmra.mxu1 %vm1282_vm3, %v6263_v51  ;;  %2911 = vmatmul.bf16.vlgmr.msra.gmra.mxu2 %v6419_v62  ;;  %v9175_v56 = vpop.f32.mrf.mxu3 }
 0x5d8   : > { %v9158_v8 = vpop.f32.mrf.mxu2 }
 0x5d9   : > { %10652 = vst [vmem:[#allocation7_spill] sm:$0xff] %v9158_v8 }
 0x5da   : > { %v2023_v37 = vpop.f32.mrf.mxu1 }
 0x5db   : > { %v2024_v58 = vadd.f32 %v2023_v37, %v8954_v7  ;;  %v6427_v7 = vor.u32 %v7666_v0, %v6426_v43  ;;  %v7668_v43 = vld [vmem:[%s10581_s3 + $0x2a4] sm:$0xf0] }
 0x5dd   : > { %v2033_v28 = vpack.c.bf16 %v2024_v58, %v2022_v55  ;;  %v6315_v58 = vor.u32 %v7645_v17, %v6312_v54  ;;  %v9182_v62 = vpop.f32.mrf.mxu3  ;;  %v6320_v17 = vld [vmem:[%s10581_s3 + $0x218] sm:$0xf0]  ;;  %v6434_v54 = vld [vmem:[%s10581_s3 + $0x2a0] sm:$0xf] }
 0x5de   : > { %v6435_v0 = vor.u32 %v7668_v43, %v6434_v54 }
 0x5df   : > { %6183 = vmatmul.msk.bf16.gmra.mxu3 %vm1656_vm4, %v2033_v28 }
 0x5e0   : > { %v9177_v55 = vpop.f32.mrf.mxu2 }
 0x5e1   : > { %10653 = vst [vmem:[#allocation17_spill] sm:$0xff] %v9177_v55  ;;  %v7647_v55 = vld [vmem:[%s10581_s3 + $0x214] sm:$0xf] }
 0x5e2   : > { %v2311_v27 = vpop.f32.mrf.mxu1 }
 0x5e3   : > { %v2312_v37 = vadd.f32 %v2311_v27, %v8962_v52 }
 0x5e5   : > { %6372 = vmatmul.msk.bf16.vlgmr.msra.gmra.mxu1 %vm1282_vm3, %v6315_v58  ;;  %2916 = vmatmul.bf16.gmra.mxu2 %v6427_v7 }
 0x5e8   : > { %v9180_v51 = vpop.f32.mrf.mxu2 }
 0x5e9   : > { %10654 = vst [vmem:[#allocation18_spill] sm:$0xff] %v9180_v51 }
 0x5ea   : > { %v2313_v34 = vpop.f32.mrf.mxu1 }
 0x5eb   : > { %v2314_v42 = vadd.f32 %v2313_v34, %v8982_v15  ;;  %v6323_v15 = vor.u32 %v7647_v55, %v6320_v17  ;;  %v7649_v55 = vld [vmem:[%s10581_s3 + $0x224] sm:$0xf]  ;;  %v6328_v17 = vld [vmem:[%s10581_s3 + $0x228] sm:$0xf0] }
 0x5ed   : > { %v2351_v28 = vpack.c.bf16 %v2314_v42, %v2312_v37  ;;  %v1776_v42 = vadd.f32 %v8958_v46, %v8796_v20  ;;  %v1778_v37 = vadd.f32 %v8970_v29, %v8805_v31  ;;  %v6442_v31 = vld [vmem:[%s10581_s3 + $0x2b0] sm:$0xf]  ;;  %v7670_v29 = vld [vmem:[%s10581_s3 + $0x2b4] sm:$0xf0] }
 0x5ee   : > { %v6443_v54 = vor.u32 %v7670_v29, %v6442_v31 }
 0x5ef   : > { %6284 = vmatmul.msk.bf16.vlgmr.msrb.gmra.mxu3 %vm1656_vm4, %v2351_v28 }
 0x5f0   : > { %v9199_v52 = vpop.f32.mrf.mxu2 }
 0x5f1   : > { %10655 = vst [vmem:[#allocation13_spill] sm:$0xff] %v9199_v52 }
 0x5f2   : > { %v2084_v58 = vpop.f32.mrf.mxu3  ;;  %v2316_v7 = vpop.f32.mrf.mxu1 }
 0x5f3   : > { %v9203_v27 = vadd.f32 %v2084_v58, %v1776_v42  ;;  %v2317_v52 = vadd.f32 %v2316_v7, %v8988_v35 }
 0x5f5   : > { %6373 = vmatmul.msk.bf16.gmra.mxu1 %vm1282_vm3, %v6323_v15  ;;  %2921 = vmatmul.bf16.gmra.mxu2 %v6435_v0  ;;  %v1783_v0 = vadd.f32 %v9009_v13, %v8829_v30  ;;  %v6450_v30 = vld [vmem:[%s10581_s3 + $0x2c0] sm:$0xf]  ;;  %v7672_v13 = vld [vmem:[%s10581_s3 + $0x2c4] sm:$0xf0] }
 0x5f8   : > { %v9206_v34 = vpop.f32.mrf.mxu2 }
 0x5fa   : > { %v2086_v28 = vpop.f32.mrf.mxu3  ;;  %v2318_v51 = vpop.f32.mrf.mxu1 }
 0x5fb   : > { %v9211_v8 = vadd.f32 %v2086_v28, %v1778_v37  ;;  %v2319_v20 = vadd.f32 %v2318_v51, %v9007_v47  ;;  %v1781_v47 = vadd.f32 %v8986_v3, %v8824_v16  ;;  %v6331_v51 = vor.u32 %v7649_v55, %v6328_v17 }
 0x5fc   : > { %v6451_v17 = vor.u32 %v7672_v13, %v6450_v30 }
 0x5fd   : > { %v2352_v46 = vpack.c.bf16 %v2319_v20, %v2317_v52  ;;  %v7651_v20 = vld [vmem:[%s10581_s3 + $0x234] sm:$0xf] }
 0x5ff   : > { %6285 = vmatmul.msk.bf16.gmra.mxu3 %vm1656_vm4, %v2352_v46  ;;  %v6336_v46 = vld [vmem:[%s10581_s3 + $0x238] sm:$0xf0] }
 0x600   : > { %v9227_v35 = vpop.f32.mrf.mxu2  ;;  %v6339_v55 = vor.u32 %v7651_v20, %v6336_v46 }
 0x602   : > { %v2089_v43 = vpop.f32.mrf.mxu3  ;;  %v2321_v52 = vpop.f32.mrf.mxu1 }
 0x603   : > { %v9231_v42 = vadd.f32 %v2089_v43, %v1781_v47  ;;  %v2322_v37 = vadd.f32 %v2321_v52, %v9012_v21 }
 0x605   : > { %6374 = vmatmul.msk.bf16.gmra.mxu1 %vm1282_vm3, %v6331_v51  ;;  %2926 = vmatmul.bf16.gmra.mxu2 %v6443_v54  ;;  %v1788_v54 = vadd.f32 %v9034_v38, %v8850_v23  ;;  %v6458_v23 = vld [vmem:[%s10581_s3 + $0x2d0] sm:$0xf]  ;;  %v7674_v38 = vld [vmem:[%s10581_s3 + $0x2d4] sm:$0xf0] }
 0x608   : > { %v9234_v15 = vpop.f32.mrf.mxu2 }
 0x60a   : > { %v2091_v58 = vpop.f32.mrf.mxu3  ;;  %v2323_v7 = vpop.f32.mrf.mxu1 }
 0x60b   : > { %v9239_v28 = vadd.f32 %v2091_v58, %v1783_v0  ;;  %v2324_v16 = vadd.f32 %v2323_v7, %v9031_v1  ;;  %v1786_v1 = vadd.f32 %v9016_v41, %v8845_v4  ;;  %v7653_v7 = vld [vmem:[%s10581_s3 + $0x244] sm:$0xf] }
 0x60d   : > { %v2353_v3 = vpack.c.bf16 %v2324_v16, %v2322_v37  ;;  %v6344_v37 = vld [vmem:[%s10581_s3 + $0x248] sm:$0xf0] }
 0x60e   : > { %v6347_v16 = vor.u32 %v7653_v7, %v6344_v37 }
 0x60f   : > { %6286 = vmatmul.msk.bf16.gmra.mxu3 %vm1656_vm4, %v2353_v3  ;;  %v6459_v3 = vor.u32 %v7674_v38, %v6458_v23  ;;  %v1798_v23 = vadd.f32 %v9089_v36, %v8892_v61  ;;  %v6474_v61 = vld [vmem:[%s10581_s3 + $0x2f0] sm:$0xf]  ;;  %v7698_v36 = vld [vmem:[%s10582_s4 + $0x68] sm:$0xff] }
 0x610   : > { %v9255_v21 = vpop.f32.mrf.mxu2  ;;  %3381 = vmatpush.bf16.msra.mxu1 %v7698_v36 }
 0x612   : > { %v2094_v31 = vpop.f32.mrf.mxu3  ;;  %v2326_v29 = vpop.f32.mrf.mxu1 }
 0x613   : > { %v9259_v47 = vadd.f32 %v2094_v31, %v1786_v1  ;;  %v2327_v0 = vadd.f32 %v2326_v29, %v9036_v32  ;;  %v1793_v1 = vadd.f32 %v9060_v22, %v8871_v33  ;;  %v6466_v33 = vld [vmem:[%s10581_s3 + $0x2e0] sm:$0xf] }
 0x615   : > { %6375 = vmatmul.msk.bf16.gmra.mxu1 %vm1282_vm3, %v6339_v55  ;;  %2931 = vmatmul.bf16.gmra.mxu2 %v6451_v17 }
 0x618   : > { %v9262_v51 = vpop.f32.mrf.mxu2 }
 0x61a   : > { %v2096_v43 = vpop.f32.mrf.mxu3  ;;  %v2328_v52 = vpop.f32.mrf.mxu1 }
 0x61b   : > { %v9267_v58 = vadd.f32 %v2096_v43, %v1788_v54  ;;  %v2329_v4 = vadd.f32 %v2328_v52, %v9055_v63  ;;  %v1791_v63 = vadd.f32 %v9053_v49, %v8866_v57  ;;  %v7655_v54 = vld [vmem:[%s10581_s3 + $0x254] sm:$0xf]  ;;  %v6352_v43 = vld [vmem:[%s10581_s3 + $0x258] sm:$0xf0] }
 0x61c   : > { %v6355_v52 = vor.u32 %v7655_v54, %v6352_v43  ;;  %v7697_v54 = vld [vmem:[%s10582_s4 + $0x60] sm:$0xff]  ;;  %v7662_v43 = vld [vmem:[%s10582_s4 + $0x48] sm:$0xff] }
 0x61d   : > { %v2354_v41 = vpack.c.bf16 %v2329_v4, %v2327_v0  ;;  %3382 = vmatpush.bf16.msra.mxu1 %v7697_v54  ;;  %2731 = vmatpush.bf16.msra.mxu3 %v7662_v43  ;;  %v6534_v43 = vld [vmem:[%s10581_s3 + $0x310] sm:$0xf] }
 0x61f   : > { %6287 = vmatmul.msk.bf16.gmra.mxu3 %vm1656_vm4, %v2354_v41 }
 0x620   : > { %v9283_v32 = vpop.f32.mrf.mxu2 }
 0x622   : > { %v2099_v20 = vpop.f32.mrf.mxu3  ;;  %v2331_v46 = vpop.f32.mrf.mxu1 }
 0x623   : > { %v9287_v30 = vadd.f32 %v2099_v20, %v1791_v63  ;;  %v2332_v31 = vadd.f32 %v2331_v46, %v9058_v2  ;;  %v7676_v2 = vld [vmem:[%s10581_s3 + $0x2e4] sm:$0xf0]  ;;  %v7657_v20 = vld [vmem:[%s10581_s3 + $0x264] sm:$0xf]  ;;  %v6360_v46 = vld [vmem:[%s10581_s3 + $0x268] sm:$0xf0] }
 0x624   : > { %v6467_v0 = vor.u32 %v7676_v2, %v6466_v33  ;;  %v1803_v33 = vadd.f32 %v9125_v50, %v8913_v14  ;;  %v7680_v2 = vld [vmem:[%s10582_s4 + $0x58] sm:$0xff]  ;;  %v7682_v14 = vld [vmem:[%s10581_s3 + $0x304] sm:$0xf0] }
 0x625   : > { %6376 = vmatmul.msk.bf16.gmra.mxu1 %vm1282_vm3, %v6347_v16  ;;  %2936 = vmatmul.bf16.gmra.mxu2 %v6459_v3 }
 0x628   : > { %v9290_v13 = vpop.f32.mrf.mxu2 }
 0x62a   : > { %v2101_v55 = vpop.f32.mrf.mxu3  ;;  %v2333_v17 = vpop.f32.mrf.mxu1 }
 0x62b   : > { %v9295_v29 = vadd.f32 %v2101_v55, %v1793_v1  ;;  %v2334_v57 = vadd.f32 %v2333_v17, %v9077_v9  ;;  %v1796_v9 = vadd.f32 %v9079_v12, %v8887_v10  ;;  %v1801_v1 = vadd.f32 %v9104_v26, %v8908_v53  ;;  %v7661_v53 = vld [vmem:[%s10582_s4 + $0x40] sm:$0xff] }
 0x62c   : > { %v6363_v55 = vor.u32 %v7657_v20, %v6360_v46  ;;  %2732 = vmatpush.bf16.msra.mxu3 %v7661_v53  ;;  %v1806_v20 = vadd.f32 %v9138_v5, %v8929_v24  ;;  %v7684_v53 = vld [vmem:[%s10581_s3 + $0x314] sm:$0xf0] }
 0x62d   : > { %v2355_v49 = vpack.c.bf16 %v2334_v57, %v2332_v31 }
 0x62f   : > { %6288 = vmatmul.msk.bf16.gmra.mxu3 %vm1656_vm4, %v2355_v49 }
 0x630   : > { %v9311_v22 = vpop.f32.mrf.mxu2  ;;  %3056 = vmatpush.bf16.msrb.mxu3 %v7680_v2 }
 0x632   : > { %v2104_v4 = vpop.f32.mrf.mxu3  ;;  %v2336_v41 = vpop.f32.mrf.mxu1 }
 0x633   : > { %v9315_v7 = vadd.f32 %v2104_v4, %v1796_v9  ;;  %v2337_v16 = vadd.f32 %v2336_v41, %v9082_v59  ;;  %v7678_v59 = vld [vmem:[%s10581_s3 + $0x2f4] sm:$0xf0] }
 0x634   : > { %v6475_v17 = vor.u32 %v7678_v59, %v6474_v61 }
 0x635   : > { %6377 = vmatmul.msk.bf16.gmra.mxu1 %vm1282_vm3, %v6355_v52  ;;  %2941 = vmatmul.bf16.gmra.mxu2 %v6467_v0 }
 0x638   : > { %v9318_v37 = vpop.f32.mrf.mxu2 }
 0x63a   : > { %v2106_v38 = vpop.f32.mrf.mxu3  ;;  %v2338_v63 = vpop.f32.mrf.mxu1 }
 0x63b   : > { %v9323_v3 = vadd.f32 %v2106_v38, %v1798_v23  ;;  %v2339_v10 = vadd.f32 %v2338_v63, %v9101_v60  ;;  %v6526_v23 = vld [vmem:[%s10581_s3 + $0x300] sm:$0xf]  ;;  %v7659_v63 = vld [vmem:[%s10581_s3 + $0x274] sm:$0xf] }
 0x63c   : > { %v6527_v50 = vor.u32 %v7682_v14, %v6526_v23 }
 0x63d   : > { %v2356_v12 = vpack.c.bf16 %v2339_v10, %v2337_v16  ;;  %v7681_v16 = vld [vmem:[%s10581_s3 + $0x304] sm:$0xf]  ;;  %v6528_v10 = vld [vmem:[%s10581_s3 + $0x308] sm:$0xf0] }
 0x63e   : > { %3236 = vmatmul.bf16.vlgmr.msrb.gmra.mxu0 %v6527_v50  ;;  %v6531_v61 = vor.u32 %v7681_v16, %v6528_v10  ;;  %v10657_v10 = vld [vmem:[#allocation17_spill] sm:$0xff] }
 0x63f   : > { %6289 = vmatmul.msk.bf16.gmra.mxu3 %vm1656_vm4, %v2356_v12 }
 0x640   : > { %v9342_v60 = vpop.f32.mrf.mxu2 }
 0x642   : > { %v2109_v31 = vpop.f32.mrf.mxu3  ;;  %v2341_v57 = vpop.f32.mrf.mxu1 }
 0x643   : > { %v9346_v49 = vadd.f32 %v2109_v31, %v1801_v1  ;;  %v2342_v0 = vadd.f32 %v2341_v57, %v9106_v40  ;;  %v7679_v40 = vld [vmem:[%s10582_s4 + $0x50] sm:$0xff] }
 0x644   : > { %3057 = vmatpush.bf16.msrb.mxu3 %v7679_v40  ;;  %v10656_v40 = vld [vmem:[#allocation7_spill] sm:$0xff] }
 0x645   : > { %6378 = vmatmul.msk.bf16.gmra.mxu1 %vm1282_vm3, %v6363_v55  ;;  %2946 = vmatmul.bf16.gmra.mxu2 %v6475_v17  ;;  %v1808_v17 = vadd.f32 %v9156_v18, %v8937_v44  ;;  %v7663_v44 = vld [vmem:[%s10581_s3 + $0x284] sm:$0xf]  ;;  %v6536_v18 = vld [vmem:[%s10581_s3 + $0x318] sm:$0xf0] }
 0x648   : > { %v9358_v26 = vpop.f32.mrf.mxu2 }
 0x64a   : > { %v2111_v9 = vpop.f32.mrf.mxu3  ;;  %v2343_v52 = vpop.f32.mrf.mxu1 }
 0x64b   : > { %v9366_v4 = vadd.f32 %v2111_v9, %v1803_v33  ;;  %v2344_v41 = vadd.f32 %v2343_v52, %v9123_v19  ;;  %v6368_v19 = vld [vmem:[%s10581_s3 + $0x278] sm:$0xf0]  ;;  %v6535_v33 = vor.u32 %v7684_v53, %v6534_v43  ;;  %v1811_v52 = vadd.f32 %v9175_v56, %v8956_v11  ;;  %v10659_v53 = vld [vmem:[#allocation27_spill] sm:$0xff] }
 0x64c   : > { %v6371_v46 = vor.u32 %v7659_v63, %v6368_v19  ;;  %v1813_v63 = vadd.f32 %v9182_v62, %v8965_v39  ;;  %v7665_v62 = vld [vmem:[%s10581_s3 + $0x294] sm:$0xf] }
 0x64d   : > { %v2357_v38 = vpack.c.bf16 %v2344_v41, %v2342_v0 }
 0x64e   : > { %3241 = vmatmul.bf16.gmra.mxu0 %v6535_v33 }
 0x64f   : > { %6290 = vmatmul.msk.bf16.gmra.mxu3 %vm1656_vm4, %v2357_v38 }
 0x650   : > { %v9391_v12 = vpop.f32.mrf.mxu2 }
 0x652   : > { %v2114_v59 = vpop.f32.mrf.mxu3  ;;  %v2346_v36 = vpop.f32.mrf.mxu1 }
 0x653   : > { %v9395_v1 = vadd.f32 %v2114_v59, %v1806_v20  ;;  %v2347_v54 = vadd.f32 %v2346_v36, %v9131_v45  ;;  %v6420_v45 = vld [vmem:[%s10581_s3 + $0x288] sm:$0xf0]  ;;  %v10658_v36 = vld [vmem:[#allocation28_spill] sm:$0xff] }
 0x654   : > { %v6423_v0 = vor.u32 %v7663_v44, %v6420_v45  ;;  %v10660_v45 = vld [vmem:[#allocation26_spill] sm:$0xff] }
 0x655   : > { %6379 = vmatmul.msk.bf16.gmra.mxu1 %vm1282_vm3, %v6371_v46  ;;  %6588 = vmatmul.msk.bf16.vlgmr.msrb.gmra.mxu2 %vm1282_vm3, %v6531_v61  ;;  %v6542_v46 = vld [vmem:[%s10581_s3 + $0x320] sm:$0xf]  ;;  %v7686_v61 = vld [vmem:[%s10581_s3 + $0x324] sm:$0xf0] }
 0x656   : > { %v6543_v59 = vor.u32 %v7686_v61, %v6542_v46 }
 0x658   : > { %v9399_v55 = vpop.f32.mrf.mxu2 }
 0x65a   : > { %v2116_v31 = vpop.f32.mrf.mxu3  ;;  %v2348_v57 = vpop.f32.mrf.mxu1 }
 0x65b   : > { %v9404_v24 = vadd.f32 %v2116_v31, %v1808_v17  ;;  %v2349_v5 = vadd.f32 %v2348_v57, %v9153_v6  ;;  %v7683_v6 = vld [vmem:[%s10581_s3 + $0x314] sm:$0xf]  ;;  %v6428_v17 = vld [vmem:[%s10581_s3 + $0x298] sm:$0xf0]  ;;  %v7685_v31 = vld [vmem:[%s10581_s3 + $0x324] sm:$0xf] }
 0x65c   : > { %v6539_v41 = vor.u32 %v7683_v6, %v6536_v18  ;;  %v6544_v57 = vld [vmem:[%s10581_s3 + $0x328] sm:$0xf0]  ;;  %v10661_v6 = vld [vmem:[#allocation25_spill] sm:$0xff] }
 0x65d   : > { %v2358_v2 = vpack.c.bf16 %v2349_v5, %v2347_v54  ;;  %v6431_v5 = vor.u32 %v7665_v62, %v6428_v17  ;;  %v6547_v43 = vor.u32 %v7685_v31, %v6544_v57 }
 0x65e   : > { %3246 = vmatmul.bf16.gmra.mxu0 %v6543_v59 }
 0x65f   : > { %6291 = vmatmul.msk.bf16.gmra.mxu3 %vm1656_vm4, %v2358_v2 }
 0x660   : > { %v9426_v9 = vpop.f32.mrf.mxu2 }
 0x662   : > { %v2119_v23 = vpop.f32.mrf.mxu3  ;;  %v2636_v14 = vpop.f32.mrf.mxu1 }
 0x663   : > { %v9430_v50 = vadd.f32 %v2119_v23, %v1811_v52  ;;  %v2637_v19 = vadd.f32 %v2636_v14, %v10656_v40  ;;  %v6550_v14 = vld [vmem:[%s10581_s3 + $0x330] sm:$0xf]  ;;  %v7667_v40 = vld [vmem:[%s10581_s3 + $0x2a4] sm:$0xf] }
 0x665   : > { %6480 = vmatmul.msk.bf16.vlgmr.msrb.gmra.mxu1 %vm1282_vm3, %v6423_v0  ;;  %6589 = vmatmul.msk.bf16.gmra.mxu2 %vm1282_vm3, %v6539_v41  ;;  %v10662_v0 = vld [vmem:[#allocation18_spill] sm:$0xff] }
 0x666   : > { %3878 = vmatpush.bf16.msrb.mxu1 %v8393_v25 }
 0x668   : > { %v9435_v38 = vpop.f32.mrf.mxu2 }
 0x66a   : > { %3879 = vmatpush.bf16.msrb.mxu1 %v8383_v48  ;;  %v2121_v11 = vpop.f32.mrf.mxu3  ;;  %v2638_v56 = vpop.f32.mrf.mxu1 }
 0x66b   : > { %v9441_v16 = vadd.f32 %v2121_v11, %v1813_v63  ;;  %v2639_v20 = vadd.f32 %v2638_v56, %v10657_v10  ;;  %v7688_v63 = vld [vmem:[%s10581_s3 + $0x334] sm:$0xf0]  ;;  %v7687_v10 = vld [vmem:[%s10581_s3 + $0x334] sm:$0xf] }
 0x66c   : > { %v6551_v11 = vor.u32 %v7688_v63, %v6550_v14 }
 0x66d   : > { %v2676_v39 = vpack.c.bf16 %v2639_v20, %v2637_v19  ;;  %v6436_v19 = vld [vmem:[%s10581_s3 + $0x2a8] sm:$0xf0]  ;;  %v6552_v20 = vld [vmem:[%s10581_s3 + $0x338] sm:$0xf0] }
 0x66e   : > { %3880 = vmatpush.bf16.msrb.mxu1 %v10658_v36  ;;  %3251 = vmatmul.bf16.gmra.mxu0 %v6551_v11  ;;  %v6439_v61 = vor.u32 %v7667_v40, %v6436_v19  ;;  %v6555_v59 = vor.u32 %v7687_v10, %v6552_v20  ;;  %v7692_v10 = vld [vmem:[%s10581_s3 + $0x354] sm:$0xf0] }
 0x66f   : > { %6392 = vmatmul.msk.bf16.vlgmr.msra.gmra.mxu3 %vm1656_vm4, %v2676_v39  ;;  %v10665_v39 = vld [vmem:[#allocation23_spill] sm:$0xff] }
 0x670   : > { %3553 = vmatpush.bf16.msra.mxu3 %v8393_v25  ;;  %v9465_v54 = vpop.f32.mrf.mxu2 }
 0x672   : > { %3881 = vmatpush.bf16.msrb.mxu1 %v10659_v53  ;;  %v2409_v33 = vpop.f32.mrf.mxu3  ;;  %v2641_v2 = vpop.f32.mrf.mxu1 }
 0x673   : > { %v9469_v44 = vadd.f32 %v2409_v33, %v9203_v27  ;;  %v2642_v41 = vadd.f32 %v2641_v2, %v10662_v0  ;;  %v6558_v33 = vld [vmem:[%s10581_s3 + $0x340] sm:$0xf]  ;;  %v7690_v2 = vld [vmem:[%s10581_s3 + $0x344] sm:$0xf0] }
 0x674   : > { %3554 = vmatpush.bf16.msra.mxu3 %v8383_v48  ;;  %v10663_v48 = vld [vmem:[#allocation13_spill] sm:$0xff] }
 0x675   : > { %6481 = vmatmul.msk.bf16.gmra.mxu1 %vm1282_vm3, %v6431_v5  ;;  %6590 = vmatmul.msk.bf16.gmra.mxu2 %vm1282_vm3, %v6547_v43 }
 0x676   : > { %3882 = vmatpush.bf16.msrb.mxu1 %v10660_v45 }
 0x678   : > { %3555 = vmatpush.bf16.msra.mxu3 %v10658_v36  ;;  %v9476_v25 = vpop.f32.mrf.mxu2 }
 0x67a   : > { %3883 = vmatpush.bf16.msrb.mxu1 %v10661_v6  ;;  %v2411_v18 = vpop.f32.mrf.mxu3  ;;  %v2643_v52 = vpop.f32.mrf.mxu1 }
 0x67b   : > { %v9481_v27 = vadd.f32 %v2411_v18, %v9211_v8  ;;  %v2644_v23 = vadd.f32 %v2643_v52, %v10663_v48  ;;  %v10664_v8 = vld [vmem:[#allocation24_spill] sm:$0xff]  ;;  %v6560_v18 = vld [vmem:[%s10581_s3 + $0x348] sm:$0xf0] }
 0x67c   : > { %3556 = vmatpush.bf16.msra.mxu3 %v10659_v53 }
 0x67d   : > { %v2677_v56 = vpack.c.bf16 %v2644_v23, %v2642_v41 }
 0x67e   : > { %3884 = vmatpush.bf16.msrb.mxu1 %v10664_v8 }
 0x67f   : > { %6393 = vmatmul.msk.bf16.gmra.mxu3 %vm1656_vm4, %v2677_v56 }
 0x680   : > { %3557 = vmatpush.bf16.msra.mxu3 %v10660_v45  ;;  %v9506_v46 = vpop.f32.mrf.mxu2  ;;  %v6559_v45 = vor.u32 %v7690_v2, %v6558_v33 }
 0x682   : > { %3885 = vmatpush.bf16.msrb.mxu1 %v10665_v39  ;;  %v2414_v62 = vpop.f32.mrf.mxu3  ;;  %v2646_v36 = vpop.f32.mrf.mxu1  ;;  %3256 = vmatmul.bf16.gmra.mxu0 %v6559_v45 }
 0x683   : > { %v9510_v17 = vadd.f32 %v2414_v62, %v9231_v42  ;;  %v2647_v43 = vadd.f32 %v2646_v36, %v9206_v34  ;;  %v7669_v34 = vld [vmem:[%s10581_s3 + $0x2b4] sm:$0xf] }
 0x684   : > { %3558 = vmatpush.bf16.msra.mxu3 %v10661_v6 }
 0x685   : > { %6482 = vmatmul.msk.bf16.gmra.mxu1 %vm1282_vm3, %v6439_v61  ;;  %6591 = vmatmul.msk.bf16.gmra.mxu2 %vm1282_vm3, %v6555_v59  ;;  %v7671_v59 = vld [vmem:[%s10581_s3 + $0x2c4] sm:$0xf] }
 0x688   : > { %3559 = vmatpush.bf16.msra.mxu3 %v10664_v8  ;;  %v9516_v31 = vpop.f32.mrf.mxu2 }
 0x68a   : > { %v2416_v57 = vpop.f32.mrf.mxu3  ;;  %v2648_v5 = vpop.f32.mrf.mxu1 }
 0x68b   : > { %v9520_v53 = vadd.f32 %v2416_v57, %v9239_v28  ;;  %v2649_v42 = vadd.f32 %v2648_v5, %v9227_v35  ;;  %v6444_v35 = vld [vmem:[%s10581_s3 + $0x2b8] sm:$0xf0]  ;;  %v7689_v28 = vld [vmem:[%s10581_s3 + $0x344] sm:$0xf] }
 0x68c   : > { %3560 = vmatpush.bf16.msra.mxu3 %v10665_v39  ;;  %v6447_v0 = vor.u32 %v7669_v34, %v6444_v35  ;;  %v6563_v41 = vor.u32 %v7689_v28, %v6560_v18  ;;  %v7694_v35 = vld [vmem:[%s10581_s3 + $0x364] sm:$0xf0] }
 0x68d   : > { %v2678_v6 = vpack.c.bf16 %v2649_v42, %v2647_v43 }
 0x68f   : > { %6394 = vmatmul.msk.bf16.gmra.mxu3 %vm1656_vm4, %v2678_v6 }
 0x690   : > { %v9543_v52 = vpop.f32.mrf.mxu2 }
 0x692   : > { %v2419_v48 = vpop.f32.mrf.mxu3  ;;  %v2651_v23 = vpop.f32.mrf.mxu1 }
 0x693   : > { %v9546_v14 = vadd.f32 %v2419_v48, %v9259_v47  ;;  %v2652_v40 = vadd.f32 %v2651_v23, %v9234_v15  ;;  %v6566_v47 = vld [vmem:[%s10581_s3 + $0x350] sm:$0xf]  ;;  %v6452_v15 = vld [vmem:[%s10581_s3 + $0x2c8] sm:$0xf0] }
 0x694   : > { %v6567_v20 = vor.u32 %v7692_v10, %v6566_v47  ;;  %v6455_v62 = vor.u32 %v7671_v59, %v6452_v15  ;;  %v7696_v15 = vld [vmem:[%s10581_s3 + $0x374] sm:$0xf0] }
 0x695   : > { %6483 = vmatmul.msk.bf16.gmra.mxu1 %vm1282_vm3, %v6447_v0  ;;  %6592 = vmatmul.msk.bf16.gmra.mxu2 %vm1282_vm3, %v6563_v41  ;;  %v7673_v0 = vld [vmem:[%s10581_s3 + $0x2d4] sm:$0xf] }
 0x696   : > { %3261 = vmatmul.bf16.gmra.mxu0 %v6567_v20 }
 0x698   : > { %v9550_v63 = vpop.f32.mrf.mxu2 }
 0x69a   : > { %v2421_v11 = vpop.f32.mrf.mxu3  ;;  %v2653_v56 = vpop.f32.mrf.mxu1 }
 0x69b   : > { %v9554_v8 = vadd.f32 %v2421_v11, %v9267_v58  ;;  %v2654_v19 = vadd.f32 %v2653_v56, %v9255_v21  ;;  %v7691_v21 = vld [vmem:[%s10581_s3 + $0x354] sm:$0xf]  ;;  %v6568_v58 = vld [vmem:[%s10581_s3 + $0x358] sm:$0xf0] }
 0x69c   : > { %v6571_v36 = vor.u32 %v7691_v21, %v6568_v58 }
 0x69d   : > { %v2679_v61 = vpack.c.bf16 %v2654_v19, %v2652_v40 }
 0x69f   : > { %6395 = vmatmul.msk.bf16.gmra.mxu3 %vm1656_vm4, %v2679_v61 }
 0x6a0   : > { %v9576_v39 = vpop.f32.mrf.mxu2 }
 0x6a2   : > { %v2424_v57 = vpop.f32.mrf.mxu3  ;;  %v2656_v5 = vpop.f32.mrf.mxu1 }
 0x6a3   : > { %v9579_v43 = vadd.f32 %v2424_v57, %v9287_v30  ;;  %v2657_v45 = vadd.f32 %v2656_v5, %v9262_v51  ;;  %v6574_v30 = vld [vmem:[%s10581_s3 + $0x360] sm:$0xf]  ;;  %v6460_v51 = vld [vmem:[%s10581_s3 + $0x2d8] sm:$0xf0] }
 0x6a4   : > { %v6575_v28 = vor.u32 %v7694_v35, %v6574_v30  ;;  %v6463_v48 = vor.u32 %v7673_v0, %v6460_v51 }
 0x6a5   : > { %6484 = vmatmul.msk.bf16.gmra.mxu1 %vm1282_vm3, %v6455_v62  ;;  %6593 = vmatmul.msk.bf16.gmra.mxu2 %vm1282_vm3, %v6571_v36  ;;  %v7675_v62 = vld [vmem:[%s10581_s3 + $0x2e4] sm:$0xf] }
 0x6a6   : > { %3266 = vmatmul.bf16.gmra.mxu0 %v6575_v28 }
 0x6a8   : > { %v9583_v42 = vpop.f32.mrf.mxu2 }
 0x6aa   : > { %v2426_v33 = vpop.f32.mrf.mxu3  ;;  %v2658_v2 = vpop.f32.mrf.mxu1 }
 0x6ab   : > { %v9587_v6 = vadd.f32 %v2426_v33, %v9295_v29  ;;  %v2659_v34 = vadd.f32 %v2658_v2, %v9283_v32  ;;  %v7693_v32 = vld [vmem:[%s10581_s3 + $0x364] sm:$0xf]  ;;  %v6576_v29 = vld [vmem:[%s10581_s3 + $0x368] sm:$0xf0] }
 0x6ac   : > { %v6579_v23 = vor.u32 %v7693_v32, %v6576_v29  ;;  %v6476_v29 = vld [vmem:[%s10581_s3 + $0x2f8] sm:$0xf0] }
 0x6ad   : > { %v2680_v18 = vpack.c.bf16 %v2659_v34, %v2657_v45 }
 0x6af   : > { %6396 = vmatmul.msk.bf16.gmra.mxu3 %vm1656_vm4, %v2680_v18 }
 0x6b0   : > { %v9609_v41 = vpop.f32.mrf.mxu2 }
 0x6b2   : > { %v2429_v11 = vpop.f32.mrf.mxu3  ;;  %v2661_v56 = vpop.f32.mrf.mxu1 }
 0x6b3   : > { %v9612_v40 = vadd.f32 %v2429_v11, %v9315_v7  ;;  %v2662_v20 = vadd.f32 %v2661_v56, %v9290_v13  ;;  %v6582_v7 = vld [vmem:[%s10581_s3 + $0x370] sm:$0xf]  ;;  %v6468_v13 = vld [vmem:[%s10581_s3 + $0x2e8] sm:$0xf0] }
 0x6b4   : > { %v6583_v21 = vor.u32 %v7696_v15, %v6582_v7  ;;  %v6471_v57 = vor.u32 %v7675_v62, %v6468_v13 }
 0x6b5   : > { %6485 = vmatmul.msk.bf16.gmra.mxu1 %vm1282_vm3, %v6463_v48  ;;  %6594 = vmatmul.msk.bf16.gmra.mxu2 %vm1282_vm3, %v6579_v23 }
 0x6b6   : > { %3271 = vmatmul.bf16.gmra.mxu0 %v6583_v21 }
 0x6b8   : > { %v9616_v19 = vpop.f32.mrf.mxu2 }
 0x6ba   : > { %v2431_v47 = vpop.f32.mrf.mxu3  ;;  %v2663_v10 = vpop.f32.mrf.mxu1 }
 0x6bb   : > { %v9620_v61 = vadd.f32 %v2431_v47, %v9323_v3  ;;  %v2664_v59 = vadd.f32 %v2663_v10, %v9311_v22  ;;  %v7695_v22 = vld [vmem:[%s10581_s3 + $0x374] sm:$0xf]  ;;  %v6584_v3 = vld [vmem:[%s10581_s3 + $0x378] sm:$0xf0]  ;;  %v3237_v51 = vpop.f32.mrf.mxu0 }
 0x6bc   : > { %v6587_v5 = vor.u32 %v7695_v22, %v6584_v3 }
 0x6bd   : > { %v2681_v58 = vpack.c.bf16 %v2664_v59, %v2662_v20 }
 0x6bf   : > { %6397 = vmatmul.msk.bf16.gmra.mxu3 %vm1656_vm4, %v2681_v58 }
 0x6c0   : > { %v9642_v36 = vpop.f32.mrf.mxu2 }
 0x6c2   : > { %v2434_v33 = vpop.f32.mrf.mxu3  ;;  %v2666_v2 = vpop.f32.mrf.mxu1 }
 0x6c3   : > { %v9645_v45 = vadd.f32 %v2434_v33, %v9346_v49  ;;  %v2667_v28 = vadd.f32 %v2666_v2, %v9318_v37  ;;  %v7677_v49 = vld [vmem:[%s10581_s3 + $0x2f4] sm:$0xf] }
 0x6c4   : > { %v6479_v37 = vor.u32 %v7677_v49, %v6476_v29 }
 0x6c5   : > { %6486 = vmatmul.msk.bf16.gmra.mxu1 %vm1282_vm3, %v6471_v57  ;;  %6595 = vmatmul.msk.bf16.gmra.mxu2 %vm1282_vm3, %v6587_v5 }
 0x6c8   : > { %v9649_v34 = vpop.f32.mrf.mxu2 }
 0x6ca   : > { %v2436_v30 = vpop.f32.mrf.mxu3  ;;  %v2668_v35 = vpop.f32.mrf.mxu1 }
 0x6cb   : > { %v9653_v18 = vadd.f32 %v2436_v30, %v9366_v4  ;;  %v2669_v0 = vadd.f32 %v2668_v35, %v9342_v60  ;;  %v3239_v60 = vpop.f32.mrf.mxu0 }
 0x6cd   : > { %v2682_v32 = vpack.c.bf16 %v2669_v0, %v2667_v28  ;;  %v10666_v0 = vld [vmem:[#allocation22_spill] sm:$0xff] }
 0x6cf   : > { %6398 = vmatmul.msk.bf16.gmra.mxu3 %vm1656_vm4, %v2682_v32 }
 0x6d0   : > { %v9663_v48 = vpop.f32.mrf.mxu2 }
 0x6d2   : > { %v2439_v23 = vpop.f32.mrf.mxu3  ;;  %v2671_v4 = vpop.f32.mrf.mxu1 }
 0x6d3   : > { %v9666_v11 = vadd.f32 %v2439_v23, %v9395_v1  ;;  %v2672_v20 = vadd.f32 %v2671_v4, %v9358_v26  ;;  %v3242_v15 = vpop.f32.mrf.mxu0 }
 0x6d5   : > { %6487 = vmatmul.msk.bf16.gmra.mxu1 %vm1282_vm3, %v6479_v37 }
 0x6d8   : > { %v3286_v56 = vpop.f32.mrf.mxu2 }
 0x6d9   : > { %v3287_v58 = vadd.f32 %v3286_v56, %v3237_v51 }
 0x6da   : > { %v2441_v47 = vpop.f32.mrf.mxu3  ;;  %v2673_v10 = vpop.f32.mrf.mxu1 }
 0x6db   : > { %v9671_v59 = vadd.f32 %v2441_v47, %v9404_v24  ;;  %v2674_v7 = vadd.f32 %v2673_v10, %v9391_v12  ;;  %v3244_v5 = vpop.f32.mrf.mxu0 }
 0x6dd   : > { %v2683_v21 = vpack.c.bf16 %v2674_v7, %v2672_v20 }
 0x6df   : > { %6399 = vmatmul.msk.bf16.gmra.mxu3 %vm1656_vm4, %v2683_v21 }
 0x6e0   : > { %v3288_v1 = vpop.f32.mrf.mxu2 }
 0x6e1   : > { %v3289_v62 = vadd.f32 %v3288_v1, %v3239_v60 }
 0x6e2   : > { %v2444_v13 = vpop.f32.mrf.mxu3  ;;  %v2961_v22 = vpop.f32.mrf.mxu1 }
 0x6e3   : > { %v9676_v3 = vadd.f32 %v2444_v13, %v9430_v50  ;;  %v3326_v57 = vpack.c.bf16 %v3289_v62, %v3287_v58  ;;  %v2962_v12 = vadd.f32 %v2961_v22, %v9399_v55  ;;  %v3247_v35 = vpop.f32.mrf.mxu0 }
 0x6e5   : > { %6608 = vmatmul.msk.bf16.vlgmr.msra.gmra.mxu1 %vm1656_vm4, %v3326_v57 }
 0x6e8   : > { %v3291_v26 = vpop.f32.mrf.mxu2 }
 0x6e9   : > { %v3292_v50 = vadd.f32 %v3291_v26, %v3242_v15 }
 0x6ea   : > { %v2446_v24 = vpop.f32.mrf.mxu3  ;;  %v2963_v33 = vpop.f32.mrf.mxu1 }
 0x6eb   : > { %v9681_v2 = vadd.f32 %v2446_v24, %v9441_v16  ;;  %v2964_v30 = vadd.f32 %v2963_v33, %v9426_v9  ;;  %v3249_v23 = vpop.f32.mrf.mxu0  ;;  %v10667_v16 = vld [vmem:[#allocation12_spill] sm:$0xff]  ;;  %v10668_v9 = vld [vmem:[#allocation6_spill] sm:$0xff] }
 0x6ed   : > { %v3001_v28 = vpack.c.bf16 %v2964_v30, %v2962_v12 }
 0x6ef   : > { %6500 = vmatmul.msk.bf16.vlgmr.msrb.gmra.mxu3 %vm1656_vm4, %v3001_v28 }
 0x6f0   : > { %3932 = vmatpush.bf16.msrb.mxu3 %v10666_v0  ;;  %v3293_v51 = vpop.f32.mrf.mxu2 }
 0x6f1   : > { %v3294_v32 = vadd.f32 %v3293_v51, %v3244_v5 }
 0x6f2   : > { %v2734_v49 = vpop.f32.mrf.mxu3  ;;  %v2966_v29 = vpop.f32.mrf.mxu1 }
 0x6f3   : > { %v9687_v37 = vadd.f32 %v2734_v49, %v9469_v44  ;;  %v3327_v55 = vpack.c.bf16 %v3294_v32, %v3292_v50  ;;  %v2967_v47 = vadd.f32 %v2966_v29, %v9435_v38  ;;  %v3252_v44 = vpop.f32.mrf.mxu0 }
 0x6f4   : > { %3933 = vmatpush.bf16.msrb.mxu3 %v10667_v16 }
 0x6f5   : > { %6609 = vmatmul.msk.bf16.gmra.mxu1 %vm1656_vm4, %v3327_v55 }
 0x6f8   : > { %3934 = vmatpush.bf16.msrb.mxu3 %v10668_v9  ;;  %v3296_v4 = vpop.f32.mrf.mxu2 }
 0x6f9   : > { %v3297_v15 = vadd.f32 %v3296_v4, %v3247_v35 }
 0x6fa   : > { %v2736_v60 = vpop.f32.mrf.mxu3  ;;  %v2968_v56 = vpop.f32.mrf.mxu1 }
 0x6fb   : > { %v9694_v10 = vadd.f32 %v2736_v60, %v9481_v27  ;;  %v2969_v20 = vadd.f32 %v2968_v56, %v9465_v54  ;;  %v3254_v57 = vpop.f32.mrf.mxu0 }
 0x6fd   : > { %v3002_v7 = vpack.c.bf16 %v2969_v20, %v2967_v47 }
 0x6ff   : > { %6501 = vmatmul.msk.bf16.gmra.mxu3 %vm1656_vm4, %v3002_v7 }
 0x700   : > { %v3298_v21 = vpop.f32.mrf.mxu2 }
 0x701   : > { %v3299_v58 = vadd.f32 %v3298_v21, %v3249_v23 }
 0x702   : > { %v2739_v1 = vpop.f32.mrf.mxu3  ;;  %v2971_v62 = vpop.f32.mrf.mxu1 }
 0x703   : > { %v9699_v13 = vadd.f32 %v2739_v1, %v9510_v17  ;;  %v3328_v22 = vpack.c.bf16 %v3299_v58, %v3297_v15  ;;  %v2972_v54 = vadd.f32 %v2971_v62, %v9476_v25  ;;  %v3257_v33 = vpop.f32.mrf.mxu0 }
 0x705   : > { %6610 = vmatmul.msk.bf16.gmra.mxu1 %vm1656_vm4, %v3328_v22 }
 0x708   : > { %v3301_v38 = vpop.f32.mrf.mxu2 }
 0x709   : > { %v3302_v17 = vadd.f32 %v3301_v38, %v3252_v44 }
 0x70a   : > { %v2741_v27 = vpop.f32.mrf.mxu3  ;;  %v2973_v5 = vpop.f32.mrf.mxu1 }
 0x70b   : > { %v9704_v26 = vadd.f32 %v2741_v27, %v9520_v53  ;;  %v2974_v24 = vadd.f32 %v2973_v5, %v9506_v46  ;;  %v3259_v32 = vpop.f32.mrf.mxu0 }
 0x70d   : > { %v3003_v12 = vpack.c.bf16 %v2974_v24, %v2972_v54 }
 0x70f   : > { %6502 = vmatmul.msk.bf16.gmra.mxu3 %vm1656_vm4, %v3003_v12 }
 0x710   : > { %v3303_v30 = vpop.f32.mrf.mxu2 }
 0x711   : > { %v3304_v35 = vadd.f32 %v3303_v30, %v3254_v57 }
 0x712   : > { %v2744_v28 = vpop.f32.mrf.mxu3  ;;  %v2976_v50 = vpop.f32.mrf.mxu1 }
 0x713   : > { %v9709_v0 = vadd.f32 %v2744_v28, %v9546_v14  ;;  %v3329_v51 = vpack.c.bf16 %v3304_v35, %v3302_v17  ;;  %v2977_v46 = vadd.f32 %v2976_v50, %v9516_v31  ;;  %v3262_v23 = vpop.f32.mrf.mxu0 }
 0x715   : > { %6611 = vmatmul.msk.bf16.gmra.mxu1 %vm1656_vm4, %v3329_v51 }
 0x718   : > { %v3306_v25 = vpop.f32.mrf.mxu2 }
 0x719   : > { %v3307_v14 = vadd.f32 %v3306_v25, %v3257_v33 }
 0x71a   : > { %v2746_v53 = vpop.f32.mrf.mxu3  ;;  %v2978_v49 = vpop.f32.mrf.mxu1 }
 0x71b   : > { %v9714_v29 = vadd.f32 %v2746_v53, %v9554_v8  ;;  %v2979_v55 = vadd.f32 %v2978_v49, %v9543_v52  ;;  %v3264_v31 = vpop.f32.mrf.mxu0 }
 0x71d   : > { %v3004_v16 = vpack.c.bf16 %v2979_v55, %v2977_v46 }
 0x71f   : > { %6503 = vmatmul.msk.bf16.gmra.mxu3 %vm1656_vm4, %v3004_v16 }
 0x720   : > { %v3308_v9 = vpop.f32.mrf.mxu2 }
 0x721   : > { %v3309_v4 = vadd.f32 %v3308_v9, %v3259_v32 }
 0x722   : > { %v2749_v60 = vpop.f32.mrf.mxu3  ;;  %v2981_v56 = vpop.f32.mrf.mxu1 }
 0x723   : > { %v9719_v47 = vadd.f32 %v2749_v60, %v9579_v43  ;;  %v3330_v20 = vpack.c.bf16 %v3309_v4, %v3307_v14  ;;  %v2982_v52 = vadd.f32 %v2981_v56, %v9550_v63  ;;  %v3267_v43 = vpop.f32.mrf.mxu0 }
 0x725   : > { %6612 = vmatmul.msk.bf16.gmra.mxu1 %vm1656_vm4, %v3330_v20 }
 0x728   : > { %v3311_v8 = vpop.f32.mrf.mxu2 }
 0x729   : > { %v3312_v1 = vadd.f32 %v3311_v8, %v3262_v23 }
 0x72a   : > { %v2751_v44 = vpop.f32.mrf.mxu3  ;;  %v2983_v7 = vpop.f32.mrf.mxu1 }
 0x72b   : > { %v9724_v15 = vadd.f32 %v2751_v44, %v9587_v6  ;;  %v2984_v21 = vadd.f32 %v2983_v7, %v9576_v39  ;;  %v3269_v6 = vpop.f32.mrf.mxu0 }
 0x72d   : > { %v3005_v58 = vpack.c.bf16 %v2984_v21, %v2982_v52 }
 0x72f   : > { %6504 = vmatmul.msk.bf16.gmra.mxu3 %vm1656_vm4, %v3005_v58 }
 0x730   : > { %v3313_v62 = vpop.f32.mrf.mxu2 }
 0x731   : > { %v3314_v22 = vadd.f32 %v3313_v62, %v3264_v31 }
 0x732   : > { %v2754_v57 = vpop.f32.mrf.mxu3  ;;  %v2986_v38 = vpop.f32.mrf.mxu1 }
 0x733   : > { %v9729_v27 = vadd.f32 %v2754_v57, %v9612_v40  ;;  %v3331_v5 = vpack.c.bf16 %v3314_v22, %v3312_v1  ;;  %v2987_v39 = vadd.f32 %v2986_v38, %v9583_v42  ;;  %v3272_v25 = vpop.f32.mrf.mxu0  ;;  %v7701_v1 = vld [vmem:[%s10581_s3 + $0x394] sm:$0xf] }
 0x735   : > { %6613 = vmatmul.msk.bf16.gmra.mxu1 %vm1656_vm4, %v3331_v5 }
 0x738   : > { %v3316_v63 = vpop.f32.mrf.mxu2 }
 0x739   : > { %v3317_v30 = vadd.f32 %v3316_v63, %v3267_v43 }
 0x73a   : > { %v2756_v54 = vpop.f32.mrf.mxu3  ;;  %v2988_v24 = vpop.f32.mrf.mxu1 }
 0x73b   : > { %v9734_v33 = vadd.f32 %v2756_v54, %v9620_v61  ;;  %v2989_v12 = vadd.f32 %v2988_v24, %v9609_v41  ;;  %v3274_v23 = vpop.f32.mrf.mxu0  ;;  %v6652_v54 = vld [vmem:[%s10581_s3 + $0x3a8] sm:$0xf0] }
 0x73d   : > { %v3006_v17 = vpack.c.bf16 %v2989_v12, %v2987_v39 }
 0x73f   : > { %6505 = vmatmul.msk.bf16.gmra.mxu3 %vm1656_vm4, %v3006_v17 }
 0x740   : > { %v3318_v40 = vpop.f32.mrf.mxu2 }
 0x741   : > { %v3319_v35 = vadd.f32 %v3318_v40, %v3269_v6  ;;  %v7703_v6 = vld [vmem:[%s10581_s3 + $0x3a4] sm:$0xf] }
 0x742   : > { %v2759_v28 = vpop.f32.mrf.mxu3  ;;  %v2991_v50 = vpop.f32.mrf.mxu1  ;;  %v6655_v24 = vor.u32 %v7703_v6, %v6652_v54 }
 0x743   : > { %v9739_v51 = vadd.f32 %v2759_v28, %v9645_v45  ;;  %v3332_v32 = vpack.c.bf16 %v3319_v35, %v3317_v30  ;;  %v2992_v41 = vadd.f32 %v2991_v50, %v9616_v19  ;;  %v7699_v19 = vld [vmem:[%s10581_s3 + $0x384] sm:$0xf] }
 0x745   : > { %6614 = vmatmul.msk.bf16.gmra.mxu1 %vm1656_vm4, %v3332_v32  ;;  %v7705_v32 = vld [vmem:[%s10581_s3 + $0x3b4] sm:$0xf] }
 0x748   : > { %v3321_v42 = vpop.f32.mrf.mxu2 }
 0x749   : > { %v3322_v45 = vadd.f32 %v3321_v42, %v3272_v25  ;;  %v6660_v25 = vld [vmem:[%s10581_s3 + $0x3b8] sm:$0xf0] }
 0x74a   : > { %v2761_v61 = vpop.f32.mrf.mxu3  ;;  %v2993_v53 = vpop.f32.mrf.mxu1  ;;  %v6663_v42 = vor.u32 %v7705_v32, %v6660_v25 }
 0x74b   : > { %v9744_v49 = vadd.f32 %v2761_v61, %v9653_v18  ;;  %v2994_v46 = vadd.f32 %v2993_v53, %v9642_v36  ;;  %v6636_v36 = vld [vmem:[%s10581_s3 + $0x388] sm:$0xf0] }
 0x74c   : > { %v6639_v18 = vor.u32 %v7699_v19, %v6636_v36 }
 0x74d   : > { %v3007_v55 = vpack.c.bf16 %v2994_v46, %v2992_v41 }
 0x74e   : > { %6696 = vmatmul.msk.bf16.vlgmr.msra.gmra.mxu0 %vm1282_vm3, %v6639_v18 }
 0x74f   : > { %6506 = vmatmul.msk.bf16.gmra.mxu3 %vm1656_vm4, %v3007_v55 }
 0x750   : > { %v3323_v16 = vpop.f32.mrf.mxu2 }
 0x751   : > { %v3324_v14 = vadd.f32 %v3323_v16, %v3274_v23 }
 0x752   : > { %v2764_v9 = vpop.f32.mrf.mxu3  ;;  %v2996_v4 = vpop.f32.mrf.mxu1 }
 0x753   : > { %v9749_v60 = vadd.f32 %v2764_v9, %v9666_v11  ;;  %v3333_v56 = vpack.c.bf16 %v3324_v14, %v3322_v45  ;;  %v2997_v8 = vadd.f32 %v2996_v4, %v9649_v34  ;;  %v6644_v34 = vld [vmem:[%s10581_s3 + $0x398] sm:$0xf0]  ;;  %v7707_v14 = vld [vmem:[%s10581_s3 + $0x3c4] sm:$0xf]  ;;  %v6668_v9 = vld [vmem:[%s10581_s3 + $0x3c8] sm:$0xf0] }
 0x754   : > { %v6671_v4 = vor.u32 %v7707_v14, %v6668_v9 }
 0x755   : > { %6615 = vmatmul.msk.bf16.gmra.mxu1 %vm1656_vm4, %v3333_v56 }
 0x75a   : > { %v2766_v20 = vpop.f32.mrf.mxu3  ;;  %v2998_v31 = vpop.f32.mrf.mxu1 }
 0x75b   : > { %v9761_v11 = vadd.f32 %v2766_v20, %v9671_v59  ;;  %v2999_v44 = vadd.f32 %v2998_v31, %v9663_v48  ;;  %v6647_v59 = vor.u32 %v7701_v1, %v6644_v34  ;;  %v6634_v48 = vld [vmem:[%s10581_s3 + $0x380] sm:$0xf] }
 0x75c   : > { %v6666_v1 = vld [vmem:[%s10581_s3 + $0x3c0] sm:$0xf] }
 0x75d   : > { %v3008_v7 = vpack.c.bf16 %v2999_v44, %v2997_v8  ;;  %v7709_v44 = vld [vmem:[%s10581_s3 + $0x3d4] sm:$0xf] }
 0x75e   : > { %6697 = vmatmul.msk.bf16.gmra.mxu0 %vm1282_vm3, %v6647_v59 }
 0x75f   : > { %6507 = vmatmul.msk.bf16.gmra.mxu3 %vm1656_vm4, %v3008_v7  ;;  %v6676_v7 = vld [vmem:[%s10581_s3 + $0x3d8] sm:$0xf0] }
 0x762   : > { %v2769_v52 = vpop.f32.mrf.mxu3  ;;  %v3384_v21 = vpop.f32.mrf.mxu1 }
 0x763   : > { %v9766_v58 = vadd.f32 %v2769_v52, %v9676_v3  ;;  %v7700_v3 = vld [vmem:[%s10581_s3 + $0x384] sm:$0xf0]  ;;  %v6679_v52 = vor.u32 %v7709_v44, %v6676_v7  ;;  %v6750_v44 = vld [vmem:[%s10581_s3 + $0x410] sm:$0xf]  ;;  %v7720_v7 = vld [vmem:[%s10581_s3 + $0x414] sm:$0xf0] }
 0x764   : > { %v6635_v57 = vor.u32 %v7700_v3, %v6634_v48 }
 0x76a   : > { %v2771_v43 = vpop.f32.mrf.mxu3  ;;  %v9781_v62 = vpop.f32.mrf.mxu1 }
 0x76b   : > { %v9784_v22 = vadd.f32 %v2771_v43, %v9681_v2  ;;  %v6642_v2 = vld [vmem:[%s10581_s3 + $0x390] sm:$0xf] }
 0x76e   : > { %6698 = vmatmul.msk.bf16.gmra.mxu0 %vm1282_vm3, %v6655_v24 }
 0x76f   : > { %3561 = vmatmul.bf16.vlgmr.msra.gmra.mxu3 %v6635_v57 }
 0x772   : > { %v3059_v38 = vpop.f32.mrf.mxu3  ;;  %v3389_v5 = vpop.f32.mrf.mxu1 }
 0x773   : > { %v3099_v63 = vadd.f32 %v3059_v38, %v9687_v37  ;;  %v7702_v37 = vld [vmem:[%s10581_s3 + $0x394] sm:$0xf0]  ;;  %v7711_v38 = vld [vmem:[%s10581_s3 + $0x3e4] sm:$0xf] }
 0x774   : > { %v6643_v40 = vor.u32 %v7702_v37, %v6642_v2 }
 0x775   : > { %v9793_v39 = vadd.f32 %v3384_v21, %v3099_v63 }
 0x77a   : > { %v3061_v12 = vpop.f32.mrf.mxu3  ;;  %v9802_v17 = vpop.f32.mrf.mxu1 }
 0x77b   : > { %v9805_v30 = vadd.f32 %v3061_v12, %v9694_v10  ;;  %v6650_v10 = vld [vmem:[%s10581_s3 + $0x3a0] sm:$0xf] }
 0x77e   : > { %6699 = vmatmul.msk.bf16.gmra.mxu0 %vm1282_vm3, %v6663_v42 }
 0x77f   : > { %3566 = vmatmul.bf16.gmra.mxu3 %v6643_v40 }
 0x782   : > { %v3064_v35 = vpop.f32.mrf.mxu3  ;;  %v3394_v28 = vpop.f32.mrf.mxu1 }
 0x783   : > { %v3101_v50 = vadd.f32 %v3064_v35, %v9699_v13  ;;  %v7704_v13 = vld [vmem:[%s10581_s3 + $0x3a4] sm:$0xf0]  ;;  %v7713_v35 = vld [vmem:[%s10581_s3 + $0x3f4] sm:$0xf] }
 0x784   : > { %v6651_v55 = vor.u32 %v7704_v13, %v6650_v10 }
 0x785   : > { %v9814_v61 = vadd.f32 %v3389_v5, %v3101_v50  ;;  %v6684_v5 = vld [vmem:[%s10581_s3 + $0x3e8] sm:$0xf0] }
 0x786   : > { %v6687_v63 = vor.u32 %v7711_v38, %v6684_v5 }
 0x78a   : > { %v3066_v53 = vpop.f32.mrf.mxu3  ;;  %v9823_v41 = vpop.f32.mrf.mxu1 }
 0x78b   : > { %v9826_v46 = vadd.f32 %v3066_v53, %v9704_v26  ;;  %v6658_v26 = vld [vmem:[%s10581_s3 + $0x3b0] sm:$0xf]  ;;  %v6742_v53 = vld [vmem:[%s10581_s3 + $0x400] sm:$0xf] }
 0x78e   : > { %6700 = vmatmul.msk.bf16.gmra.mxu0 %vm1282_vm3, %v6671_v4 }
 0x78f   : > { %3571 = vmatmul.bf16.gmra.mxu3 %v6651_v55  ;;  %v7718_v55 = vld [vmem:[%s10581_s3 + $0x404] sm:$0xf0] }
 0x792   : > { %v3069_v23 = vpop.f32.mrf.mxu3  ;;  %v3399_v45 = vpop.f32.mrf.mxu1 }
 0x793   : > { %v3103_v16 = vadd.f32 %v3069_v23, %v9709_v0  ;;  %v7706_v0 = vld [vmem:[%s10581_s3 + $0x3b4] sm:$0xf0]  ;;  %v6743_v23 = vor.u32 %v7718_v55, %v6742_v53 }
 0x794   : > { %v6659_v18 = vor.u32 %v7706_v0, %v6658_v26  ;;  %v6690_v0 = vld [vmem:[%s10581_s3 + $0x3f0] sm:$0xf] }
 0x795   : > { %v9835_v56 = vadd.f32 %v3394_v28, %v3103_v16  ;;  %v6692_v28 = vld [vmem:[%s10581_s3 + $0x3f8] sm:$0xf0]  ;;  %3886 = vmatmul.bf16.vlgmr.msrb.gmra.mxu1 %v6743_v23  ;;  %v7721_v23 = vld [vmem:[%s10581_s3 + $0x424] sm:$0xf] }
 0x796   : > { %v6695_v32 = vor.u32 %v7713_v35, %v6692_v28 }
 0x79a   : > { %v3071_v19 = vpop.f32.mrf.mxu3  ;;  %v9847_v20 = vpop.f32.mrf.mxu1 }
 0x79b   : > { %v9845_v36 = vadd.f32 %v3071_v19, %v9714_v29  ;;  %v7714_v19 = vld [vmem:[%s10581_s3 + $0x3f4] sm:$0xf0] }
 0x79e   : > { %6701 = vmatmul.msk.bf16.gmra.mxu0 %vm1282_vm3, %v6679_v52 }
 0x79f   : > { %3576 = vmatmul.bf16.gmra.mxu3 %v6659_v18 }
 0x7a2   : > { %v3074_v31 = vpop.f32.mrf.mxu3  ;;  %v3404_v29 = vpop.f32.mrf.mxu1 }
 0x7a3   : > { %v3105_v8 = vadd.f32 %v3074_v31, %v9719_v47  ;;  %v7708_v47 = vld [vmem:[%s10581_s3 + $0x3c4] sm:$0xf0]  ;;  %v6691_v31 = vor.u32 %v7714_v19, %v6690_v0  ;;  %v6774_v0 = vld [vmem:[%s10581_s3 + $0x440] sm:$0xf] }
 0x7a4   : > { %v6667_v48 = vor.u32 %v7708_v47, %v6666_v1  ;;  %v7726_v19 = vld [vmem:[%s10581_s3 + $0x444] sm:$0xf0] }
 0x7a5   : > { %v9856_v21 = vadd.f32 %v3399_v45, %v3105_v8  ;;  %v7715_v8 = vld [vmem:[%s10582_s4 + $0x70] sm:$0xff] }
 0x7aa   : > { %v3076_v34 = vpop.f32.mrf.mxu3  ;;  %v9868_v3 = vpop.f32.mrf.mxu1 }
 0x7ab   : > { %v9866_v59 = vadd.f32 %v3076_v34, %v9724_v15  ;;  %v6674_v15 = vld [vmem:[%s10581_s3 + $0x3d0] sm:$0xf] }
 0x7ae   : > { %6702 = vmatmul.msk.bf16.gmra.mxu0 %vm1282_vm3, %v6687_v63 }
 0x7af   : > { %3581 = vmatmul.bf16.gmra.mxu3 %v6667_v48 }
 0x7b2   : > { %v3079_v43 = vpop.f32.mrf.mxu3  ;;  %v3409_v24 = vpop.f32.mrf.mxu1 }
 0x7b3   : > { %v3107_v57 = vadd.f32 %v3079_v43, %v9729_v27  ;;  %v7710_v27 = vld [vmem:[%s10581_s3 + $0x3d4] sm:$0xf0]  ;;  %v7717_v43 = vld [vmem:[%s10581_s3 + $0x404] sm:$0xf] }
 0x7b4   : > { %v6675_v37 = vor.u32 %v7710_v27, %v6674_v15  ;;  %v7722_v15 = vld [vmem:[%s10581_s3 + $0x424] sm:$0xf0] }
 0x7b5   : > { %v9877_v6 = vadd.f32 %v3404_v29, %v3107_v57  ;;  %v6751_v29 = vor.u32 %v7720_v7, %v6750_v44  ;;  %v6744_v57 = vld [vmem:[%s10581_s3 + $0x408] sm:$0xf0]  ;;  %v7723_v7 = vld [vmem:[%s10581_s3 + $0x434] sm:$0xf] }
 0x7b6   : > { %v6747_v63 = vor.u32 %v7717_v43, %v6744_v57  ;;  %v6782_v43 = vld [vmem:[%s10581_s3 + $0x450] sm:$0xf]  ;;  %v7728_v57 = vld [vmem:[%s10581_s3 + $0x454] sm:$0xf0] }
 0x7b7   : > { %3891 = vmatmul.bf16.gmra.mxu1 %v6751_v29 }
 0x7ba   : > { %v3081_v54 = vpop.f32.mrf.mxu3  ;;  %v9896_v50 = vpop.f32.mrf.mxu1 }
 0x7bb   : > { %v9887_v2 = vadd.f32 %v3081_v54, %v9734_v33  ;;  %v6682_v33 = vld [vmem:[%s10581_s3 + $0x3e0] sm:$0xf] }
 0x7be   : > { %6703 = vmatmul.msk.bf16.gmra.mxu0 %vm1282_vm3, %v6695_v32 }
 0x7bf   : > { %3586 = vmatmul.bf16.gmra.mxu3 %v6675_v37  ;;  %v6752_v37 = vld [vmem:[%s10581_s3 + $0x418] sm:$0xf0] }
 0x7c2   : > { %v3084_v12 = vpop.f32.mrf.mxu3  ;;  %v3414_v45 = vpop.f32.mrf.mxu1 }
 0x7c3   : > { %v3109_v40 = vadd.f32 %v3084_v12, %v9739_v51  ;;  %v7712_v51 = vld [vmem:[%s10581_s3 + $0x3e4] sm:$0xf0] }
 0x7c4   : > { %v6683_v13 = vor.u32 %v7712_v51, %v6682_v33  ;;  %v6766_v33 = vld [vmem:[%s10581_s3 + $0x430] sm:$0xf]  ;;  %v7724_v51 = vld [vmem:[%s10581_s3 + $0x434] sm:$0xf0] }
 0x7c5   : > { %v9898_v25 = vadd.f32 %v3409_v24, %v3109_v40 }
 0x7ca   : > { %v3086_v42 = vpop.f32.mrf.mxu3  ;;  %v9922_v26 = vpop.f32.mrf.mxu1 }
 0x7cb   : > { %v9908_v10 = vadd.f32 %v3086_v42, %v9744_v49  ;;  %v3611_v9 = vpop.f32.mrf.mxu0  ;;  %v7716_v49 = vld [vmem:[%s10582_s4 + $0x78] sm:$0xff]  ;;  %v6767_v42 = vor.u32 %v7724_v51, %v6766_v33 }
 0x7cc   : > { %3706 = vmatpush.bf16.msra.mxu2 %v7716_v49 }
 0x7cf   : > { %3591 = vmatmul.bf16.gmra.mxu3 %v6683_v13 }
 0x7d0   : > { %3707 = vmatpush.bf16.msra.mxu2 %v7715_v8 }
 0x7d2   : > { %v3089_v16 = vpop.f32.mrf.mxu3  ;;  %v3419_v1 = vpop.f32.mrf.mxu1 }
 0x7d3   : > { %v3111_v14 = vadd.f32 %v3089_v16, %v9749_v60  ;;  %v3613_v52 = vpop.f32.mrf.mxu0 }
 0x7d5   : > { %v9920_v4 = vadd.f32 %v3414_v45, %v3111_v14  ;;  %v6760_v45 = vld [vmem:[%s10581_s3 + $0x428] sm:$0xf0] }
 0x7d6   : > { %v6763_v49 = vor.u32 %v7721_v23, %v6760_v45 }
 0x7da   : > { %v3091_v18 = vpop.f32.mrf.mxu3 }
 0x7db   : > { %v9931_v60 = vadd.f32 %v3091_v18, %v9761_v11  ;;  %v3616_v48 = vpop.f32.mrf.mxu0  ;;  %v6775_v18 = vor.u32 %v7726_v19, %v6774_v0 }
 0x7df   : > { %3596 = vmatmul.bf16.gmra.mxu3 %v6691_v31 }
 0x7e2   : > { %v3094_v11 = vpop.f32.mrf.mxu3 }
 0x7e3   : > { %v3113_v47 = vadd.f32 %v3094_v11, %v9766_v58  ;;  %v6758_v58 = vld [vmem:[%s10581_s3 + $0x420] sm:$0xf]  ;;  %v3618_v54 = vpop.f32.mrf.mxu0 }
 0x7e4   : > { %v6759_v27 = vor.u32 %v7722_v15, %v6758_v58 }
 0x7e5   : > { %v9943_v34 = vadd.f32 %v3419_v1, %v3113_v47 }
 0x7e6   : > { %3896 = vmatmul.bf16.gmra.mxu1 %v6759_v27  ;;  %v7725_v27 = vld [vmem:[%s10581_s3 + $0x444] sm:$0xf] }
 0x7ea   : > { %v3096_v38 = vpop.f32.mrf.mxu3 }
 0x7eb   : > { %v9952_v5 = vadd.f32 %v3096_v38, %v9784_v22  ;;  %v7719_v22 = vld [vmem:[%s10581_s3 + $0x414] sm:$0xf]  ;;  %v3621_v40 = vpop.f32.mrf.mxu0  ;;  %v6783_v38 = vor.u32 %v7728_v57, %v6782_v43  ;;  %v7734_v57 = vld [vmem:[%s10582_s4 + $0x88] sm:$0xff] }
 0x7ec   : > { %v6755_v32 = vor.u32 %v7719_v22, %v6752_v37  ;;  %4031 = vmatpush.bf16.msrb.mxu0 %v7734_v57 }
 0x7ef   : > { %6804 = vmatmul.msk.bf16.vlgmr.msrb.gmra.mxu3 %vm1282_vm3, %v6747_v63 }
 0x7f2   : > { %v3562_v24 = vpop.f32.mrf.mxu3 }
 0x7f3   : > { %v3612_v35 = vadd.f32 %v3611_v9, %v3562_v24  ;;  %v3623_v55 = vpop.f32.mrf.mxu0 }
 0x7f6   : > { %3901 = vmatmul.bf16.gmra.mxu1 %v6767_v42 }
 0x7fa   : > { %v3564_v12 = vpop.f32.mrf.mxu3 }
 0x7fb   : > { %v3614_v28 = vadd.f32 %v3613_v52, %v3564_v12  ;;  %v3626_v8 = vpop.f32.mrf.mxu0  ;;  %v6768_v52 = vld [vmem:[%s10581_s3 + $0x438] sm:$0xf0] }
 0x7fd   : > { %v3651_v13 = vpack.c.bf16 %v3614_v28, %v3612_v35  ;;  %v7730_v35 = vld [vmem:[%s10581_s3 + $0x464] sm:$0xf0] }
 0x7ff   : > { %6716 = vmatmul.msk.bf16.vlgmr.msra.gmra.mxu2 %vm1656_vm4, %v3651_v13  ;;  %6805 = vmatmul.msk.bf16.gmra.mxu3 %vm1282_vm3, %v6755_v32  ;;  %v7727_v13 = vld [vmem:[%s10581_s3 + $0x454] sm:$0xf] }
 0x802   : > { %v3567_v53 = vpop.f32.mrf.mxu3 }
 0x803   : > { %v3617_v14 = vadd.f32 %v3616_v48, %v3567_v53  ;;  %v3628_v29 = vpop.f32.mrf.mxu0  ;;  %v6771_v48 = vor.u32 %v7723_v7, %v6768_v52  ;;  %v6784_v53 = vld [vmem:[%s10581_s3 + $0x458] sm:$0xf0]  ;;  %v10037_v52 = vpop.f32.mrf.mxu1 }
 0x806   : > { %3906 = vmatmul.bf16.gmra.mxu1 %v6775_v18 }
 0x80a   : > { %v3569_v16 = vpop.f32.mrf.mxu3 }
 0x80b   : > { %v3619_v9 = vadd.f32 %v3618_v54, %v3569_v16  ;;  %v3631_v15 = vpop.f32.mrf.mxu0  ;;  %v6776_v54 = vld [vmem:[%s10581_s3 + $0x448] sm:$0xf0]  ;;  %v6787_v16 = vor.u32 %v7727_v13, %v6784_v53 }
 0x80c   : > { %v6779_v12 = vor.u32 %v7725_v27, %v6776_v54 }
 0x80d   : > { %v3652_v31 = vpack.c.bf16 %v3619_v9, %v3617_v14  ;;  %v6798_v14 = vld [vmem:[%s10581_s3 + $0x470] sm:$0xf]  ;;  %v7732_v9 = vld [vmem:[%s10581_s3 + $0x474] sm:$0xf0] }
 0x80f   : > { %6717 = vmatmul.msk.bf16.gmra.mxu2 %vm1656_vm4, %v3652_v31  ;;  %6806 = vmatmul.msk.bf16.gmra.mxu3 %vm1282_vm3, %v6763_v49  ;;  %v6799_v49 = vor.u32 %v7732_v9, %v6798_v14  ;;  %v7729_v31 = vld [vmem:[%s10581_s3 + $0x464] sm:$0xf] }
 0x812   : > { %v3572_v44 = vpop.f32.mrf.mxu3  ;;  %v3887_v43 = vpop.f32.mrf.mxu1 }
 0x813   : > { %v3622_v1 = vadd.f32 %v3621_v40, %v3572_v44  ;;  %v6790_v40 = vld [vmem:[%s10581_s3 + $0x460] sm:$0xf]  ;;  %v3633_v28 = vpop.f32.mrf.mxu0 }
 0x814   : > { %v6791_v32 = vor.u32 %v7730_v35, %v6790_v40 }
 0x816   : > { %3911 = vmatmul.bf16.gmra.mxu1 %v6783_v38 }
 0x81a   : > { %v3574_v11 = vpop.f32.mrf.mxu3 }
 0x81b   : > { %v3624_v47 = vadd.f32 %v3623_v55, %v3574_v11  ;;  %v3636_v42 = vpop.f32.mrf.mxu0 }
 0x81d   : > { %v3653_v63 = vpack.c.bf16 %v3624_v47, %v3622_v1 }
 0x81f   : > { %6718 = vmatmul.msk.bf16.gmra.mxu2 %vm1656_vm4, %v3653_v63  ;;  %6807 = vmatmul.msk.bf16.gmra.mxu3 %vm1282_vm3, %v6771_v48  ;;  %v7731_v63 = vld [vmem:[%s10581_s3 + $0x474] sm:$0xf] }
 0x822   : > { %v3577_v58 = vpop.f32.mrf.mxu3 }
 0x823   : > { %v3627_v22 = vadd.f32 %v3626_v8, %v3577_v58  ;;  %v3638_v19 = vpop.f32.mrf.mxu0  ;;  %v6792_v8 = vld [vmem:[%s10581_s3 + $0x468] sm:$0xf0]  ;;  %v6800_v58 = vld [vmem:[%s10581_s3 + $0x478] sm:$0xf0] }
 0x824   : > { %v6795_v1 = vor.u32 %v7729_v31, %v6792_v8 }
 0x826   : > { %3916 = vmatmul.bf16.gmra.mxu1 %v6791_v32 }
 0x82a   : > { %v3579_v24 = vpop.f32.mrf.mxu3 }
 0x82b   : > { %v3629_v37 = vadd.f32 %v3628_v29, %v3579_v24  ;;  %v3641_v7 = vpop.f32.mrf.mxu0  ;;  %v6803_v24 = vor.u32 %v7731_v63, %v6800_v58 }
 0x82d   : > { %v3654_v33 = vpack.c.bf16 %v3629_v37, %v3627_v22  ;;  %v7733_v22 = vld [vmem:[%s10582_s4 + $0x80] sm:$0xff] }
 0x82e   : > { %4032 = vmatpush.bf16.msrb.mxu0 %v7733_v22 }
 0x82f   : > { %6719 = vmatmul.msk.bf16.gmra.mxu2 %vm1656_vm4, %v3654_v33  ;;  %6808 = vmatmul.msk.bf16.gmra.mxu3 %vm1282_vm3, %v6779_v12  ;;  %v3889_v12 = vpop.f32.mrf.mxu1 }
 0x832   : > { %v3582_v51 = vpop.f32.mrf.mxu3 }
 0x833   : > { %v3632_v23 = vadd.f32 %v3631_v15, %v3582_v51  ;;  %v3643_v38 = vpop.f32.mrf.mxu0 }
 0x836   : > { %3921 = vmatmul.bf16.gmra.mxu1 %v6799_v49 }
 0x83a   : > { %v3584_v55 = vpop.f32.mrf.mxu3 }
 0x83b   : > { %v3634_v45 = vadd.f32 %v3633_v28, %v3584_v55  ;;  %v3646_v40 = vpop.f32.mrf.mxu0  ;;  %v3892_v28 = vpop.f32.mrf.mxu1 }
 0x83d   : > { %v3655_v0 = vpack.c.bf16 %v3634_v45, %v3632_v23 }
 0x83f   : > { %6720 = vmatmul.msk.bf16.gmra.mxu2 %vm1656_vm4, %v3655_v0  ;;  %6809 = vmatmul.msk.bf16.gmra.mxu3 %vm1282_vm3, %v6787_v16 }
 0x842   : > { %v3587_v18 = vpop.f32.mrf.mxu3 }
 0x843   : > { %v3637_v29 = vadd.f32 %v3636_v42, %v3587_v18  ;;  %v3648_v32 = vpop.f32.mrf.mxu0  ;;  %v3894_v53 = vpop.f32.mrf.mxu1 }
 0x84a   : > { %v3589_v44 = vpop.f32.mrf.mxu3 }
 0x84b   : > { %v3639_v11 = vadd.f32 %v3638_v19, %v3589_v44 }
 0x84d   : > { %v3656_v47 = vpack.c.bf16 %v3639_v11, %v3637_v29 }
 0x84f   : > { %6721 = vmatmul.msk.bf16.gmra.mxu2 %vm1656_vm4, %v3656_v47  ;;  %6810 = vmatmul.msk.bf16.gmra.mxu3 %vm1282_vm3, %v6795_v1 }
 0x852   : > { %v3592_v48 = vpop.f32.mrf.mxu3 }
 0x853   : > { %v3642_v27 = vadd.f32 %v3641_v7, %v3592_v48 }
 0x85a   : > { %v3594_v15 = vpop.f32.mrf.mxu3 }
 0x85b   : > { %v3644_v54 = vadd.f32 %v3643_v38, %v3594_v15 }
 0x85d   : > { %v3657_v37 = vpack.c.bf16 %v3644_v54, %v3642_v27 }
 0x85f   : > { %6722 = vmatmul.msk.bf16.gmra.mxu2 %vm1656_vm4, %v3657_v37  ;;  %6811 = vmatmul.msk.bf16.gmra.mxu3 %vm1282_vm3, %v6803_v24 }
 0x862   : > { %v3597_v35 = vpop.f32.mrf.mxu3 }
 0x863   : > { %v3647_v51 = vadd.f32 %v3646_v40, %v3597_v35  ;;  %v3897_v14 = vpop.f32.mrf.mxu1 }
 0x86a   : > { %v3599_v33 = vpop.f32.mrf.mxu3 }
 0x86b   : > { %v3649_v42 = vadd.f32 %v3648_v32, %v3599_v33  ;;  %v3899_v18 = vpop.f32.mrf.mxu1 }
 0x86d   : > { %v3658_v13 = vpack.c.bf16 %v3649_v42, %v3647_v51 }
 0x86f   : > { %6723 = vmatmul.msk.bf16.gmra.mxu2 %vm1656_vm4, %v3658_v13 }
 0x872   : > { %v3936_v55 = vpop.f32.mrf.mxu3 }
 0x873   : > { %v3937_v45 = vadd.f32 %v3936_v55, %v3887_v43  ;;  %v3902_v11 = vpop.f32.mrf.mxu1 }
 0x87a   : > { %v3938_v23 = vpop.f32.mrf.mxu3 }
 0x87b   : > { %v3939_v16 = vadd.f32 %v3938_v23, %v3889_v12  ;;  %v3904_v43 = vpop.f32.mrf.mxu1 }
 0x87d   : > { %v3976_v9 = vpack.c.bf16 %v3939_v16, %v3937_v45 }
 0x87f   : > { %6824 = vmatmul.msk.bf16.vlgmr.msrb.gmra.mxu0 %vm1656_vm4, %v3976_v9 }
 0x882   : > { %v3709_v49 = vpop.f32.mrf.mxu2  ;;  %v3941_v0 = vpop.f32.mrf.mxu3 }
 0x883   : > { %v10058_v19 = vadd.f32 %v3709_v49, %v9793_v39  ;;  %v3942_v44 = vadd.f32 %v3941_v0, %v3892_v28  ;;  %v3907_v24 = vpop.f32.mrf.mxu1 }
 0x88a   : > { %v10060_v31 = vpop.f32.mrf.mxu2  ;;  %v3943_v8 = vpop.f32.mrf.mxu3 }
 0x88b   : > { %v3944_v7 = vadd.f32 %v3943_v8, %v3894_v53  ;;  %v3909_v28 = vpop.f32.mrf.mxu1 }
 0x88d   : > { %v3977_v29 = vpack.c.bf16 %v3944_v7, %v3942_v44 }
 0x88f   : > { %6825 = vmatmul.msk.bf16.gmra.mxu0 %vm1656_vm4, %v3977_v29 }
 0x892   : > { %v3714_v1 = vpop.f32.mrf.mxu2  ;;  %v3946_v47 = vpop.f32.mrf.mxu3 }
 0x893   : > { %v3751_v48 = vadd.f32 %v3714_v1, %v9814_v61  ;;  %v3947_v63 = vadd.f32 %v3946_v47, %v3897_v14  ;;  %v3912_v51 = vpop.f32.mrf.mxu1 }
 0x89a   : > { %v3716_v57 = vpop.f32.mrf.mxu2  ;;  %v3948_v38 = vpop.f32.mrf.mxu3 }
 0x89b   : > { %v3949_v39 = vadd.f32 %v3948_v38, %v3899_v18 }
 0x89d   : > { %v3978_v58 = vpack.c.bf16 %v3949_v39, %v3947_v63 }
 0x89f   : > { %6826 = vmatmul.msk.bf16.gmra.mxu0 %vm1656_vm4, %v3978_v58 }
 0x8a2   : > { %v3719_v15 = vpop.f32.mrf.mxu2  ;;  %v3951_v27 = vpop.f32.mrf.mxu3 }
 0x8a3   : > { %v3753_v54 = vadd.f32 %v3719_v15, %v9835_v56  ;;  %v3952_v12 = vadd.f32 %v3951_v27, %v3902_v11  ;;  %v3914_v56 = vpop.f32.mrf.mxu1 }
 0x8aa   : > { %v3721_v22 = vpop.f32.mrf.mxu2  ;;  %v3953_v37 = vpop.f32.mrf.mxu3 }
 0x8ab   : > { %v3954_v40 = vadd.f32 %v3953_v37, %v3904_v43  ;;  %v3917_v9 = vpop.f32.mrf.mxu1  ;;  %v3427_v37 = vadd.f32 %v9802_v17, %v9826_v46 }
 0x8ad   : > { %v3979_v35 = vpack.c.bf16 %v3954_v40, %v3952_v12  ;;  %v3752_v12 = vadd.f32 %v3716_v57, %v3427_v37 }
 0x8af   : > { %6827 = vmatmul.msk.bf16.gmra.mxu0 %vm1656_vm4, %v3979_v35 }
 0x8b2   : > { %v3724_v61 = vpop.f32.mrf.mxu2  ;;  %v3956_v32 = vpop.f32.mrf.mxu3 }
 0x8b3   : > { %v3755_v33 = vadd.f32 %v3724_v61, %v9856_v21  ;;  %v3957_v13 = vadd.f32 %v3956_v32, %v3907_v24  ;;  %v3919_v18 = vpop.f32.mrf.mxu1 }
 0x8ba   : > { %v3958_v42 = vpop.f32.mrf.mxu3 }
 0x8bb   : > { %v3959_v53 = vadd.f32 %v3958_v42, %v3909_v28  ;;  %v3922_v29 = vpop.f32.mrf.mxu1  ;;  %v3425_v42 = vadd.f32 %v9781_v62, %v9805_v30 }
 0x8bd   : > { %v3980_v55 = vpack.c.bf16 %v3959_v53, %v3957_v13 }
 0x8bf   : > { %6828 = vmatmul.msk.bf16.gmra.mxu0 %vm1656_vm4, %v3980_v55 }
 0x8c2   : > { %v3961_v23 = vpop.f32.mrf.mxu3 }
 0x8c3   : > { %v3962_v16 = vadd.f32 %v3961_v23, %v3912_v51  ;;  %v3924_v1 = vpop.f32.mrf.mxu1  ;;  %v3726_v51 = vpop.f32.mrf.mxu2 }
 0x8ca   : > { %v3963_v45 = vpop.f32.mrf.mxu3 }
 0x8cb   : > { %v3964_v14 = vadd.f32 %v3963_v45, %v3914_v56  ;;  %v3729_v57 = vpop.f32.mrf.mxu2  ;;  %v3431_v45 = vadd.f32 %v9847_v20, %v9866_v59  ;;  %v7738_v20 = vld [vmem:[%s10585_s7 + $0x10] sm:$0xff] }
 0x8cc   : > { %v3757_v59 = vadd.f32 %v3729_v57, %v9877_v6 }
 0x8cd   : > { %v3981_v49 = vpack.c.bf16 %v3964_v14, %v3962_v16  ;;  %v3756_v16 = vadd.f32 %v3726_v51, %v3431_v45 }
 0x8cf   : > { %6829 = vmatmul.msk.bf16.gmra.mxu0 %vm1656_vm4, %v3981_v49 }
 0x8d2   : > { %v3966_v0 = vpop.f32.mrf.mxu3 }
 0x8d3   : > { %v3967_v21 = vadd.f32 %v3966_v0, %v3917_v9  ;;  %v3731_v62 = vpop.f32.mrf.mxu2 }
 0x8da   : > { %v3968_v8 = vpop.f32.mrf.mxu3 }
 0x8db   : > { %v3969_v44 = vadd.f32 %v3968_v8, %v3919_v18 }
 0x8dd   : > { %v3982_v7 = vpack.c.bf16 %v3969_v44, %v3967_v21 }
 0x8df   : > { %6830 = vmatmul.msk.bf16.gmra.mxu0 %vm1656_vm4, %v3982_v7 }
 0x8e2   : > { %v3971_v11 = vpop.f32.mrf.mxu3 }
 0x8e3   : > { %v3972_v43 = vadd.f32 %v3971_v11, %v3922_v29  ;;  %v7737_v11 = vld [vmem:[%s10585_s7 + $0x8] sm:$0xff] }
 0x8ea   : > { %v3973_v47 = vpop.f32.mrf.mxu3 }
 0x8eb   : > { %v3974_v38 = vadd.f32 %v3973_v47, %v3924_v1  ;;  %v3433_v47 = vadd.f32 %v9868_v3, %v9887_v2 }
 0x8ed   : > { %v3983_v63 = vpack.c.bf16 %v3974_v38, %v3972_v43  ;;  %v3437_v43 = vadd.f32 %v9922_v26, %v9931_v60  ;;  %v3758_v38 = vadd.f32 %v3731_v62, %v3433_v47  ;;  %v7750_v47 = vld [vmem:[%s10584_s6 + $0x18] sm:$0x10] }
 0x8ef   : > { %6831 = vmatmul.msk.bf16.gmra.mxu0 %vm1656_vm4, %v3983_v63 }
 0x8fc   : > { %v4034_v39 = vpop.f32.mrf.mxu0 }
 0x8fd   : > { %v4074_v58 = vadd.f32 %v4034_v39, %v10058_v19  ;;  %v3429_v19 = vadd.f32 %v9823_v41, %v9845_v36 }
 0x8ff   : > { %v3754_v13 = vadd.f32 %v3721_v22, %v3429_v19 }
 0x904   : > { %v4036_v15 = vpop.f32.mrf.mxu0 }
 0x90c   : > { %v4039_v27 = vpop.f32.mrf.mxu0 }
 0x90d   : > { %v10073_v24 = vadd.f32 %v4039_v27, %v3751_v48  ;;  %v3750_v48 = vadd.f32 %v10060_v31, %v3425_v42  ;;  %v3734_v31 = vpop.f32.mrf.mxu2 }
 0x90e   : > { %v3759_v26 = vadd.f32 %v3734_v31, %v9898_v25  ;;  %v6890_v31 = vld [vmem:[%s10584_s6 + $0x10] sm:$0xf] }
 0x90f   : > { %v4075_v55 = vadd.f32 %v4036_v15, %v3750_v48  ;;  %v7895_v15 = vld [vmem:[%s10583_s5] ss:$0 sm:$0xff]  ;;  %v3435_v48 = vadd.f32 %v9896_v50, %v9908_v10  ;;  %v7735_v10 = vld [vmem:[%s10584_s6] sm:$0x10] }
 0x910   : > { %v6834_v50 = vld [vmem:[%s10584_s6] sm:$0xf] }
 0x914   : > { %v4041_v40 = vpop.f32.mrf.mxu0 }
 0x915   : > { %v10077_v35 = vadd.f32 %v4041_v40, %v3752_v12  ;;  %v3736_v9 = vpop.f32.mrf.mxu2 }
 0x916   : > { %v3760_v25 = vadd.f32 %v3736_v9, %v3435_v48  ;;  %v7751_v48 = vld [vmem:[%s10585_s7 + $0x60] sm:$0xff] }
 0x91c   : > { %v4044_v28 = vpop.f32.mrf.mxu0 }
 0x91d   : > { %v4078_v61 = vadd.f32 %v4044_v28, %v3753_v54  ;;  %v3739_v0 = vpop.f32.mrf.mxu2 }
 0x91e   : > { %v3761_v8 = vadd.f32 %v3739_v0, %v9920_v4  ;;  %v7736_v4 = vld [vmem:[%s10585_s7] sm:$0xff]  ;;  %v7743_v0 = vld [vmem:[%s10585_s7 + $0x30] sm:$0xff] }
 0x91f   : > { %v4090_v32 = vmax.f32 %v4074_v58, %v4078_v61 }
 0x924   : > { %v4046_v53 = vpop.f32.mrf.mxu0 }
 0x925   : > { %v4079_v17 = vadd.f32 %v4046_v53, %v3754_v13  ;;  %v3741_v21 = vpop.f32.mrf.mxu2  ;;  %v3439_v13 = vadd.f32 %v10037_v52, %v9952_v5  ;;  %v6835_v5 = vor.u32 %v7735_v10, %v6834_v50  ;;  %v6841_v52 = vld [vmem:[%s10584_s6 + $0x8] sm:$0xf] }
 0x926   : > { %v3762_v63 = vadd.f32 %v3741_v21, %v3437_v43  ;;  %v7746_v21 = vld [vmem:[%s10585_s7 + $0x40] sm:$0xff] }
 0x927   : > { %v4091_v46 = vmax.f32 %v4075_v55, %v4079_v17 }
 0x92c   : > { %v4049_v56 = vpop.f32.mrf.mxu0 }
 0x92d   : > { %v4080_v23 = vadd.f32 %v4049_v56, %v3755_v33  ;;  %v7739_v33 = vld [vmem:[%s10585_s7 + $0x18] sm:$0xff] }
 0x92e   : > { %4261 = vmatpush.bf16.msra.mxu3 %v7739_v33  ;;  %v7741_v33 = vld [vmem:[%s10585_s7 + $0x20] sm:$0xff] }
 0x92f   : > { %v4092_v54 = vmax.f32 %v10073_v24, %v4080_v23  ;;  %v3744_v24 = vpop.f32.mrf.mxu2 }
 0x930   : > { %v3763_v60 = vadd.f32 %v3744_v24, %v9943_v34 }
 0x932   : > { %4262 = vmatpush.bf16.msra.mxu3 %v7738_v20  ;;  %v7749_v20 = vld [vmem:[%s10585_s7 + $0x58] sm:$0xff] }
 0x934   : > { %v4051_v30 = vpop.f32.mrf.mxu0 }
 0x935   : > { %v4081_v14 = vadd.f32 %v4051_v30, %v3756_v16 }
 0x936   : > { %4263 = vmatpush.bf16.msra.mxu3 %v7737_v11 }
 0x937   : > { %v4093_v41 = vmax.f32 %v10077_v35, %v4081_v14  ;;  %v3746_v19 = vpop.f32.mrf.mxu2  ;;  %v10669_v14 = vld [vmem:[#allocation5_spill] sm:$0xff] }
 0x938   : > { %v3764_v55 = vadd.f32 %v3746_v19, %v3439_v13  ;;  %v7752_v19 = vld [vmem:[%s10585_s7 + $0x68] sm:$0xff] }
 0x93a   : > { %4264 = vmatpush.bf16.msra.mxu3 %v7736_v4  ;;  %v7760_v4 = vld [vmem:[%s10584_s6 + $0x28] sm:$0x10] }
 0x93c   : > { %v4054_v36 = vpop.f32.mrf.mxu0 }
 0x93d   : > { %v4082_v7 = vadd.f32 %v4054_v36, %v3757_v59  ;;  %v7748_v59 = vld [vmem:[%s10585_s7 + $0x50] sm:$0xff] }
 0x944   : > { %v4056_v22 = vpop.f32.mrf.mxu0 }
 0x945   : > { %v4083_v58 = vadd.f32 %v4056_v22, %v3758_v38  ;;  %v7745_v22 = vld [vmem:[%s10584_s6 + $0x10] sm:$0x10] }
 0x946   : > { %v6891_v9 = vor.u32 %v7745_v22, %v6890_v31  ;;  %v7767_v22 = vld [vmem:[%s10585_s7 + $0xc8] sm:$0xff] }
 0x94c   : > { %v4059_v49 = vpop.f32.mrf.mxu0 }
 0x94d   : > { %v4084_v35 = vadd.f32 %v4059_v49, %v3759_v26  ;;  %v7744_v49 = vld [vmem:[%s10585_s7 + $0x38] sm:$0xff]  ;;  %v7755_v26 = vld [vmem:[%s10584_s6 + $0x20] sm:$0x10] }
 0x94e   : > { %4220 = vmatpush.bf16.msra.mxu1 %v7744_v49 }
 0x952   : > { %4221 = vmatpush.bf16.msra.mxu1 %v7743_v0  ;;  %v7772_v0 = vld [vmem:[%s10585_s7 + $0xe8] sm:$0xff] }
 0x954   : > { %v4061_v18 = vpop.f32.mrf.mxu0 }
 0x955   : > { %v4085_v17 = vadd.f32 %v4061_v18, %v3760_v25  ;;  %v7742_v18 = vld [vmem:[%s10585_s7 + $0x28] sm:$0xff]  ;;  %v7764_v25 = vld [vmem:[%s10585_s7 + $0xb8] sm:$0xff] }
 0x956   : > { %4222 = vmatpush.bf16.msra.mxu1 %v7742_v18  ;;  %v7766_v18 = vld [vmem:[%s10585_s7 + $0xc0] sm:$0xff] }
 0x95a   : > { %4223 = vmatpush.bf16.msra.mxu1 %v7741_v33 }
 0x95c   : > { %v4064_v44 = vpop.f32.mrf.mxu0 }
 0x95d   : > { %v4086_v29 = vadd.f32 %v4064_v44, %v3761_v8  ;;  %v7747_v8 = vld [vmem:[%s10585_s7 + $0x48] sm:$0xff] }
 0x95e   : > { %4337 = vmatpush.bf16.msrb.mxu1 %v7749_v20 }
 0x95f   : > { %v4094_v1 = vmax.f32 %v4082_v7, %v4086_v29 }
 0x961   : > { %v4098_v6 = vmax.f32 %v4090_v32, %v4094_v1  ;;  %v6922_v1 = vld [vmem:[%s10584_s6 + $0x18] sm:$0xf] }
 0x962   : > { %4338 = vmatpush.bf16.msrb.mxu1 %v7748_v59  ;;  %v6923_v43 = vor.u32 %v7750_v47, %v6922_v1  ;;  %v7771_v59 = vld [vmem:[%s10585_s7 + $0xe0] sm:$0xff]  ;;  %v7778_v47 = vld [vmem:[%s10585_s7 + $0x110] sm:$0xff] }
 0x963   : > { %v4106_v2 = vadd.f32 %v7895_v15, %v4098_v6  ;;  %v6986_v6 = vld [vmem:[%s10584_s6 + $0x28] sm:$0xf] }
 0x964   : > { %v4066_v39 = vpop.f32.mrf.mxu0 }
 0x965   : > { %v4087_v27 = vadd.f32 %v4066_v39, %v3762_v63  ;;  %v4110_v28 = vmax.f32 %v4106_v2, 0.0  ;;  %v6987_v63 = vor.u32 %v7760_v4, %v6986_v6  ;;  %v7777_v4 = vld [vmem:[%s10585_s7 + $0x108] sm:$0xff] }
 0x966   : > { %4339 = vmatpush.bf16.msrb.mxu1 %v7747_v8 }
 0x967   : > { %v4095_v3 = vmax.f32 %v4083_v58, %v4087_v27  ;;  %v7770_v27 = vld [vmem:[%s10584_s6 + $0x38] sm:$0x10] }
 0x969   : > { %v4099_v37 = vmax.f32 %v4091_v46, %v4095_v3 }
 0x96a   : > { %4340 = vmatpush.bf16.msrb.mxu1 %v7746_v21 }
 0x96b   : > { %v4107_v12 = vadd.f32 %v7895_v15, %v4099_v37  ;;  %v6954_v37 = vld [vmem:[%s10584_s6 + $0x20] sm:$0xf] }
 0x96c   : > { %v4069_v40 = vpop.f32.mrf.mxu0 }
 0x96d   : > { %v4111_v61 = vmax.f32 %v4107_v12, 0.0  ;;  %v4088_v32 = vadd.f32 %v4069_v40, %v3763_v60  ;;  %v6955_v60 = vor.u32 %v7755_v26, %v6954_v37  ;;  %v7018_v12 = vld [vmem:[%s10584_s6 + $0x30] sm:$0xf]  ;;  %v7765_v40 = vld [vmem:[%s10584_s6 + $0x30] sm:$0x10]  ;;  %v7784_v37 = vld [vmem:[%s10587_s9 + $0x20] sm:$0xff] }
 0x96e   : > { %v7783_v26 = vld [vmem:[%s10587_s9 + $0x18] sm:$0xff] }
 0x96f   : > { %v10111_v51 = vpack.c.bf16 %v4111_v61, %v4110_v28  ;;  %v4096_v42 = vmax.f32 %v4084_v35, %v4088_v32  ;;  %v7019_v35 = vor.u32 %v7765_v40, %v7018_v12  ;;  %v7082_v28 = vld [vmem:[%s10584_s6 + $0x40] sm:$0xf]  ;;  %v7775_v61 = vld [vmem:[%s10584_s6 + $0x40] sm:$0x10]  ;;  %v7803_v12 = vld [vmem:[%s10587_s9 + $0xb8] sm:$0xff] }
 0x970   : > { %v7083_v32 = vor.u32 %v7775_v61, %v7082_v28  ;;  %v7782_v40 = vld [vmem:[%s10587_s9 + $0x10] sm:$0xff] }
 0x971   : > { %v4100_v53 = vmax.f32 %v4092_v54, %v4096_v42  ;;  %v7740_v54 = vld [vmem:[%s10584_s6 + $0x8] sm:$0x10]  ;;  %v7753_v42 = vld [vmem:[%s10585_s7 + $0x70] sm:$0xff] }
 0x972   : > { %v7794_v28 = vld [vmem:[%s10587_s9 + $0x70] sm:$0xff] }
 0x973   : > { %v4108_v56 = vadd.f32 %v7895_v15, %v4100_v53  ;;  %v7759_v53 = vld [vmem:[%s10585_s7 + $0x98] sm:$0xff]  ;;  %v7802_v61 = vld [vmem:[%s10587_s9 + $0xb0] sm:$0xff] }
 0x974   : > { %v4071_v34 = vpop.f32.mrf.mxu0 }
 0x975   : > { %v4089_v46 = vadd.f32 %v4071_v34, %v3764_v55  ;;  %v4112_v16 = vmax.f32 %v4108_v56, 0.0  ;;  %v7763_v55 = vld [vmem:[%s10585_s7 + $0xb0] sm:$0xff] }
 0x977   : > { %v4097_v57 = vmax.f32 %v4085_v17, %v4089_v46  ;;  %v7758_v17 = vld [vmem:[%s10585_s7 + $0x90] sm:$0xff] }
 0x979   : > { %v4101_v23 = vmax.f32 %v4093_v41, %v4097_v57  ;;  %v6842_v41 = vor.u32 %v7740_v54, %v6841_v52  ;;  %v7762_v57 = vld [vmem:[%s10585_s7 + $0xa8] sm:$0xff]  ;;  %v7768_v54 = vld [vmem:[%s10585_s7 + $0xd0] sm:$0xff] }
 0x97b   : > { %v4109_v45 = vadd.f32 %v7895_v15, %v4101_v23  ;;  %v7050_v15 = vld [vmem:[%s10584_s6 + $0x38] sm:$0xf]  ;;  %v7757_v23 = vld [vmem:[%s10585_s7 + $0x88] sm:$0xff] }
 0x97c   : > { %v7051_v3 = vor.u32 %v7770_v27, %v7050_v15 }
 0x97d   : > { %v4113_v62 = vmax.f32 %v4109_v45, 0.0  ;;  %v7761_v45 = vld [vmem:[%s10585_s7 + $0xa0] sm:$0xff] }
 0x97f   : > { %v4115_v30 = vpack.c.bf16 %v4113_v62, %v4112_v16  ;;  %v7756_v62 = vld [vmem:[%s10585_s7 + $0x80] sm:$0xff] }
 0x981   : > { %v10118_v36 = vand.u32 %v4115_v30, %v10669_v14 }
 0x983   : > { %4136 = vmatpush.bf16.msrb.mxu2 %v10118_v36  ;;  %4366 = vmatpush.bf16.msrb.mxu3 %v10118_v36 }
 0x984   : > { %4522 = vmatpush.bf16.msra.mxu0 %v10118_v36 }
 0x987   : > { %4137 = vmatpush.bf16.msrb.mxu2 %v10111_v51  ;;  %4367 = vmatpush.bf16.msrb.mxu3 %v10111_v51 }
 0x988   : > { %4523 = vmatpush.bf16.msra.mxu0 %v10111_v51 }
 0x98a   : > { %6836 = vmatmul.msk.bf16.vlgmr.msrb.gmra.mxu2 %vm4123_vm5, %v6835_v5  ;;  %v7774_v5 = vld [vmem:[%s10585_s7 + $0xf8] sm:$0xff] }
 0x98b   : > { %4170 = vmatpush.bf16.msra.mxu2 %v10118_v36  ;;  %6988 = vmatmul.msk.bf16.vlgmr.msra.gmra.mxu0 %vm4123_vm5, %v6987_v63 }
 0x98c   : > { %4678 = vmatpush.bf16.msrb.mxu0 %v10118_v36 }
 0x98f   : > { %4171 = vmatpush.bf16.msra.mxu2 %v10111_v51 }
 0x990   : > { %4679 = vmatpush.bf16.msrb.mxu0 %v10111_v51 }
 0x993   : > { %4288 = vmatpush.bf16.msrb.mxu2 %v10118_v36 }
 0x997   : > { %4289 = vmatpush.bf16.msrb.mxu2 %v10111_v51 }
 0x99a   : > { %6843 = vmatmul.msk.bf16.vlgmr.msra.gmra.mxu2 %vm4123_vm5, %v6842_v41 }
 0x99b   : > { %7052 = vmatmul.msk.bf16.vlgmr.msrb.gmra.mxu0 %vm4123_vm5, %v7051_v3  ;;  %v7786_v3 = vld [vmem:[%s10587_s9 + $0x30] sm:$0xff] }
 0x9aa   : > { %6892 = vmatmul.msk.bf16.vlgmr.msrb.gmra.mxu2 %vm4123_vm5, %v6891_v9  ;;  %v7773_v9 = vld [vmem:[%s10585_s7 + $0xf0] sm:$0xff] }
 0xa08   : > { %v4525_v50 = vpop.f32.mrf.mxu0 }
 0xa0d   : > { %v4139_v44 = vpop.f32.mrf.mxu2 }
 0xa10   : > { %v4527_v49 = vpop.f32.mrf.mxu0 }
 0xa11   : > { %v4530_v8 = vpack.c.bf16 %v4527_v49, %v4525_v50  ;;  %v7797_v50 = vld [vmem:[%s10587_s9 + $0x88] sm:$0xff]  ;;  %v7804_v49 = vld [vmem:[%s10587_s9 + $0xc0] sm:$0xff] }
 0xa15   : > { %v4141_v7 = vpop.f32.mrf.mxu2 }
 0xa16   : > { %v4144_v29 = vpack.c.bf16 %v4141_v7, %v4139_v44 }
 0xa18   : > { %6885 = vmatmul.msk.bf16.vlgmr.msra.gmra.mxu3 %vm4212_vm6, %v4144_v29  ;;  %v4681_v44 = vpop.f32.mrf.mxu0  ;;  %v7779_v29 = vld [vmem:[%s10585_s7 + $0x118] sm:$0xff] }
 0xa19   : > { %4493 = vmatpush.bf16.msra.mxu3 %v7759_v53  ;;  %v7819_v53 = vld [vmem:[%s10587_s9 + $0x138] sm:$0xff] }
 0xa1d   : > { %v4173_v11 = vpop.f32.mrf.mxu2  ;;  %4494 = vmatpush.bf16.msra.mxu3 %v7758_v17  ;;  %v7818_v17 = vld [vmem:[%s10587_s9 + $0x130] sm:$0xff] }
 0xa20   : > { %v4683_v1 = vpop.f32.mrf.mxu0 }
 0xa21   : > { %4495 = vmatpush.bf16.msra.mxu3 %v7757_v23  ;;  %v7817_v23 = vld [vmem:[%s10587_s9 + $0x128] sm:$0xff] }
 0xa25   : > { %v4175_v38 = vpop.f32.mrf.mxu2  ;;  %4496 = vmatpush.bf16.msra.mxu3 %v7756_v62 }
 0xa26   : > { %v4178_v39 = vpack.c.bf16 %v4175_v38, %v4173_v11  ;;  %v7776_v38 = vld [vmem:[%s10585_s7 + $0x100] sm:$0xff] }
 0xa28   : > { %6868 = vmatmul.msk.bf16.vlgmr.msra.gmra.mxu1 %vm4212_vm6, %v4178_v39  ;;  %6924 = vmatmul.msk.bf16.vlgmr.msrb.gmra.mxu3 %vm4123_vm5, %v6923_v43  ;;  %v4686_v43 = vpack.c.bf16 %v4683_v1, %v4681_v44  ;;  %v7842_v44 = vld [vmem:[%s10587_s9 + $0x1f0] sm:$0xff]  ;;  %v7812_v1 = vld [vmem:[%s10587_s9 + $0x100] sm:$0xff] }
 0xa29   : > { %4444 = vmatpush.bf16.msra.mxu1 %v10118_v36 }
 0xa2d   : > { %4445 = vmatpush.bf16.msra.mxu1 %v10111_v51  ;;  %v4291_v58 = vpop.f32.mrf.mxu2 }
 0xa35   : > { %v4293_v24 = vpop.f32.mrf.mxu2 }
 0xa36   : > { %v4296_v2 = vpack.c.bf16 %v4293_v24, %v4291_v58  ;;  %v7787_v24 = vld [vmem:[%s10587_s9 + $0x38] sm:$0xff] }
 0xa37   : > { %4892 = vmatpush.bf16.msra.mxu0 %v7787_v24  ;;  %v7830_v24 = vld [vmem:[%s10587_s9 + $0x190] sm:$0xff] }
 0xa38   : > { %6917 = vmatmul.msk.bf16.vlgmr.msrb.gmra.mxu1 %vm4212_vm6, %v4296_v2  ;;  %v7785_v2 = vld [vmem:[%s10587_s9 + $0x28] sm:$0xff] }
 0xa39   : > { %4600 = vmatpush.bf16.msrb.mxu1 %v10118_v36 }
 0xa3b   : > { %4893 = vmatpush.bf16.msra.mxu0 %v7786_v3 }
 0xa3d   : > { %4601 = vmatpush.bf16.msrb.mxu1 %v10111_v51 }
 0xa3f   : > { %4894 = vmatpush.bf16.msra.mxu0 %v7785_v2  ;;  %v7838_v2 = vld [vmem:[%s10587_s9 + $0x1d0] sm:$0xff] }
 0xa43   : > { %4895 = vmatpush.bf16.msra.mxu0 %v7784_v37 }
 0xa47   : > { %4896 = vmatpush.bf16.msra.mxu0 %v7783_v26 }
 0xa48   : > { %6956 = vmatmul.msk.bf16.vlgmr.msra.gmra.mxu1 %vm4123_vm5, %v6955_v60  ;;  %v7795_v60 = vld [vmem:[%s10587_s9 + $0x78] sm:$0xff] }
 0xa49   : > { %4756 = vmatpush.bf16.msra.mxu1 %v10118_v36  ;;  %v7769_v36 = vld [vmem:[%s10585_s7 + $0xd8] sm:$0xff] }
 0xa4a   : > { %4649 = vmatpush.bf16.msrb.mxu3 %v7769_v36  ;;  %v7789_v36 = vld [vmem:[%s10587_s9 + $0x48] sm:$0xff] }
 0xa4b   : > { %4897 = vmatpush.bf16.msra.mxu0 %v7782_v40 }
 0xa4d   : > { %4757 = vmatpush.bf16.msra.mxu1 %v10111_v51  ;;  %v7754_v51 = vld [vmem:[%s10585_s7 + $0x78] sm:$0xff] }
 0xa4e   : > { %4415 = vmatpush.bf16.msra.mxu2 %v7754_v51  ;;  %4650 = vmatpush.bf16.msrb.mxu3 %v7768_v54  ;;  %v7810_v51 = vld [vmem:[%s10587_s9 + $0xf0] sm:$0xff]  ;;  %v7796_v54 = vld [vmem:[%s10587_s9 + $0x80] sm:$0xff] }
 0xa52   : > { %4416 = vmatpush.bf16.msra.mxu2 %v7753_v42  ;;  %4651 = vmatpush.bf16.msrb.mxu3 %v7767_v22  ;;  %v7793_v42 = vld [vmem:[%s10587_s9 + $0x68] sm:$0xff]  ;;  %v7835_v22 = vld [vmem:[%s10587_s9 + $0x1b8] sm:$0xff] }
 0xa56   : > { %4417 = vmatpush.bf16.msra.mxu2 %v7752_v19  ;;  %4652 = vmatpush.bf16.msrb.mxu3 %v7766_v18  ;;  %v7801_v19 = vld [vmem:[%s10587_s9 + $0xa8] sm:$0xff]  ;;  %v7843_v18 = vld [vmem:[%s10587_s9 + $0x1f8] sm:$0xff] }
 0xa58   : > { %7020 = vmatmul.msk.bf16.vlgmr.msrb.gmra.mxu1 %vm4123_vm5, %v7019_v35  ;;  %v7811_v35 = vld [vmem:[%s10587_s9 + $0xf8] sm:$0xff] }
 0xa59   : > { %5059 = vmatpush.bf16.msrb.mxu1 %v7803_v12  ;;  %v7829_v12 = vld [vmem:[%s10587_s9 + $0x188] sm:$0xff] }
 0xa5a   : > { %4418 = vmatpush.bf16.msra.mxu2 %v7751_v48  ;;  %v7780_v48 = vld [vmem:[%s10587_s9] sm:$0xff] }
 0xa5d   : > { %5060 = vmatpush.bf16.msrb.mxu1 %v7802_v61  ;;  %v7828_v61 = vld [vmem:[%s10587_s9 + $0x180] sm:$0xff] }
 0xa5e   : > { %4571 = vmatpush.bf16.msrb.mxu2 %v7764_v25  ;;  %v7792_v25 = vld [vmem:[%s10587_s9 + $0x60] sm:$0xff] }
 0xa61   : > { %5061 = vmatpush.bf16.msrb.mxu1 %v7801_v19 }
 0xa62   : > { %4572 = vmatpush.bf16.msrb.mxu2 %v7763_v55  ;;  %v7800_v55 = vld [vmem:[%s10587_s9 + $0xa0] sm:$0xff] }
 0xa65   : > { %5062 = vmatpush.bf16.msrb.mxu1 %v7800_v55 }
 0xa66   : > { %4573 = vmatpush.bf16.msrb.mxu2 %v7762_v57  ;;  %v7799_v57 = vld [vmem:[%s10587_s9 + $0x98] sm:$0xff] }
 0xa68   : > { %7084 = vmatmul.msk.bf16.vlgmr.msra.gmra.mxu1 %vm4123_vm5, %v7083_v32  ;;  %v7781_v32 = vld [vmem:[%s10587_s9 + $0x8] sm:$0xff] }
 0xa69   : > { %4898 = vmatpush.bf16.msra.mxu0 %v7781_v32  ;;  %5063 = vmatpush.bf16.msrb.mxu1 %v7799_v57  ;;  %v7850_v57 = vld [vmem:[%s10587_s9 + $0x230] sm:$0xff] }
 0xa6a   : > { %4574 = vmatpush.bf16.msrb.mxu2 %v7761_v45  ;;  %v7790_v45 = vld [vmem:[%s10587_s9 + $0x50] sm:$0xff] }
 0xa6d   : > { %4899 = vmatpush.bf16.msra.mxu0 %v7780_v48  ;;  %v7896_v48 = vld [vmem:[%s10586_s8] ss:$0 sm:$0xff] }
 0xa71   : > { %5221 = vmatpush.bf16.msrb.mxu0 %v7819_v53 }
 0xa75   : > { %5222 = vmatpush.bf16.msrb.mxu0 %v7818_v17 }
 0xa79   : > { %5223 = vmatpush.bf16.msrb.mxu0 %v7817_v23 }
 0xa9b   : > { %v4266_v13 = vpop.f32.mrf.mxu3 }
 0xaa3   : > { %v4268_v34 = vpop.f32.mrf.mxu3 }
 0xaa5   : > { %v4225_v46 = vpop.f32.mrf.mxu1 }
 0xaa6   : > { %v4267_v56 = vadd.f32 %v4266_v13, %v4225_v46  ;;  %v7809_v13 = vld [vmem:[%s10587_s9 + $0xe8] sm:$0xff]  ;;  %v7791_v46 = vld [vmem:[%s10587_s9 + $0x58] sm:$0xff] }
 0xaab   : > { %v4369_v16 = vpop.f32.mrf.mxu3 }
 0xaad   : > { %v4227_v30 = vpop.f32.mrf.mxu1 }
 0xaae   : > { %v4269_v14 = vadd.f32 %v4268_v34, %v4227_v30  ;;  %v7808_v34 = vld [vmem:[%s10587_s9 + $0xe0] sm:$0xff]  ;;  %v7806_v30 = vld [vmem:[%s10587_s9 + $0xd0] sm:$0xff] }
 0xab3   : > { %v4371_v10 = vpop.f32.mrf.mxu3 }
 0xab4   : > { %v4374_v52 = vpack.c.bf16 %v4371_v10, %v4369_v16  ;;  %v7798_v16 = vld [vmem:[%s10587_s9 + $0x90] sm:$0xff]  ;;  %v7805_v10 = vld [vmem:[%s10587_s9 + $0xc8] sm:$0xff] }
 0xab5   : > { %v4342_v41 = vpop.f32.mrf.mxu1  ;;  %5064 = vmatpush.bf16.msrb.mxu1 %v7798_v16 }
 0xab6   : > { %v10273_v31 = vadd.f32 %v4342_v41, %v4267_v56  ;;  %6949 = vmatmul.msk.bf16.vlgmr.msra.gmra.mxu2 %vm4212_vm6, %v4374_v52  ;;  %v7807_v56 = vld [vmem:[%s10587_s9 + $0xd8] sm:$0xff]  ;;  %v7788_v52 = vld [vmem:[%s10587_s9 + $0x40] sm:$0xff] }
 0xab7   : > { %4727 = vmatpush.bf16.msra.mxu2 %v7774_v5  ;;  %v7815_v5 = vld [vmem:[%s10587_s9 + $0x118] sm:$0xff] }
 0xab8   : > { %v7827_v41 = vld [vmem:[%s10587_s9 + $0x178] sm:$0xff] }
 0xab9   : > { %5065 = vmatpush.bf16.msrb.mxu1 %v7797_v50 }
 0xabb   : > { %4728 = vmatpush.bf16.msra.mxu2 %v7773_v9 }
 0xabd   : > { %v4344_v33 = vpop.f32.mrf.mxu1  ;;  %5066 = vmatpush.bf16.msrb.mxu1 %v7796_v54 }
 0xabe   : > { %v10288_v20 = vadd.f32 %v4344_v33, %v4269_v14  ;;  %v7816_v14 = vld [vmem:[%s10587_s9 + $0x120] sm:$0xff] }
 0xabf   : > { %4729 = vmatpush.bf16.msra.mxu2 %v7772_v0  ;;  %5224 = vmatpush.bf16.msrb.mxu0 %v7816_v14  ;;  %v7814_v0 = vld [vmem:[%s10587_s9 + $0x110] sm:$0xff] }
 0xac1   : > { %5383 = vmatpush.bf16.msra.mxu1 %v7835_v22  ;;  %v7846_v22 = vld [vmem:[%s10587_s9 + $0x210] sm:$0xff] }
 0xac3   : > { %4730 = vmatpush.bf16.msra.mxu2 %v7771_v59  ;;  %5225 = vmatpush.bf16.msrb.mxu0 %v7815_v5  ;;  %v7826_v59 = vld [vmem:[%s10587_s9 + $0x170] sm:$0xff] }
 0xac5   : > { %v4447_v21 = vpop.f32.mrf.mxu1 }
 0xac6   : > { %7013 = vmatmul.msk.bf16.vlgmr.msrb.gmra.mxu2 %vm4212_vm6, %v4530_v8  ;;  %v7834_v8 = vld [vmem:[%s10587_s9 + $0x1b0] sm:$0xff] }
 0xac7   : > { %4978 = vmatpush.bf16.msrb.mxu2 %v7795_v60  ;;  %5226 = vmatpush.bf16.msrb.mxu0 %v7814_v0  ;;  %v7821_v60 = vld [vmem:[%s10587_s9 + $0x148] sm:$0xff] }
 0xac8   : > { %5384 = vmatpush.bf16.msra.mxu1 %v7834_v8  ;;  %v7844_v8 = vld [vmem:[%s10587_s9 + $0x200] sm:$0xff] }
 0xacb   : > { %4979 = vmatpush.bf16.msrb.mxu2 %v7794_v28  ;;  %v7820_v28 = vld [vmem:[%s10587_s9 + $0x140] sm:$0xff] }
 0xacd   : > { %v4449_v7 = vpop.f32.mrf.mxu1 }
 0xace   : > { %v4452_v11 = vpack.c.bf16 %v4449_v7, %v4447_v21  ;;  %v7813_v21 = vld [vmem:[%s10587_s9 + $0x108] sm:$0xff] }
 0xacf   : > { %4980 = vmatpush.bf16.msrb.mxu2 %v7793_v42  ;;  %5227 = vmatpush.bf16.msrb.mxu0 %v7813_v21  ;;  %v7825_v7 = vld [vmem:[%s10587_s9 + $0x168] sm:$0xff] }
 0xad0   : > { %6981 = vmatmul.msk.bf16.vlgmr.msra.gmra.mxu3 %vm4212_vm6, %v4452_v11 }
 0xad1   : > { %4805 = vmatpush.bf16.msra.mxu3 %v7779_v29  ;;  %v7833_v29 = vld [vmem:[%s10587_s9 + $0x1a8] sm:$0xff] }
 0xad2   : > { %5385 = vmatpush.bf16.msra.mxu1 %v7833_v29 }
 0xad3   : > { %4981 = vmatpush.bf16.msrb.mxu2 %v7792_v25  ;;  %5228 = vmatpush.bf16.msrb.mxu0 %v7812_v1  ;;  %v4827_v1 = vld [vmem:[%s10588_s10] sm:$0x1] }
 0xad5   : > { %v4603_v6 = vpop.f32.mrf.mxu1  ;;  %4806 = vmatpush.bf16.msra.mxu3 %v7778_v47  ;;  %v7841_v47 = vld [vmem:[%s10587_s9 + $0x1e8] sm:$0xff] }
 0xad6   : > { %7077 = vmatmul.msk.bf16.vlgmr.msra.gmra.mxu2 %vm4212_vm6, %v4686_v43 }
 0xad7   : > { %4982 = vmatpush.bf16.msrb.mxu2 %v7791_v46 }
 0xad9   : > { %4807 = vmatpush.bf16.msra.mxu3 %v7777_v4  ;;  %v7832_v4 = vld [vmem:[%s10587_s9 + $0x1a0] sm:$0xff] }
 0xada   : > { %5386 = vmatpush.bf16.msra.mxu1 %v7832_v4 }
 0xadb   : > { %4983 = vmatpush.bf16.msrb.mxu2 %v7790_v45 }
 0xadd   : > { %v4605_v63 = vpop.f32.mrf.mxu1  ;;  %4808 = vmatpush.bf16.msra.mxu3 %v7776_v38  ;;  %v7840_v38 = vld [vmem:[%s10587_s9 + $0x1e0] sm:$0xff] }
 0xade   : > { %v4608_v39 = vpack.c.bf16 %v4605_v63, %v4603_v6  ;;  %v7824_v6 = vld [vmem:[%s10587_s9 + $0x160] sm:$0xff]  ;;  %v7823_v63 = vld [vmem:[%s10587_s9 + $0x158] sm:$0xff] }
 0xadf   : > { %4984 = vmatpush.bf16.msrb.mxu2 %v7789_v36  ;;  %v7848_v36 = vld [vmem:[%s10587_s9 + $0x220] sm:$0xff] }
 0xae0   : > { %7045 = vmatmul.msk.bf16.vlgmr.msrb.gmra.mxu3 %vm4212_vm6, %v4608_v39  ;;  %v7831_v39 = vld [vmem:[%s10587_s9 + $0x198] sm:$0xff] }
 0xae1   : > { %5140 = vmatpush.bf16.msrb.mxu3 %v7811_v35  ;;  %5387 = vmatpush.bf16.msra.mxu1 %v7831_v39  ;;  %v7837_v35 = vld [vmem:[%s10587_s9 + $0x1c8] sm:$0xff] }
 0xae3   : > { %4985 = vmatpush.bf16.msrb.mxu2 %v7788_v52 }
 0xae5   : > { %v4759_v58 = vpop.f32.mrf.mxu1  ;;  %5141 = vmatpush.bf16.msrb.mxu3 %v7810_v51  ;;  %5388 = vmatpush.bf16.msra.mxu1 %v7830_v24  ;;  %v7836_v51 = vld [vmem:[%s10587_s9 + $0x1c0] sm:$0xff] }
 0xae7   : > { %5302 = vmatpush.bf16.msra.mxu2 %v7827_v41 }
 0xae9   : > { %5142 = vmatpush.bf16.msrb.mxu3 %v7809_v13  ;;  %5389 = vmatpush.bf16.msra.mxu1 %v7829_v12 }
 0xaeb   : > { %5303 = vmatpush.bf16.msra.mxu2 %v7826_v59 }
 0xaed   : > { %v4761_v15 = vpop.f32.mrf.mxu1  ;;  %5143 = vmatpush.bf16.msrb.mxu3 %v7808_v34  ;;  %5390 = vmatpush.bf16.msra.mxu1 %v7828_v61  ;;  %v7851_v34 = vld [vmem:[%s10587_s9 + $0x238] sm:$0xff] }
 0xaee   : > { %v4764_v27 = vpack.c.bf16 %v4761_v15, %v4759_v58  ;;  %v7839_v15 = vld [vmem:[%s10587_s9 + $0x1d8] sm:$0xff] }
 0xaef   : > { %5304 = vmatpush.bf16.msra.mxu2 %v7825_v7 }
 0xaf0   : > { %7109 = vmatmul.msk.bf16.vlgmr.msra.gmra.mxu3 %vm4212_vm6, %v4764_v27  ;;  %v7822_v27 = vld [vmem:[%s10587_s9 + $0x150] sm:$0xff] }
 0xaf1   : > { %5144 = vmatpush.bf16.msrb.mxu3 %v7807_v56 }
 0xaf3   : > { %5305 = vmatpush.bf16.msra.mxu2 %v7824_v6 }
 0xaf5   : > { %5145 = vmatpush.bf16.msrb.mxu3 %v7806_v30 }
 0xaf7   : > { %5306 = vmatpush.bf16.msra.mxu2 %v7823_v63 }
 0xaf9   : > { %5146 = vmatpush.bf16.msrb.mxu3 %v7805_v10  ;;  %v7847_v10 = vld [vmem:[%s10587_s9 + $0x218] sm:$0xff] }
 0xafb   : > { %5307 = vmatpush.bf16.msra.mxu2 %v7822_v27 }
 0xafd   : > { %5147 = vmatpush.bf16.msrb.mxu3 %v7804_v49 }
 0xaff   : > { %5308 = vmatpush.bf16.msra.mxu2 %v7821_v60 }
 0xb01   : > { %5464 = vmatpush.bf16.msra.mxu3 %v7843_v18  ;;  %v7845_v18 = vld [vmem:[%s10587_s9 + $0x208] sm:$0xff] }
 0xb03   : > { %5309 = vmatpush.bf16.msra.mxu2 %v7820_v28 }
 0xb05   : > { %5465 = vmatpush.bf16.msra.mxu3 %v7842_v44 }
 0xb09   : > { %5466 = vmatpush.bf16.msra.mxu3 %v7841_v47 }
 0xb0d   : > { %5467 = vmatpush.bf16.msra.mxu3 %v7840_v38 }
 0xb11   : > { %5468 = vmatpush.bf16.msra.mxu3 %v7839_v15 }
 0xb15   : > { %5469 = vmatpush.bf16.msra.mxu3 %v7838_v2 }
 0xb19   : > { %5470 = vmatpush.bf16.msra.mxu3 %v7837_v35 }
 0xb1d   : > { %5471 = vmatpush.bf16.msra.mxu3 %v7836_v51 }
 0xb39   : > { %v10394_v62 = vpop.f32.mrf.mxu2 }
 0xb3a   : > { %v4425_v3 = vadd.f32 %v10394_v62, %v10273_v31  ;;  %v7849_v62 = vld [vmem:[%s10587_s9 + $0x228] sm:$0xff] }
 0xb41   : > { %v10435_v33 = vpop.f32.mrf.mxu2 }
 0xb42   : > { %v4426_v23 = vadd.f32 %v10435_v33, %v10288_v20 }
 0xb49   : > { %v4576_v43 = vpop.f32.mrf.mxu2 }
 0xb51   : > { %v4578_v37 = vpop.f32.mrf.mxu2 }
 0xb53   : > { %v4498_v9 = vpop.f32.mrf.mxu3 }
 0xb54   : > { %v4503_v26 = vadd.f32 %v4498_v9, %v4425_v3 }
 0xb56   : > { %v4581_v31 = vadd.f32 %v4576_v43, %v4503_v26 }
 0xb59   : > { %v4732_v42 = vpop.f32.mrf.mxu2 }
 0xb5b   : > { %v10455_v11 = vpop.f32.mrf.mxu3 }
 0xb5c   : > { %v4504_v30 = vadd.f32 %v10455_v11, %v4426_v23 }
 0xb5e   : > { %v4582_v50 = vadd.f32 %v4578_v37, %v4504_v30 }
 0xb61   : > { %v4734_v52 = vpop.f32.mrf.mxu2 }
 0xb63   : > { %v4654_v58 = vpop.f32.mrf.mxu3 }
 0xb64   : > { %v4659_v32 = vadd.f32 %v4654_v58, %v4581_v31 }
 0xb66   : > { %v4737_v19 = vadd.f32 %v4732_v42, %v4659_v32 }
 0xb6b   : > { %v4656_v40 = vpop.f32.mrf.mxu3 }
 0xb6c   : > { %v4660_v20 = vadd.f32 %v4656_v40, %v4582_v50 }
 0xb6e   : > { %v4738_v41 = vadd.f32 %v4734_v52, %v4660_v20 }
 0xb73   : > { %v4810_v13 = vpop.f32.mrf.mxu3 }
 0xb74   : > { %v4815_v53 = vadd.f32 %v4810_v13, %v4737_v19 }
 0xb76   : > { %v4821_v25 = vadd.f32 %v7896_v48, %v4815_v53 }
 0xb78   : > { %v4823_v55 = vmax.f32 %v4821_v25, 0.0 }
 0xb7a   : > { %v4825_v17 = vpack.c.bf16 %v4823_v55, %v4823_v55 }
 0xb7b   : > { %v4812_v54 = vpop.f32.mrf.mxu3 }
 0xb7c   : > { %v4924_v46 = vunpack.c.l.b16 %v4825_v17  ;;  %4900 = vmatmul.bf16.vlgmr.msra.gmra.mxu0 %v4825_v17  ;;  %v4816_v9 = vadd.f32 %v4812_v54, %v4738_v41 }
 0xb7d   : > { %5543 = vmatpush.bf16.msra.mxu0 %v7851_v34 }
 0xb7e   : > { %v4925_v56 = vpack.c.b16 %v4924_v46, %v4924_v46  ;;  %v4822_v33 = vadd.f32 %v7896_v48, %v4816_v9 }
 0xb80   : > { %v4927_v45 = vshrl.u32 %v4925_v56, 16  ;;  %v5009_v16 = vrot.slane %v4925_v56, 1  ;;  %v5171_v5 = vrot.slane %v4925_v56, 2  ;;  %v5333_v0 = vrot.slane %v4925_v56, 3 }
 0xb81   : > { %5544 = vmatpush.bf16.msra.mxu0 %v7850_v57  ;;  %v4824_v21 = vmax.f32 %v4822_v33, 0.0 }
 0xb82   : > { %4986 = vmatmul.bf16.vlgmr.msrb.gmra.mxu2 %v4927_v45  ;;  %5067 = vmatmul.bf16.vlgmr.msrb.gmra.mxu1 %v5009_v16  ;;  %v5090_v14 = vrot.slane %v4927_v45, 1  ;;  %v5252_v49 = vrot.slane %v4927_v45, 2  ;;  %v5414_v59 = vrot.slane %v4927_v45, 3 }
 0xb83   : > { %v4826_v44 = vpack.c.bf16 %v4824_v21, %v4824_v21 }
 0xb84   : > { %5148 = vmatmul.bf16.vlgmr.msrb.gmra.mxu3 %v5090_v14 }
 0xb85   : > { %5545 = vmatpush.bf16.msra.mxu0 %v7849_v62 }
 0xb89   : > { %5546 = vmatpush.bf16.msra.mxu0 %v7848_v36 }
 0xb8c   : > { %5229 = vmatmul.bf16.vlgmr.msrb.gmra.mxu0 %v5171_v5 }
 0xb8d   : > { %5547 = vmatpush.bf16.msra.mxu0 %v7847_v10 }
 0xb91   : > { %5548 = vmatpush.bf16.msra.mxu0 %v7846_v22 }
 0xb92   : > { %5310 = vmatmul.bf16.vlgmr.msra.gmra.mxu2 %v5252_v49  ;;  %5391 = vmatmul.bf16.vlgmr.msra.gmra.mxu1 %v5333_v0 }
 0xb94   : > { %5472 = vmatmul.bf16.vlgmr.msra.gmra.mxu3 %v5414_v59 }
 0xb95   : > { %5549 = vmatpush.bf16.msra.mxu0 %v7845_v18 }
 0xb99   : > { %5550 = vmatpush.bf16.msra.mxu0 %v7844_v8 }
 0xb9c   : > { %5551 = vmatmul.bf16.vlgmr.msra.gmra.mxu0 %v4826_v44 }
 0xbf9   : > { %v4901_v7 = vpop.f32.mrf.mxu0 }
 0xbfa   : > { %v4905_v43 = vadd.f32 %v4901_v7, %v4827_v1 }
 0xbff   : > { %v5068_v29 = vpop.f32.mrf.mxu1 }
 0xc01   : > { %v4903_v11 = vpop.f32.mrf.mxu0 }
 0xc05   : > { %v4987_v47 = vpop.f32.mrf.mxu2 }
 0xc06   : > { %v4991_v38 = vadd.f32 %v4987_v47, %v4905_v43 }
 0xc07   : > { %v5070_v6 = vpop.f32.mrf.mxu1  ;;  %v5149_v4 = vpop.f32.mrf.mxu3 }
 0xc08   : > { %v5072_v39 = vadd.f32 %v5068_v29, %v4991_v38 }
 0xc09   : > { %v5230_v63 = vpop.f32.mrf.mxu0 }
 0xc0a   : > { %v5153_v24 = vadd.f32 %v5149_v4, %v5072_v39 }
 0xc0c   : > { %v5234_v2 = vadd.f32 %v5230_v63, %v5153_v24 }
 0xc0d   : > { %v4989_v58 = vpop.f32.mrf.mxu2 }
 0xc0f   : > { %v5151_v15 = vpop.f32.mrf.mxu3  ;;  %v5392_v27 = vpop.f32.mrf.mxu1 }
 0xc11   : > { %v5232_v3 = vpop.f32.mrf.mxu0 }
 0xc15   : > { %v5311_v37 = vpop.f32.mrf.mxu2 }
 0xc16   : > { %v5315_v26 = vadd.f32 %v5311_v37, %v5234_v2 }
 0xc17   : > { %v5394_v60 = vpop.f32.mrf.mxu1  ;;  %v5473_v12 = vpop.f32.mrf.mxu3 }
 0xc18   : > { %v5396_v40 = vadd.f32 %v5392_v27, %v5315_v26 }
 0xc19   : > { %v5552_v31 = vpop.f32.mrf.mxu0 }
 0xc1a   : > { %v5477_v35 = vadd.f32 %v5473_v12, %v5396_v40 }
 0xc1c   : > { %v5556_v28 = vadd.f32 %v5552_v31, %v5477_v35 }
 0xc1d   : > { %v5313_v61 = vpop.f32.mrf.mxu2 }
 0xc1e   : > { %v5558_v32 = vsel %vm5557_vm7, %v5556_v28, -inf }
 0xc1f   : > { %v5475_v51 = vpop.f32.mrf.mxu3  ;;  %5559 = vmax.xlane.f32.xlu0 %v5558_v32 }
 0xc21   : > { %v5554_v42 = vpop.f32.mrf.mxu0 }
 0xc92   : > { %v5560_v19 = vpop.xlane.xlu0 %5559 }
 0xc93   : > { %v5561_v48 = vsub.f32 %v5556_v28, %v5560_v19 }
 0xc95   : > { %v5562_v13 = vmul.f32 1.442695, %v5561_v48 }
 0xc97   : > { %7897 = vpow2.f32 %v5562_v13 }
 0xc9d   : > { %v7898_v53 = vpop.eup %7897 }
 0xc9e   : > { %v5564_v25 = vsel %vm5557_vm7, %v7898_v53, 0.0 }
 0xc9f   : > { %5565 = vadd.xlane.f32.xlu0 %v5564_v25 }
 0xd12   : > { %v5566_v55 = vpop.xlane.xlu0 %5565 }
 0xd13   : > { %7899 = vrcp.f32 %v5566_v55  ;;  %v5578_v57 = vand.u32 2147483648, %v5566_v55  ;;  %v5576_v23 = vand.u32 2147483647, %v5566_v55  ;;  %vm5572_vm9 = vweird.f32 %v5566_v55 }
 0xd15   : > { %v5579_v16 = vor.u32 1.1754944e-38, %v5578_v57  ;;  %vm5577_vm11 = vcmp.eq.f32.partialorder %v5576_v23, 8.507059e+37 }
 0xd19   : > { %v7900_v34 = vpop.eup %7899 }
 0xd1a   : > { %v5568_v17 = vmul.f32 %v7900_v34, %v5566_v55  ;;  %vm5573_vm8 = vweird.f32 %v7900_v34 }
 0xd1b   : > { %vm5574_vm10 = vmor %vm5572_vm9, %vm5573_vm8 }
 0xd1c   : > { %v5569_v46 = vsub.f32 1.0, %v5568_v17 }
 0xd1e   : > { %v5570_v56 = vmul.f32 %v7900_v34, %v5569_v46 }
 0xd20   : > { %v5571_v45 = vadd.f32 %v7900_v34, %v5570_v56 }
 0xd22   : > { %v5575_v62 = vsel %vm5574_vm10, %v7900_v34, %v5571_v45 }
 0xd23   : > { %v5580_v30 = vsel %vm5577_vm11, %v5579_v16, %v5575_v62 }
 0xd24   : > { %v5581_v14 = vmul.f32 %v7898_v53, %v5580_v30 }
 0xd26   : > { %5582 = vst.msk [vmem:[%s378_s15] sm:$0x1] %vm5557_vm7, %v5581_v14 }
 0xd27   : > { %7928 = shalt.err (!%p7925_p3)
}
 0xd28   : > { %7854 = dma.vmem_to_hbm [thread:$0]  (%p8064_p5), %s5595_s16, 16, %s5597_s22, %s5584_s24  }
 0xd29 PF: > { %p7860_p4 = scmp.ge.s32.totalorder %s7963_s20, 2  ;;  %s5608_s30 = sand.u32 1, %s7951_s17  }
 0xd2a   : > { %s5609_s15 = scalar_lea.sflag [#allocation3], %s5608_s30 }
 0xd2b   : > { %p7857_p7 = pnand %p7860_p4, %p8068_p6 }
 0xd2d   : > { %p7858_p8 = pneg %p7857_p7 }
 0xd2f   : > { %7946 = dma.done.wait (%p7858_p8), %s5609_s15, 16  }
 0xd30   : > { %7948 = vsyncadd (%p7858_p8), %s5609_s15, 4294967280  ;;  %p21_p9 = scmp.ge.s32.totalorder %s8051_s23, 4   ;;  %s10670_s17 = smov %s7955_s18 }
 0xd31   : > { %s10671_s18 = smov %s7959_s19  ;;  %s10672_s19 = smov %s8062_s26 }
 0xd32   : > { %s10673_s20 = smov %s8051_s23  ;;  %23 = sbr.rel (!%p21_p9) target bundleno = 5 (0x5), region = 139 }
 0xd37   :  { %5614 = vsyncpa [#allocation3], 1 }
 0xd38   :  { %5616 = vsyncpa [#allocation3 + $0x1], 1 }

</bundles_post_ra>
